<compile_context>
chip_gen: v6e
topology: v6e:2x2x1
jax: 0.10.0
libtpu: 0.0.40
codegen_flags: <defaults>
</compile_context>

<pallas_src>
import functools

import jax
import jax.numpy as jnp
from jax.experimental import pallas as pl
from jax.experimental.pallas import tpu as pltpu

# ---------------------------------------------------------------------------
# model hyper-parameters (match the nn.Module defaults)
# ---------------------------------------------------------------------------
NODE_IN = 4        # node_input_dim
EDGE_IN = 4        # edge_input_dim
D = 8              # gnn_node_output_dim
EH = 16            # gnn_edge_hidden_dim
NUM_STEPS = 3      # num_step_message_passing
RH = 8             # readout_node_hidden_dim
RO = 8             # readout_node_output_dim
OUT = 1            # output_dim
LANES = 128        # lane width


# ---------------------------------------------------------------------------
# plain-JAX reference of the ORIGINAL (unfused) math — ground truth for checks
# ---------------------------------------------------------------------------
def _mpnn_math(x, edge_attr, S_src, A_dst, P_mean, params, num_steps):
    (wp, bp, we1, be1, we2, be2, wroot, bconv,
     wir, wiz, win, whr, whz, whn,
     bir, biz, bin_, bhr, bhz, bhn,
     wr1, br1, wr2, br2, wout, bout) = params

    dot = lambda a, b: jnp.dot(a, b, preferred_element_type=jnp.float32)

    h = jnp.maximum(dot(x, wp) + bp, 0.0)

    e_hid = jnp.maximum(dot(edge_attr, we1) + be1, 0.0)
    e_w = dot(e_hid, we2) + be2
    e_w = e_w.reshape(edge_attr.shape[0], D, D)

    hidden = h
    for _ in range(num_steps):
        h_src = dot(S_src, h)                                 # gather x[src]
        msg = jnp.sum(h_src[:, :, None] * e_w, axis=1)        # per-edge matvec
        agg = dot(A_dst, msg)                                 # scatter-add
        m = jnp.maximum(dot(h, wroot) + agg + bconv, 0.0)

        r = jax.nn.sigmoid(dot(m, wir) + bir + dot(hidden, whr) + bhr)
        z = jax.nn.sigmoid(dot(m, wiz) + biz + dot(hidden, whz) + bhz)
        n = jnp.tanh(dot(m, win) + bin_ + r * (dot(hidden, whn) + bhn))
        hidden = (1.0 - z) * n + z * hidden
        h = hidden

    hr = jnp.maximum(dot(h, wr1) + br1, 0.0)
    hr = dot(hr, wr2) + br2
    g = dot(P_mean, hr)
    return dot(g, wout) + bout


# ---------------------------------------------------------------------------
# packing helpers: many small arrays -> one [R, 128] buffer (one DMA each)
# ---------------------------------------------------------------------------
def _row_offsets(items):
    """items: [(name, (rows, cols))] -> ({name: (row0, rows, cols)}, total_rows)."""
    off, row = {}, 0
    for name, (r, c) in items:
        assert c <= LANES, name
        off[name] = (row, r, c)
        row += -(-r // 8) * 8            # 8-sublane aligned chunks
    return off, row


def _fill(buf, off, name, arr):
    r0, r, c = off[name]
    return buf.at[..., r0:r0 + r, 0:c].set(arr)


def _kron_i(w, n):
    """kron(w, I_n): feature-major expansion of a per-node linear map."""
    return jnp.kron(jnp.asarray(w, jnp.float32), jnp.eye(n, dtype=jnp.float32))


def _rep_fm(b, n):
    """feature-major bias: out[0, i*n + u] = b[0, i]."""
    return jnp.repeat(jnp.asarray(b, jnp.float32), n, axis=1)


# ---------------------------------------------------------------------------
# Pallas kernel: one graph problem per grid step, everything resident in VMEM
# ---------------------------------------------------------------------------
def mpnn_kernel(wbuf_ref, whi_ref, gbuf_ref, sbuf_ref, out_ref, *,
                woff, goff, n_nodes, n_edges, num_steps):
    f32 = jnp.float32
    dot = lambda a, b: jnp.dot(a, b, preferred_element_type=f32)
    dn = n_nodes * D          # flat feature-major state width (== 128)
    ed = n_edges * D          # row-expanded edge count

    def wld(name):
        r0, nr, nc = woff[name]
        return wbuf_ref[r0:r0 + nr, 0:nc]

    def gld(name):
        r0, nr, nc = goff[name]
        return gbuf_ref[0, r0:r0 + nr, 0:nc]

    # ---- shared (problem-independent) weights -----------------------------
    wp_fm, bp_fm = wld("wp_fm"), wld("bp_fm")
    we1_exp, be1_exp = wld("we1_exp"), wld("be1_exp")
    r_exp, sel_mask = wld("r_exp"), wld("sel_mask")
    we2_rxn, be2_exp = wld("we2_rxn"), wld("be2_exp")
    wr1_fm, br1_fm = wld("wr1_fm"), wld("br1_fm")
    wr2_fm, br2_fm = wld("wr2_fm"), wld("br2_fm")
    b_fin = wld("b_fin")
    b_m, b_r, b_z = wld("b_m"), wld("b_r"), wld("b_z")
    b_in, b_hn = wld("b_in"), wld("b_hn")
    w_h = whi_ref[:, 0:4 * dn]          # [dn, 4*dn] = [root | hr | hz | hn]
    w_i = whi_ref[:, 4 * dn:7 * dn]     # [dn, 3*dn] = [ir | iz | in]

    # ---- per-problem data --------------------------------------------------
    x_flat = gld("x_flat")              # [1, NODE_IN*N] (feature-major)
    edge_attr = gld("edge_attr")        # [E, EDGE_IN]
    w_fin = gld("w_fin")                # [RO*N, 128]  (pool + predict, padded)
    dst_exp = sbuf_ref[0, 0:ed, :].astype(f32)           # [E*D, D*N] 0/1 mask

    # 1) project node features:  h[0, i*N+u] = ReLU(x @ wp + bp)[u, i]
    h = jnp.maximum(dot(x_flat, wp_fm) + bp_fm, 0.0)                 # [1, dn]

    # 2) edge network, produced directly in (e,i)-row / (j,v)-column layout
    e_hid = jnp.maximum(dot(edge_attr, we1_exp) + be1_exp, 0.0)      # [E, D*EH]
    lhs = dot(r_exp, e_hid) * sel_mask                               # [E*D, D*EH]
    ew_exp = dot(lhs, we2_rxn) + be2_exp                             # [E*D, D*N]

    # 3) fold gather + per-edge matvec + scatter-add into one dense operator
    #    m_op[i*N+u, j*N+v] = sum_{e: src=u, dst=v} ew[e, i, j]
    t = ew_exp * dst_exp                                             # [E*D, D*N]
    n_chunk = ed // LANES
    m_op = dot(sbuf_ref[0, ed:ed + dn, :].astype(f32), t[0:LANES, :])
    for c in range(1, n_chunk):
        src_c = sbuf_ref[0, ed + c * dn:ed + (c + 1) * dn, :].astype(f32)
        m_op = m_op + dot(src_c, t[c * LANES:(c + 1) * LANES, :])

    # 4) message passing: 3 lane-dense matmuls + VPU/EUP gates per step,
    #    no relayouts, all gate slices 128-lane aligned
    hidden = h
    for _ in range(num_steps):
        gh = dot(hidden, w_h)                                        # [1, 4*dn]
        agg = dot(hidden, m_op)                                      # [1, dn]
        m = jnp.maximum(gh[:, 0:dn] + agg + b_m, 0.0)                # NNConv+ReLU
        gi = dot(m, w_i)                                             # [1, 3*dn]
        r = jax.nn.sigmoid(gi[:, 0:dn] + gh[:, dn:2 * dn] + b_r)
        z = jax.nn.sigmoid(gi[:, dn:2 * dn] + gh[:, 2 * dn:3 * dn] + b_z)
        n = jnp.tanh(gi[:, 2 * dn:3 * dn] + b_in
                     + r * (gh[:, 3 * dn:4 * dn] + b_hn))
        hidden = (1.0 - z) * n + z * hidden

    # 5) readout MLP + mean pool + predict (folded into w_fin); dense store
    hr = jnp.maximum(dot(hidden, wr1_fm) + br1_fm, 0.0)              # [1, RH*N]
    hr = dot(hr, wr2_fm) + br2_fm                                    # [1, RO*N]
    row = dot(hr, w_fin) + b_fin                                     # [1, 128]
    out_ref[0, :, :] = jnp.broadcast_to(row, (8, LANES))


# ---------------------------------------------------------------------------
# per-problem structural operators (vmapped over the batch)
# ---------------------------------------------------------------------------
def _prep_graph(x_b, ei_b, batch_b, *, wout, num_graphs):
    n = x_b.shape[0]
    e = ei_b.shape[1]
    x_flat = x_b.T.reshape(1, -1)                                     # [1, F*N]
    src_oh = jax.nn.one_hot(ei_b[0], n, dtype=jnp.float32)            # [E, N]
    dst_oh = jax.nn.one_hot(ei_b[1], n, dtype=jnp.float32)            # [E, N]
    # dst broadcast mask: [(e,i), (j,v)] = dst_oh[e, v]
    dst_exp = jnp.tile(jnp.repeat(dst_oh, D, axis=0), (1, D))         # [E*D, D*N]
    # src scatter operator (feature-major): [(i,u), (e,i')] = [i==i']*src_oh[e,u]
    eye_d = jnp.eye(D, dtype=jnp.float32)
    src_op = (eye_d[:, None, None, :]
              * src_oh.T[None, :, :, None]).reshape(D * n, D * e)     # [D*N, E*D]
    # mean pooling + final Linear folded into one [RO*N, G*OUT] matrix
    pool = jax.nn.one_hot(batch_b, num_graphs, dtype=jnp.float32).T   # [G, N]
    p_mean = pool / jnp.maximum(pool.sum(axis=1, keepdims=True), 1.0)
    wf = (jnp.asarray(wout, jnp.float32)[:, None, None, :]
          * p_mean.T[None, :, :, None]).reshape(RO * n, num_graphs * OUT)
    w_fin = jnp.zeros((RO * n, LANES),
                      jnp.float32).at[:, :num_graphs * OUT].set(wf)
    return x_flat, dst_exp, src_op, w_fin


# ---------------------------------------------------------------------------
# wrapper: B independent graph problems -> one pallas_call with grid=(B,)
# ---------------------------------------------------------------------------
def mpnn_forward_batched(x, edge_index, edge_attr, batch, num_graphs, params):
    (wp, bp, we1, be1, we2, be2, wroot, bconv,
     wir, wiz, win, whr, whz, whn,
     bir, biz, bin_, bhr, bhz, bhn,
     wr1, br1, wr2, br2, wout, bout) = params

    bsz, n_nodes, _ = x.shape
    n_edges = edge_attr.shape[1]
    dn, ed = n_nodes * D, n_edges * D
    assert dn == LANES and ed % LANES == 0, "dense path needs D*N==128, E*D%128==0"

    f32 = jnp.float32

    # ---- shared weight prep (feature-major kron expansion / gate fusion) ---
    wp_fm = _kron_i(wp, n_nodes)                                       # [F*N, D*N]
    bp_fm = _rep_fm(bp, n_nodes)
    we1_exp = jnp.tile(jnp.asarray(we1, f32), (1, D))                  # [F_e, D*EH]
    be1_exp = jnp.tile(jnp.asarray(be1, f32), (1, D))
    r_exp = jnp.repeat(jnp.eye(n_edges, dtype=f32), D, axis=0)         # [E*D, E]
    sel_mask = jnp.tile(jnp.repeat(jnp.eye(D, dtype=f32), EH, axis=1),
                        (n_edges, 1))                                  # [E*D, D*EH]
    w2 = jnp.asarray(we2, f32).reshape(EH, D, D).transpose(1, 0, 2)
    we2_rxn = jnp.repeat(w2.reshape(D * EH, D), n_nodes, axis=1)       # [D*EH, D*N]
    be2_exp = jnp.tile(jnp.repeat(jnp.asarray(be2, f32).reshape(D, D),
                                  n_nodes, axis=1), (n_edges, 1))      # [E*D, D*N]
    w_h_fm = jnp.concatenate([_kron_i(w, n_nodes)
                              for w in (wroot, whr, whz, whn)], axis=1)
    w_i_fm = jnp.concatenate([_kron_i(w, n_nodes)
                              for w in (wir, wiz, win)], axis=1)
    whi = jnp.concatenate([w_h_fm, w_i_fm], axis=1)                    # [D*N, 7*D*N]
    wr1_fm, br1_fm = _kron_i(wr1, n_nodes), _rep_fm(br1, n_nodes)
    wr2_fm, br2_fm = _kron_i(wr2, n_nodes), _rep_fm(br2, n_nodes)
    b_fin = jnp.zeros((1, LANES), f32).at[:, :num_graphs * OUT].set(
        jnp.tile(jnp.asarray(bout, f32), (1, num_graphs)))

    witems = [
        ("wp_fm", wp_fm), ("bp_fm", bp_fm),
        ("we1_exp", we1_exp), ("be1_exp", be1_exp),
        ("r_exp", r_exp), ("sel_mask", sel_mask),
        ("we2_rxn", we2_rxn), ("be2_exp", be2_exp),
        ("wr1_fm", wr1_fm), ("br1_fm", br1_fm),
        ("wr2_fm", wr2_fm), ("br2_fm", br2_fm),
        ("b_fin", b_fin),
        ("b_m", _rep_fm(bconv, n_nodes)),
        ("b_r", _rep_fm(bir + bhr, n_nodes)),
        ("b_z", _rep_fm(biz + bhz, n_nodes)),
        ("b_in", _rep_fm(bin_, n_nodes)),
        ("b_hn", _rep_fm(bhn, n_nodes)),
    ]
    woff, rw = _row_offsets([(k, v.shape) for k, v in witems])
    wbuf = jnp.zeros((rw, LANES), f32)
    for k, v in witems:
        wbuf = _fill(wbuf, woff, k, v)

    # ---- per-problem data (vmapped structural prep) -------------------------
    prep = functools.partial(_prep_graph, wout=wout, num_graphs=num_graphs)
    x_flat, dst_exp, src_op, w_fin = jax.vmap(prep)(x, edge_index, batch)

    gitems = [("x_flat", (1, n_nodes * NODE_IN)),
              ("edge_attr", (n_edges, EDGE_IN)),
              ("w_fin", (RO * n_nodes, LANES))]
    goff, rg = _row_offsets(gitems)
    gbuf = jnp.zeros((bsz, rg, LANES), f32)
    gbuf = _fill(gbuf, goff, "x_flat", x_flat)
    gbuf = _fill(gbuf, goff, "edge_attr", edge_attr.astype(f32))
    gbuf = _fill(gbuf, goff, "w_fin", w_fin)

    # 0/1 structural operators: exact in bf16 -> half the per-problem DMA
    n_chunk = ed // LANES
    rs = ed + n_chunk * dn
    sbuf = jnp.zeros((bsz, rs, LANES), jnp.bfloat16)
    sbuf = sbuf.at[:, 0:ed, :].set(dst_exp.astype(jnp.bfloat16))
    for c in range(n_chunk):
        sbuf = sbuf.at[:, ed + c * dn:ed + (c + 1) * dn, :].set(
            src_op[:, :, c * LANES:(c + 1) * LANES].astype(jnp.bfloat16))

    kernel = functools.partial(mpnn_kernel, woff=woff, goff=goff,
                               n_nodes=n_nodes, n_edges=n_edges,
                               num_steps=NUM_STEPS)
    out_padded = pl.pallas_call(
        kernel,
        out_shape=jax.ShapeDtypeStruct((bsz, 8, LANES), f32),
        grid=(bsz,),
        in_specs=[
            pl.BlockSpec((rw, LANES), lambda b: (0, 0)),          # shared weights
            pl.BlockSpec((dn, 7 * dn), lambda b: (0, 0)),         # fused conv/GRU weights
            pl.BlockSpec((1, rg, LANES), lambda b: (b, 0, 0)),    # per-problem f32 data
            pl.BlockSpec((1, rs, LANES), lambda b: (b, 0, 0)),    # per-problem bf16 structural
        ],
        out_specs=pl.BlockSpec((1, 8, LANES), lambda b: (b, 0, 0)),
        compiler_params=pltpu.CompilerParams(
            dimension_semantics=("parallel",)),
    )(wbuf, whi, gbuf, sbuf)
    return out_padded[:, 0, :num_graphs * OUT].reshape(bsz, num_graphs, OUT)


mpnn_forward_batched_jit = jax.jit(mpnn_forward_batched, static_argnums=(4,))


def mpnn_forward(x, edge_index, edge_attr, batch, num_graphs, params):
    """Single-problem entry point matching MPNN.forward(x, edge_index, edge_attr, batch)."""
    out = mpnn_forward_batched_jit(x[None], edge_index[None], edge_attr[None],
                                   batch[None], num_graphs, params)
    return out[0]


# ---------------------------------------------------------------------------
# deterministic parameter init (PyTorch-Linear-style uniform(-1/sqrt(fan_in)))
# ---------------------------------------------------------------------------
def _init_linear(key, fan_in, fan_out):
    kw, kb = jax.random.split(key)
    bound = float(fan_in) ** -0.5
    w = jax.random.uniform(kw, (fan_in, fan_out), jnp.float32, -bound, bound)
    b = jax.random.uniform(kb, (1, fan_out), jnp.float32, -bound, bound)
    return w, b


def make_params(key):
    keys = jax.random.split(key, 12)
    wp, bp = _init_linear(keys[0], NODE_IN, D)            # project_node_feats
    we1, be1 = _init_linear(keys[1], EDGE_IN, EH)         # edge network layer 1
    we2, be2 = _init_linear(keys[2], EH, D * D)           # edge network layer 2
    wroot, bconv = _init_linear(keys[3], D, D)            # NNConv root + bias
    wir, bir = _init_linear(keys[4], D, D)                # GRU input->reset
    wiz, biz = _init_linear(keys[5], D, D)                # GRU input->update
    win, bin_ = _init_linear(keys[6], D, D)               # GRU input->new
    whr, bhr = _init_linear(keys[7], D, D)                # GRU hidden->reset
    whz, bhz = _init_linear(keys[8], D, D)                # GRU hidden->update
    whn, bhn = _init_linear(keys[9], D, D)                # GRU hidden->new
    wr1, br1 = _init_linear(keys[10], D, RH)              # readout MLP layer 1
    wr2, br2 = _init_linear(keys[11], RH, RO)             # readout MLP layer 2
    wout, bout = _init_linear(jax.random.fold_in(key, 99), RO, OUT)  # predict
    return (wp, bp, we1, be1, we2, be2, wroot, bconv,
            wir, wiz, win, whr, whz, whn,
            bir, biz, bin_, bhr, bhz, bhn,
            wr1, br1, wr2, br2, wout, bout)


# ---------------------------------------------------------------------------
# main
# ---------------------------------------------------------------------------
if __name__ == "__main__":
    B = 8                                        # independent graph problems
    N_NODES, N_EDGES, N_GRAPHS = 16, 32, 2       # 8 nodes / 16 edges per graph

    root = jax.random.PRNGKey(0)
    kx, ke, ks0, kd0, kp = jax.random.split(root, 5)

    x = jax.random.normal(kx, (B, N_NODES, NODE_IN), jnp.float32)
    edge_attr = jax.random.normal(ke, (B, N_EDGES, EDGE_IN), jnp.float32)

    half_n, half_e = N_NODES // 2, N_EDGES // 2
    src = jnp.concatenate(
        [jax.random.randint(ks0, (B, half_e), 0, half_n),
         jax.random.randint(jax.random.fold_in(ks0, 1), (B, half_e), 0, half_n)
         + half_n], axis=1)
    dst = jnp.concatenate(
        [jax.random.randint(kd0, (B, half_e), 0, half_n),
         jax.random.randint(jax.random.fold_in(kd0, 1), (B, half_e), 0, half_n)
         + half_n], axis=1)
    edge_index = jnp.stack([src, dst], axis=1).astype(jnp.int32)      # [B, 2, E]
    batch = jnp.tile(jnp.concatenate([jnp.zeros(half_n, jnp.int32),
                                      jnp.ones(half_n, jnp.int32)])[None],
                     (B, 1))                                          # [B, N]

    params = make_params(kp)

    # run the Pallas kernel (whole batch in one pallas_call, grid over B)
    out = mpnn_forward_batched_jit(x, edge_index, edge_attr, batch,
                                   N_GRAPHS, params)
    out = jax.block_until_ready(out)

    # sanity-check against the plain-JAX reference of the ORIGINAL math
    refs = []
    for b in range(B):
        S_src = jax.nn.one_hot(edge_index[b, 0], N_NODES, dtype=jnp.float32)
        A_dst = jax.nn.one_hot(edge_index[b, 1], N_NODES, dtype=jnp.float32).T
        P_oh = jax.nn.one_hot(batch[b], N_GRAPHS, dtype=jnp.float32).T
        P_mean = P_oh / jnp.maximum(P_oh.sum(axis=1, keepdims=True), 1.0)
        refs.append(_mpnn_math(x[b], edge_attr[b], S_src, A_dst, P_mean,
                               params, NUM_STEPS))
    ref = jnp.stack(refs)

    assert out.shape == (B, N_GRAPHS, OUT)
    assert jnp.allclose(out, ref, atol=2e-3, rtol=2e-3), (out, ref)

    print("KERNEL_OK")
</pallas_src>

<mosaic_0001>
module attributes {stable_mosaic.version = 11 : i64} {
  func.func @mpnn_kernel(%arg0: i32, %arg1: memref<1304x128xf32, #tpu.memory_space<vmem>>, %arg2: memref<128x896xf32, #tpu.memory_space<vmem>>, %arg3: memref<1x168x128xf32, #tpu.memory_space<vmem>>, %arg4: memref<1x512x128xbf16, #tpu.memory_space<vmem>>, %arg5: memref<1x8x128xf32, #tpu.memory_space<vmem>>) attributes {dimension_semantics = [#tpu.dimension_semantics<parallel>], iteration_bounds = array<i64: 8>, scalar_prefetch = 0 : i64, scratch_operands = 0 : i64, tpu.core_type = #tpu.core_type<tc>, window_params = [{pipeline_mode = #tpu.pipeline_mode<synchronous>, transform_indices = @transform_0, window_bounds = array<i64: 1304, 128>}, {pipeline_mode = #tpu.pipeline_mode<synchronous>, transform_indices = @transform_1, window_bounds = array<i64: 128, 896>}, {transform_indices = @transform_2, window_bounds = array<i64: 1, 168, 128>}, {transform_indices = @transform_3, window_bounds = array<i64: 1, 512, 128>}, {transform_indices = @transform_4, window_bounds = array<i64: 1, 8, 128>}]} {
    %c0 = arith.constant 0 : index
    %c0_0 = arith.constant 0 : index
    %0 = vector.load %arg1[%c0, %c0_0] : memref<1304x128xf32, #tpu.memory_space<vmem>>, vector<64x128xf32>
    %c64 = arith.constant 64 : index
    %c0_1 = arith.constant 0 : index
    %1 = vector.load %arg1[%c64, %c0_1] : memref<1304x128xf32, #tpu.memory_space<vmem>>, vector<1x128xf32>
    %c72 = arith.constant 72 : index
    %c0_2 = arith.constant 0 : index
    %2 = vector.load %arg1[%c72, %c0_2] : memref<1304x128xf32, #tpu.memory_space<vmem>>, vector<4x128xf32>
    %c80 = arith.constant 80 : index
    %c0_3 = arith.constant 0 : index
    %3 = vector.load %arg1[%c80, %c0_3] : memref<1304x128xf32, #tpu.memory_space<vmem>>, vector<1x128xf32>
    %c88 = arith.constant 88 : index
    %c0_4 = arith.constant 0 : index
    %4 = vector.load %arg1[%c88, %c0_4] : memref<1304x128xf32, #tpu.memory_space<vmem>>, vector<256x32xf32>
    %c344 = arith.constant 344 : index
    %c0_5 = arith.constant 0 : index
    %5 = vector.load %arg1[%c344, %c0_5] : memref<1304x128xf32, #tpu.memory_space<vmem>>, vector<256x128xf32>
    %c600 = arith.constant 600 : index
    %c0_6 = arith.constant 0 : index
    %6 = vector.load %arg1[%c600, %c0_6] : memref<1304x128xf32, #tpu.memory_space<vmem>>, vector<128x128xf32>
    %c728 = arith.constant 728 : index
    %c0_7 = arith.constant 0 : index
    %7 = vector.load %arg1[%c728, %c0_7] : memref<1304x128xf32, #tpu.memory_space<vmem>>, vector<256x128xf32>
    %c984 = arith.constant 984 : index
    %c0_8 = arith.constant 0 : index
    %8 = vector.load %arg1[%c984, %c0_8] : memref<1304x128xf32, #tpu.memory_space<vmem>>, vector<128x128xf32>
    %c1112 = arith.constant 1112 : index
    %c0_9 = arith.constant 0 : index
    %9 = vector.load %arg1[%c1112, %c0_9] : memref<1304x128xf32, #tpu.memory_space<vmem>>, vector<1x128xf32>
    %c1120 = arith.constant 1120 : index
    %c0_10 = arith.constant 0 : index
    %10 = vector.load %arg1[%c1120, %c0_10] : memref<1304x128xf32, #tpu.memory_space<vmem>>, vector<128x128xf32>
    %c1248 = arith.constant 1248 : index
    %c0_11 = arith.constant 0 : index
    %11 = vector.load %arg1[%c1248, %c0_11] : memref<1304x128xf32, #tpu.memory_space<vmem>>, vector<1x128xf32>
    %c1256 = arith.constant 1256 : index
    %c0_12 = arith.constant 0 : index
    %12 = vector.load %arg1[%c1256, %c0_12] : memref<1304x128xf32, #tpu.memory_space<vmem>>, vector<1x128xf32>
    %c1264 = arith.constant 1264 : index
    %c0_13 = arith.constant 0 : index
    %13 = vector.load %arg1[%c1264, %c0_13] : memref<1304x128xf32, #tpu.memory_space<vmem>>, vector<1x128xf32>
    %c1272 = arith.constant 1272 : index
    %c0_14 = arith.constant 0 : index
    %14 = vector.load %arg1[%c1272, %c0_14] : memref<1304x128xf32, #tpu.memory_space<vmem>>, vector<1x128xf32>
    %c1280 = arith.constant 1280 : index
    %c0_15 = arith.constant 0 : index
    %15 = vector.load %arg1[%c1280, %c0_15] : memref<1304x128xf32, #tpu.memory_space<vmem>>, vector<1x128xf32>
    %c1288 = arith.constant 1288 : index
    %c0_16 = arith.constant 0 : index
    %16 = vector.load %arg1[%c1288, %c0_16] : memref<1304x128xf32, #tpu.memory_space<vmem>>, vector<1x128xf32>
    %c1296 = arith.constant 1296 : index
    %c0_17 = arith.constant 0 : index
    %17 = vector.load %arg1[%c1296, %c0_17] : memref<1304x128xf32, #tpu.memory_space<vmem>>, vector<1x128xf32>
    %c0_18 = arith.constant 0 : index
    %c0_19 = arith.constant 0 : index
    %18 = vector.load %arg2[%c0_18, %c0_19] : memref<128x896xf32, #tpu.memory_space<vmem>>, vector<128x512xf32>
    %c0_20 = arith.constant 0 : index
    %c512 = arith.constant 512 : index
    %19 = vector.load %arg2[%c0_20, %c512] : memref<128x896xf32, #tpu.memory_space<vmem>>, vector<128x384xf32>
    %c0_21 = arith.constant 0 : index
    %c0_22 = arith.constant 0 : index
    %c0_23 = arith.constant 0 : index
    %20 = vector.load %arg3[%c0_21, %c0_22, %c0_23] : memref<1x168x128xf32, #tpu.memory_space<vmem>>, vector<1x1x64xf32>
    %21 = vector.shape_cast %20 : vector<1x1x64xf32> to vector<1x64xf32>
    %c0_24 = arith.constant 0 : index
    %c8 = arith.constant 8 : index
    %c0_25 = arith.constant 0 : index
    %22 = vector.load %arg3[%c0_24, %c8, %c0_25] : memref<1x168x128xf32, #tpu.memory_space<vmem>>, vector<1x32x4xf32>
    %23 = vector.shape_cast %22 : vector<1x32x4xf32> to vector<32x4xf32>
    %c0_26 = arith.constant 0 : index
    %c40 = arith.constant 40 : index
    %c0_27 = arith.constant 0 : index
    %24 = vector.load %arg3[%c0_26, %c40, %c0_27] : memref<1x168x128xf32, #tpu.memory_space<vmem>>, vector<1x128x128xf32>
    %25 = vector.shape_cast %24 : vector<1x128x128xf32> to vector<128x128xf32>
    %c0_28 = arith.constant 0 : index
    %c0_29 = arith.constant 0 : index
    %c0_30 = arith.constant 0 : index
    %26 = vector.load %arg4[%c0_28, %c0_29, %c0_30] : memref<1x512x128xbf16, #tpu.memory_space<vmem>>, vector<1x256x128xbf16>
    %27 = vector.shape_cast %26 : vector<1x256x128xbf16> to vector<256x128xbf16>
    %28 = arith.extf %27 : vector<256x128xbf16> to vector<256x128xf32>
    %cst = arith.constant dense<0.000000e+00> : vector<1x128xf32>
    %29 = tpu.matmul %21, %0, %cst {dimension_numbers = #tpu.dot_dimension_numbers<[1], [0], [0], [1], [0, 0, 1, 1], [], []>} : vector<1x64xf32>, vector<64x128xf32>, vector<1x128xf32> -> vector<1x128xf32>
    %30 = arith.addf %29, %1 : vector<1x128xf32>
    %cst_31 = arith.constant 0.000000e+00 : f32
    %31 = vector.broadcast %cst_31 : f32 to vector<1x128xf32>
    %32 = arith.maximumf %30, %31 : vector<1x128xf32>
    %cst_32 = arith.constant dense<0.000000e+00> : vector<32x128xf32>
    %33 = tpu.matmul %23, %2, %cst_32 {dimension_numbers = #tpu.dot_dimension_numbers<[1], [0], [0], [1], [0, 0, 1, 1], [], []>} : vector<32x4xf32>, vector<4x128xf32>, vector<32x128xf32> -> vector<32x128xf32>
    %34 = vector.broadcast %3 : vector<1x128xf32> to vector<32x128xf32>
    %35 = arith.addf %33, %34 : vector<32x128xf32>
    %cst_33 = arith.constant 0.000000e+00 : f32
    %36 = vector.broadcast %cst_33 : f32 to vector<32x128xf32>
    %37 = arith.maximumf %35, %36 : vector<32x128xf32>
    %cst_34 = arith.constant dense<0.000000e+00> : vector<256x128xf32>
    %38 = tpu.matmul %4, %37, %cst_34 {dimension_numbers = #tpu.dot_dimension_numbers<[1], [0], [0], [1], [0, 0, 1, 1], [], []>} : vector<256x32xf32>, vector<32x128xf32>, vector<256x128xf32> -> vector<256x128xf32>
    %39 = arith.mulf %38, %5 : vector<256x128xf32>
    %cst_35 = arith.constant dense<0.000000e+00> : vector<256x128xf32>
    %40 = tpu.matmul %39, %6, %cst_35 {dimension_numbers = #tpu.dot_dimension_numbers<[1], [0], [0], [1], [0, 0, 1, 1], [], []>} : vector<256x128xf32>, vector<128x128xf32>, vector<256x128xf32> -> vector<256x128xf32>
    %41 = arith.addf %40, %7 : vector<256x128xf32>
    %42 = arith.mulf %41, %28 : vector<256x128xf32>
    %c0_36 = arith.constant 0 : index
    %c256 = arith.constant 256 : index
    %c0_37 = arith.constant 0 : index
    %43 = vector.load %arg4[%c0_36, %c256, %c0_37] : memref<1x512x128xbf16, #tpu.memory_space<vmem>>, vector<1x128x128xbf16>
    %44 = vector.shape_cast %43 : vector<1x128x128xbf16> to vector<128x128xbf16>
    %45 = arith.extf %44 : vector<128x128xbf16> to vector<128x128xf32>
    %46 = vector.extract_strided_slice %42 {offsets = [0, 0], sizes = [128, 128], strides = [1, 1]} : vector<256x128xf32> to vector<128x128xf32>
    %cst_38 = arith.constant dense<0.000000e+00> : vector<128x128xf32>
    %47 = tpu.matmul %45, %46, %cst_38 {dimension_numbers = #tpu.dot_dimension_numbers<[1], [0], [0], [1], [0, 0, 1, 1], [], []>} : vector<128x128xf32>, vector<128x128xf32>, vector<128x128xf32> -> vector<128x128xf32>
    %c0_39 = arith.constant 0 : index
    %c384 = arith.constant 384 : index
    %c0_40 = arith.constant 0 : index
    %48 = vector.load %arg4[%c0_39, %c384, %c0_40] : memref<1x512x128xbf16, #tpu.memory_space<vmem>>, vector<1x128x128xbf16>
    %49 = vector.shape_cast %48 : vector<1x128x128xbf16> to vector<128x128xbf16>
    %50 = arith.extf %49 : vector<128x128xbf16> to vector<128x128xf32>
    %51 = vector.extract_strided_slice %42 {offsets = [128, 0], sizes = [128, 128], strides = [1, 1]} : vector<256x128xf32> to vector<128x128xf32>
    %cst_41 = arith.constant dense<0.000000e+00> : vector<128x128xf32>
    %52 = tpu.matmul %50, %51, %cst_41 {dimension_numbers = #tpu.dot_dimension_numbers<[1], [0], [0], [1], [0, 0, 1, 1], [], []>} : vector<128x128xf32>, vector<128x128xf32>, vector<128x128xf32> -> vector<128x128xf32>
    %53 = arith.addf %47, %52 : vector<128x128xf32>
    %cst_42 = arith.constant dense<0.000000e+00> : vector<1x512xf32>
    %54 = tpu.matmul %32, %18, %cst_42 {dimension_numbers = #tpu.dot_dimension_numbers<[1], [0], [0], [1], [0, 0, 1, 1], [], []>} : vector<1x128xf32>, vector<128x512xf32>, vector<1x512xf32> -> vector<1x512xf32>
    %cst_43 = arith.constant dense<0.000000e+00> : vector<1x128xf32>
    %55 = tpu.matmul %32, %53, %cst_43 {dimension_numbers = #tpu.dot_dimension_numbers<[1], [0], [0], [1], [0, 0, 1, 1], [], []>} : vector<1x128xf32>, vector<128x128xf32>, vector<1x128xf32> -> vector<1x128xf32>
    %56 = vector.extract_strided_slice %54 {offsets = [0, 0], sizes = [1, 128], strides = [1, 1]} : vector<1x512xf32> to vector<1x128xf32>
    %57 = arith.addf %56, %55 : vector<1x128xf32>
    %58 = arith.addf %57, %13 : vector<1x128xf32>
    %cst_44 = arith.constant 0.000000e+00 : f32
    %59 = vector.broadcast %cst_44 : f32 to vector<1x128xf32>
    %60 = arith.maximumf %58, %59 : vector<1x128xf32>
    %cst_45 = arith.constant dense<0.000000e+00> : vector<1x384xf32>
    %61 = tpu.matmul %60, %19, %cst_45 {dimension_numbers = #tpu.dot_dimension_numbers<[1], [0], [0], [1], [0, 0, 1, 1], [], []>} : vector<1x128xf32>, vector<128x384xf32>, vector<1x384xf32> -> vector<1x384xf32>
    %62 = vector.extract_strided_slice %61 {offsets = [0, 0], sizes = [1, 128], strides = [1, 1]} : vector<1x384xf32> to vector<1x128xf32>
    %63 = vector.extract_strided_slice %54 {offsets = [0, 128], sizes = [1, 128], strides = [1, 1]} : vector<1x512xf32> to vector<1x128xf32>
    %64 = arith.addf %62, %63 : vector<1x128xf32>
    %65 = arith.addf %64, %14 : vector<1x128xf32>
    %66 = arith.negf %65 : vector<1x128xf32>
    %67 = math.exp %66 : vector<1x128xf32>
    %cst_46 = arith.constant 1.000000e+00 : f32
    %68 = vector.broadcast %cst_46 : f32 to vector<1x128xf32>
    %69 = arith.addf %68, %67 : vector<1x128xf32>
    %70 = arith.divf %68, %69 : vector<1x128xf32>
    %71 = vector.extract_strided_slice %61 {offsets = [0, 128], sizes = [1, 128], strides = [1, 1]} : vector<1x384xf32> to vector<1x128xf32>
    %72 = vector.extract_strided_slice %54 {offsets = [0, 256], sizes = [1, 128], strides = [1, 1]} : vector<1x512xf32> to vector<1x128xf32>
    %73 = arith.addf %71, %72 : vector<1x128xf32>
    %74 = arith.addf %73, %15 : vector<1x128xf32>
    %75 = arith.negf %74 : vector<1x128xf32>
    %76 = math.exp %75 : vector<1x128xf32>
    %cst_47 = arith.constant 1.000000e+00 : f32
    %77 = vector.broadcast %cst_47 : f32 to vector<1x128xf32>
    %78 = arith.addf %77, %76 : vector<1x128xf32>
    %79 = arith.divf %77, %78 : vector<1x128xf32>
    %80 = vector.extract_strided_slice %61 {offsets = [0, 256], sizes = [1, 128], strides = [1, 1]} : vector<1x384xf32> to vector<1x128xf32>
    %81 = arith.addf %80, %16 : vector<1x128xf32>
    %82 = vector.extract_strided_slice %54 {offsets = [0, 384], sizes = [1, 128], strides = [1, 1]} : vector<1x512xf32> to vector<1x128xf32>
    %83 = arith.addf %82, %17 : vector<1x128xf32>
    %84 = arith.mulf %70, %83 : vector<1x128xf32>
    %85 = arith.addf %81, %84 : vector<1x128xf32>
    %86 = math.tanh %85 : vector<1x128xf32>
    %cst_48 = arith.constant 1.000000e+00 : f32
    %87 = vector.broadcast %cst_48 : f32 to vector<1x128xf32>
    %88 = arith.subf %87, %79 : vector<1x128xf32>
    %89 = arith.mulf %88, %86 : vector<1x128xf32>
    %90 = arith.mulf %79, %32 : vector<1x128xf32>
    %91 = arith.addf %89, %90 : vector<1x128xf32>
    %cst_49 = arith.constant dense<0.000000e+00> : vector<1x512xf32>
    %92 = tpu.matmul %91, %18, %cst_49 {dimension_numbers = #tpu.dot_dimension_numbers<[1], [0], [0], [1], [0, 0, 1, 1], [], []>} : vector<1x128xf32>, vector<128x512xf32>, vector<1x512xf32> -> vector<1x512xf32>
    %cst_50 = arith.constant dense<0.000000e+00> : vector<1x128xf32>
    %93 = tpu.matmul %91, %53, %cst_50 {dimension_numbers = #tpu.dot_dimension_numbers<[1], [0], [0], [1], [0, 0, 1, 1], [], []>} : vector<1x128xf32>, vector<128x128xf32>, vector<1x128xf32> -> vector<1x128xf32>
    %94 = vector.extract_strided_slice %92 {offsets = [0, 0], sizes = [1, 128], strides = [1, 1]} : vector<1x512xf32> to vector<1x128xf32>
    %95 = arith.addf %94, %93 : vector<1x128xf32>
    %96 = arith.addf %95, %13 : vector<1x128xf32>
    %cst_51 = arith.constant 0.000000e+00 : f32
    %97 = vector.broadcast %cst_51 : f32 to vector<1x128xf32>
    %98 = arith.maximumf %96, %97 : vector<1x128xf32>
    %cst_52 = arith.constant dense<0.000000e+00> : vector<1x384xf32>
    %99 = tpu.matmul %98, %19, %cst_52 {dimension_numbers = #tpu.dot_dimension_numbers<[1], [0], [0], [1], [0, 0, 1, 1], [], []>} : vector<1x128xf32>, vector<128x384xf32>, vector<1x384xf32> -> vector<1x384xf32>
    %100 = vector.extract_strided_slice %99 {offsets = [0, 0], sizes = [1, 128], strides = [1, 1]} : vector<1x384xf32> to vector<1x128xf32>
    %101 = vector.extract_strided_slice %92 {offsets = [0, 128], sizes = [1, 128], strides = [1, 1]} : vector<1x512xf32> to vector<1x128xf32>
    %102 = arith.addf %100, %101 : vector<1x128xf32>
    %103 = arith.addf %102, %14 : vector<1x128xf32>
    %104 = arith.negf %103 : vector<1x128xf32>
    %105 = math.exp %104 : vector<1x128xf32>
    %cst_53 = arith.constant 1.000000e+00 : f32
    %106 = vector.broadcast %cst_53 : f32 to vector<1x128xf32>
    %107 = arith.addf %106, %105 : vector<1x128xf32>
    %108 = arith.divf %106, %107 : vector<1x128xf32>
    %109 = vector.extract_strided_slice %99 {offsets = [0, 128], sizes = [1, 128], strides = [1, 1]} : vector<1x384xf32> to vector<1x128xf32>
    %110 = vector.extract_strided_slice %92 {offsets = [0, 256], sizes = [1, 128], strides = [1, 1]} : vector<1x512xf32> to vector<1x128xf32>
    %111 = arith.addf %109, %110 : vector<1x128xf32>
    %112 = arith.addf %111, %15 : vector<1x128xf32>
    %113 = arith.negf %112 : vector<1x128xf32>
    %114 = math.exp %113 : vector<1x128xf32>
    %cst_54 = arith.constant 1.000000e+00 : f32
    %115 = vector.broadcast %cst_54 : f32 to vector<1x128xf32>
    %116 = arith.addf %115, %114 : vector<1x128xf32>
    %117 = arith.divf %115, %116 : vector<1x128xf32>
    %118 = vector.extract_strided_slice %99 {offsets = [0, 256], sizes = [1, 128], strides = [1, 1]} : vector<1x384xf32> to vector<1x128xf32>
    %119 = arith.addf %118, %16 : vector<1x128xf32>
    %120 = vector.extract_strided_slice %92 {offsets = [0, 384], sizes = [1, 128], strides = [1, 1]} : vector<1x512xf32> to vector<1x128xf32>
    %121 = arith.addf %120, %17 : vector<1x128xf32>
    %122 = arith.mulf %108, %121 : vector<1x128xf32>
    %123 = arith.addf %119, %122 : vector<1x128xf32>
    %124 = math.tanh %123 : vector<1x128xf32>
    %cst_55 = arith.constant 1.000000e+00 : f32
    %125 = vector.broadcast %cst_55 : f32 to vector<1x128xf32>
    %126 = arith.subf %125, %117 : vector<1x128xf32>
    %127 = arith.mulf %126, %124 : vector<1x128xf32>
    %128 = arith.mulf %117, %91 : vector<1x128xf32>
    %129 = arith.addf %127, %128 : vector<1x128xf32>
    %cst_56 = arith.constant dense<0.000000e+00> : vector<1x512xf32>
    %130 = tpu.matmul %129, %18, %cst_56 {dimension_numbers = #tpu.dot_dimension_numbers<[1], [0], [0], [1], [0, 0, 1, 1], [], []>} : vector<1x128xf32>, vector<128x512xf32>, vector<1x512xf32> -> vector<1x512xf32>
    %cst_57 = arith.constant dense<0.000000e+00> : vector<1x128xf32>
    %131 = tpu.matmul %129, %53, %cst_57 {dimension_numbers = #tpu.dot_dimension_numbers<[1], [0], [0], [1], [0, 0, 1, 1], [], []>} : vector<1x128xf32>, vector<128x128xf32>, vector<1x128xf32> -> vector<1x128xf32>
    %132 = vector.extract_strided_slice %130 {offsets = [0, 0], sizes = [1, 128], strides = [1, 1]} : vector<1x512xf32> to vector<1x128xf32>
    %133 = arith.addf %132, %131 : vector<1x128xf32>
    %134 = arith.addf %133, %13 : vector<1x128xf32>
    %cst_58 = arith.constant 0.000000e+00 : f32
    %135 = vector.broadcast %cst_58 : f32 to vector<1x128xf32>
    %136 = arith.maximumf %134, %135 : vector<1x128xf32>
    %cst_59 = arith.constant dense<0.000000e+00> : vector<1x384xf32>
    %137 = tpu.matmul %136, %19, %cst_59 {dimension_numbers = #tpu.dot_dimension_numbers<[1], [0], [0], [1], [0, 0, 1, 1], [], []>} : vector<1x128xf32>, vector<128x384xf32>, vector<1x384xf32> -> vector<1x384xf32>
    %138 = vector.extract_strided_slice %137 {offsets = [0, 0], sizes = [1, 128], strides = [1, 1]} : vector<1x384xf32> to vector<1x128xf32>
    %139 = vector.extract_strided_slice %130 {offsets = [0, 128], sizes = [1, 128], strides = [1, 1]} : vector<1x512xf32> to vector<1x128xf32>
    %140 = arith.addf %138, %139 : vector<1x128xf32>
    %141 = arith.addf %140, %14 : vector<1x128xf32>
    %142 = arith.negf %141 : vector<1x128xf32>
    %143 = math.exp %142 : vector<1x128xf32>
    %cst_60 = arith.constant 1.000000e+00 : f32
    %144 = vector.broadcast %cst_60 : f32 to vector<1x128xf32>
    %145 = arith.addf %144, %143 : vector<1x128xf32>
    %146 = arith.divf %144, %145 : vector<1x128xf32>
    %147 = vector.extract_strided_slice %137 {offsets = [0, 128], sizes = [1, 128], strides = [1, 1]} : vector<1x384xf32> to vector<1x128xf32>
    %148 = vector.extract_strided_slice %130 {offsets = [0, 256], sizes = [1, 128], strides = [1, 1]} : vector<1x512xf32> to vector<1x128xf32>
    %149 = arith.addf %147, %148 : vector<1x128xf32>
    %150 = arith.addf %149, %15 : vector<1x128xf32>
    %151 = arith.negf %150 : vector<1x128xf32>
    %152 = math.exp %151 : vector<1x128xf32>
    %cst_61 = arith.constant 1.000000e+00 : f32
    %153 = vector.broadcast %cst_61 : f32 to vector<1x128xf32>
    %154 = arith.addf %153, %152 : vector<1x128xf32>
    %155 = arith.divf %153, %154 : vector<1x128xf32>
    %156 = vector.extract_strided_slice %137 {offsets = [0, 256], sizes = [1, 128], strides = [1, 1]} : vector<1x384xf32> to vector<1x128xf32>
    %157 = arith.addf %156, %16 : vector<1x128xf32>
    %158 = vector.extract_strided_slice %130 {offsets = [0, 384], sizes = [1, 128], strides = [1, 1]} : vector<1x512xf32> to vector<1x128xf32>
    %159 = arith.addf %158, %17 : vector<1x128xf32>
    %160 = arith.mulf %146, %159 : vector<1x128xf32>
    %161 = arith.addf %157, %160 : vector<1x128xf32>
    %162 = math.tanh %161 : vector<1x128xf32>
    %cst_62 = arith.constant 1.000000e+00 : f32
    %163 = vector.broadcast %cst_62 : f32 to vector<1x128xf32>
    %164 = arith.subf %163, %155 : vector<1x128xf32>
    %165 = arith.mulf %164, %162 : vector<1x128xf32>
    %166 = arith.mulf %155, %129 : vector<1x128xf32>
    %167 = arith.addf %165, %166 : vector<1x128xf32>
    %cst_63 = arith.constant dense<0.000000e+00> : vector<1x128xf32>
    %168 = tpu.matmul %167, %8, %cst_63 {dimension_numbers = #tpu.dot_dimension_numbers<[1], [0], [0], [1], [0, 0, 1, 1], [], []>} : vector<1x128xf32>, vector<128x128xf32>, vector<1x128xf32> -> vector<1x128xf32>
    %169 = arith.addf %168, %9 : vector<1x128xf32>
    %cst_64 = arith.constant 0.000000e+00 : f32
    %170 = vector.broadcast %cst_64 : f32 to vector<1x128xf32>
    %171 = arith.maximumf %169, %170 : vector<1x128xf32>
    %cst_65 = arith.constant dense<0.000000e+00> : vector<1x128xf32>
    %172 = tpu.matmul %171, %10, %cst_65 {dimension_numbers = #tpu.dot_dimension_numbers<[1], [0], [0], [1], [0, 0, 1, 1], [], []>} : vector<1x128xf32>, vector<128x128xf32>, vector<1x128xf32> -> vector<1x128xf32>
    %173 = arith.addf %172, %11 : vector<1x128xf32>
    %cst_66 = arith.constant dense<0.000000e+00> : vector<1x128xf32>
    %174 = tpu.matmul %173, %25, %cst_66 {dimension_numbers = #tpu.dot_dimension_numbers<[1], [0], [0], [1], [0, 0, 1, 1], [], []>} : vector<1x128xf32>, vector<128x128xf32>, vector<1x128xf32> -> vector<1x128xf32>
    %175 = arith.addf %174, %12 : vector<1x128xf32>
    %176 = vector.shape_cast %175 : vector<1x128xf32> to vector<1x128xf32>
    %177 = vector.broadcast %176 : vector<1x128xf32> to vector<8x128xf32>
    %c0_67 = arith.constant 0 : index
    %c0_68 = arith.constant 0 : index
    %c0_69 = arith.constant 0 : index
    %178 = vector.load %arg5[%c0_67, %c0_68, %c0_69] : memref<1x8x128xf32, #tpu.memory_space<vmem>>, vector<1x8x128xf32>
    %179 = vector.shape_cast %178 : vector<1x8x128xf32> to vector<8x128xf32>
    %180 = vector.shape_cast %177 : vector<8x128xf32> to vector<1x8x128xf32>
    tpu.vector_store %arg5[%c0_67, %c0_68, %c0_69], %180 {strides = array<i32>} : memref<1x8x128xf32, #tpu.memory_space<vmem>>, vector<1x8x128xf32>,
    return
  }
  func.func @transform_0(%arg0: i32) -> (i32, i32) {
    %c0_i32 = arith.constant 0 : i32
    %c0_i32_0 = arith.constant 0 : i32
    %c0_i32_1 = arith.constant 0 : i32
    return %c0_i32, %c0_i32_0 : i32, i32
  }
  func.func @transform_1(%arg0: i32) -> (i32, i32) {
    %c0_i32 = arith.constant 0 : i32
    %c0_i32_0 = arith.constant 0 : i32
    %c0_i32_1 = arith.constant 0 : i32
    return %c0_i32, %c0_i32_0 : i32, i32
  }
  func.func @transform_2(%arg0: i32) -> (i32, i32, i32) {
    %c0_i32 = arith.constant 0 : i32
    %c0_i32_0 = arith.constant 0 : i32
    %c0_i32_1 = arith.constant 0 : i32
    return %arg0, %c0_i32, %c0_i32_0 : i32, i32, i32
  }
  func.func @transform_3(%arg0: i32) -> (i32, i32, i32) {
    %c0_i32 = arith.constant 0 : i32
    %c0_i32_0 = arith.constant 0 : i32
    %c0_i32_1 = arith.constant 0 : i32
    return %arg0, %c0_i32, %c0_i32_0 : i32, i32, i32
  }
  func.func @transform_4(%arg0: i32) -> (i32, i32, i32) {
    %c0_i32 = arith.constant 0 : i32
    %c0_i32_0 = arith.constant 0 : i32
    %c0_i32_1 = arith.constant 0 : i32
    return %arg0, %c0_i32, %c0_i32_0 : i32, i32, i32
  }
}

</mosaic_0001>

<bundles_post_ra>
// kernel: mpnn_forward_batched.1
= control target key start
LH: loop header
LB: loop body
LE: loop exit
PB: predicated region body
PF: predicated region fallthrough
CT: control target
= control target key end

     0   :  { %s4419_s15 = smov 0   ;;  %s6471_s0 = inlined_call_operand.vmem [shape: f32[1304,128], index: 0, kind: input, shape index: {}]   ;;  %s6472_s1 = inlined_call_operand.vmem [shape: f32[128,896], index: 1, kind: input, shape index: {}]   ;;  %s6473_s2 = inlined_call_operand.vmem [shape: f32[8,168,128], index: 2, kind: input, shape index: {}]   ;;  %s6474_s3 = inlined_call_operand.vmem [shape: bf16[8,512,128], index: 3, kind: input, shape index: {}]   ;;  %s6475_s4 = inlined_call_operand.vmem [shape: f32[8,8,128], index: 4, kind: output, shape index: {}]  }
   0x1 LB: > { %s3150_s16 = sadd.s32 4294967295, %s4390_s15   ;;  %p3154_p0 = scmp.ge.s32.totalorder %s4390_s15, 1  ;;  %s4390_s15 = sphi %s4419_s15, %s14_s15  }
   0x2   : > { %p172_p1 = scmp.lt.s32.totalorder %s4390_s15, 9 }
   0x4   : > { %p173_p2 = pnand %p3154_p0, %p172_p1 }
   0x6   : > { %176 = sbr.rel (%p173_p2) target bundleno = 3005 (0xbbd), region = 36 }
   0xb   : > { %v225_v0 = vld [vmem:[%s6471_s0 + $0x48] sm:$0xf]  ;;  %vm668_vm0 = vcmask 1043456   ;;  %p202_p3 = scmp.lt.s32.totalorder %s3150_s16, 7  ;;  %v6476_v1 = vmov 0.0   ;;  %v223_v2 = vld [vmem:[%s6471_s0 + $0x38] sm:$0xff] }
   0xc   : > { %3700 = vmatprep.subr.msk.mxu1 %vm668_vm0, %v225_v0  ;;  %3681 = vmatprep.subr.mxu0 %v6476_v1  ;;  %v222_v3 = vld [vmem:[%s6471_s0 + $0x30] sm:$0xff]  ;;  %v221_v4 = vld [vmem:[%s6471_s0 + $0x28] sm:$0xff]  ;;  %vm655_vm1 = vcmask 31744   ;;  %v220_v5 = vld [vmem:[%s6471_s0 + $0x20] sm:$0xff]  ;;  %vm4393_vm2 = vmmov 0   ;;  %vm576_vm3 = vcmask 523264  }
   0xd   : > { %3701 = vmatpush3.msk.msra.mxu1 %vm668_vm0, %v225_v0  ;;  %s6746_s16 = smov (!%p202_p3, %s3150_s16), 7  ;;  %3682 = vmatpush3.msra.mxu0 %v223_v2  ;;  %v219_v10 = vld [vmem:[%s6471_s0 + $0x18] sm:$0xff]  ;;  %v218_v11 = vld [vmem:[%s6471_s0 + $0x10] sm:$0xff]  ;;  %v217_v12 = vld [vmem:[%s6471_s0 + $0x8] sm:$0xff]  ;;  %vm761_vm4 = vcmask 261120  }
   0xe   : > { %3683 = vmatprep.subr.mxu0 %v6476_v1  ;;  %s4279_s25 = smul.u32 168, %s6746_s16  ;;  %v216_v13 = vld [vmem:[%s6471_s0] sm:$0xff]  ;;  %3697 = vmatprep.mubr.msk.f32.mxu0 %vm4393_vm2, %v6476_v1  ;;  %v227_v15 = vld [vmem:[%s6471_s0 + $0x58] sm:$0xff]  ;;  %v3160_v19 = vld [vmem:[%s6471_s0 + $0x50] ss:$0 sm:$0xff]  ;;  %s3206_s11 = sshll.u32 %s6746_s16, 8 }
   0xf   : > { %3684 = vmatpush3.msra.mxu0 %v222_v3  ;;  %v243_v16 = vld [vmem:[%s6471_s0 + $0xd8] sm:$0xff]  ;;  %v228_v30 = vld [vmem:[%s6471_s0 + $0x60] sm:$0xff]  ;;  %v229_v32 = vld [vmem:[%s6471_s0 + $0x68] sm:$0xff]  ;;  %s4889_s14 = scalar_lea.vmem %s6474_s3, %s3206_s11  ;;  %s3158_s17 = sshll.u32 %s6746_s16, 3 }
  0x10   : > { %3685 = vmatprep.subr.mxu0 %v6476_v1  ;;  %s4451_s30 = scalar_lea.vmem %s6473_s2, %s4279_s25  ;;  %v244_v31 = vld [vmem:[%s6471_s0 + $0xe0] sm:$0xff]  ;;  %v245_v33 = vld [vmem:[%s6471_s0 + $0xe8] sm:$0xff]  ;;  %v306_v34 = vld [vmem:[%s6471_s0 + $0x2d0] sm:$0xff] }
  0x11   : > { %3686 = vmatpush3.msra.mxu0 %v221_v4  ;;  %v492_v6 = vld [vmem:[%s4451_s30 + $0x8] sm:$0xff]  ;;  %v493_v7 = vld [vmem:[%s4451_s30 + $0x10] sm:$0xff]  ;;  %v494_v8 = vld [vmem:[%s4451_s30 + $0x18] sm:$0xff] }
  0x12   : > { %3687 = vmatprep.subr.mxu0 %v6476_v1  ;;  %3702 = vmatprep.mubr.msk.f32.mxu1 %vm655_vm1, %v492_v6  ;;  %v495_v9 = vld [vmem:[%s4451_s30 + $0x20] sm:$0xff]  ;;  %v230_v35 = vld [vmem:[%s6471_s0 + $0x70] sm:$0xff]  ;;  %v231_v37 = vld [vmem:[%s6471_s0 + $0x78] sm:$0xff] }
  0x13   : > { %3688 = vmatpush3.msra.mxu0 %v220_v5  ;;  %3703 = vmatmul.mubr.msk.f32.vlgmr.msra.gmra.mxu1 %vm655_vm1, %v493_v7  ;;  %v491_v14 = vld [vmem:[%s4451_s30] sm:$0x1]  ;;  %v246_v36 = vld [vmem:[%s6471_s0 + $0xf0] sm:$0xff]  ;;  %v247_v38 = vld [vmem:[%s6471_s0 + $0xf8] sm:$0xff] }
  0x14   : > { %3689 = vmatprep.subr.mxu0 %v6476_v1  ;;  %3705 = vmatprep.mubr.msk.f32.mxu1 %vm655_vm1, %v494_v8  ;;  %v305_v39 = vld [vmem:[%s6471_s0 + $0x2c8] sm:$0xff]  ;;  %v232_v40 = vld [vmem:[%s6471_s0 + $0x80] sm:$0xff]  ;;  %v234_v45 = vld [vmem:[%s6471_s0 + $0x90] sm:$0xff] }
  0x15   : > { %3690 = vmatpush3.msra.mxu0 %v219_v10  ;;  %v248_v41 = vld [vmem:[%s6471_s0 + $0x100] sm:$0xff]  ;;  %v233_v42 = vld [vmem:[%s6471_s0 + $0x88] sm:$0xff]  ;;  %v250_v46 = vld [vmem:[%s6471_s0 + $0x110] sm:$0xff] }
  0x16   : > { %3691 = vmatprep.subr.mxu0 %v6476_v1  ;;  %v249_v43 = vld [vmem:[%s6471_s0 + $0x108] sm:$0xff]  ;;  %v304_v44 = vld [vmem:[%s6471_s0 + $0x2c0] sm:$0xff]  ;;  %v235_v47 = vld [vmem:[%s6471_s0 + $0x98] sm:$0xff] }
  0x17   : > { %3706 = vmatmul.mubr.msk.f32.gmra.mxu1 %vm655_vm1, %v495_v9  ;;  %3692 = vmatpush3.msra.mxu0 %v218_v11  ;;  %v251_v48 = vld [vmem:[%s6471_s0 + $0x118] sm:$0xff]  ;;  %v236_v50 = vld [vmem:[%s6471_s0 + $0xa0] sm:$0xff]  ;;  %v237_v52 = vld [vmem:[%s6471_s0 + $0xa8] sm:$0xff] }
  0x18   : > { %3693 = vmatprep.subr.mxu0 %v6476_v1  ;;  %3740 = vmatprep.mubr.msk.f32.mxu1 %vm761_vm4, %v243_v16  ;;  %v303_v49 = vld [vmem:[%s6471_s0 + $0x2b8] sm:$0xff]  ;;  %v252_v51 = vld [vmem:[%s6471_s0 + $0x120] sm:$0xff]  ;;  %v253_v53 = vld [vmem:[%s6471_s0 + $0x128] sm:$0xff] }
  0x19   : > { %3694 = vmatpush3.msra.mxu0 %v217_v12  ;;  %v302_v54 = vld [vmem:[%s6471_s0 + $0x2b0] sm:$0xff]  ;;  %v239_v57 = vld [vmem:[%s6471_s0 + $0xb8] sm:$0xff]  ;;  %v301_v59 = vld [vmem:[%s6471_s0 + $0x2a8] sm:$0xff] }
  0x1a   : > { %3695 = vmatprep.subr.mxu0 %v6476_v1  ;;  %v238_v55 = vld [vmem:[%s6471_s0 + $0xb0] sm:$0xff]  ;;  %v255_v58 = vld [vmem:[%s6471_s0 + $0x138] sm:$0xff]  ;;  %v240_v60 = vld [vmem:[%s6471_s0 + $0xc0] sm:$0xff] }
  0x1b   : > { %3696 = vmatpush3.msra.mxu0 %v216_v13  ;;  %v254_v56 = vld [vmem:[%s6471_s0 + $0x130] sm:$0xff]  ;;  %v256_v61 = vld [vmem:[%s6471_s0 + $0x140] sm:$0xff]  ;;  %v241_v62 = vld [vmem:[%s6471_s0 + $0xc8] sm:$0xff] }
  0x1c   : > { %3698 = vmatmul.mubr.msk.f32.vlgmr.msra.gmra.mxu0 %vm576_vm3, %v491_v14  ;;  %v257_v63 = vld [vmem:[%s6471_s0 + $0x148] sm:$0xff]  ;;  %v300_v0 = vld [vmem:[%s6471_s0 + $0x2a0] sm:$0xff]  ;;  %v242_v2 = vld [vmem:[%s6471_s0 + $0xd0] sm:$0xff] }
  0x1d   : > { %3716 = vmatprep.mubr.msk.f32.mxu0 %vm761_vm4, %v227_v15  ;;  %v258_v3 = vld [vmem:[%s6471_s0 + $0x150] sm:$0xff]  ;;  %v299_v4 = vld [vmem:[%s6471_s0 + $0x298] sm:$0xff]  ;;  %v297_v6 = vld [vmem:[%s6471_s0 + $0x288] sm:$0xff] }
  0x1e   : > { %v298_v5 = vld [vmem:[%s6471_s0 + $0x290] sm:$0xff]  ;;  %v296_v7 = vld [vmem:[%s6471_s0 + $0x280] sm:$0xff]  ;;  %v295_v8 = vld [vmem:[%s6471_s0 + $0x278] sm:$0xff] }
  0x1f   : > { %v294_v9 = vld [vmem:[%s6471_s0 + $0x270] sm:$0xff]  ;;  %v293_v12 = vld [vmem:[%s6471_s0 + $0x268] sm:$0xff]  ;;  %v292_v13 = vld [vmem:[%s6471_s0 + $0x260] sm:$0xff] }
  0x20   : > { %v291_v14 = vld [vmem:[%s6471_s0 + $0x258] sm:$0xff]  ;;  %v440_v15 = vld [vmem:[%s6472_s1 + $0x350] sm:$0xff] }
  0xd3   : > { %v3704_v17 = vpop.f32.mrf.mxu1 }
  0xd4   : > { %v744_v23 = vadd.f32 %v3704_v17, %v3160_v19  ;;  %v259_v17 = vld [vmem:[%s6471_s0 + $0x158] sm:$0xff] }
  0xd5   : > { %v738_v18 = vpop.f32.mrf.mxu1 }
  0xd6   : > { %v739_v26 = vadd.f32 %v3160_v19, %v738_v18  ;;  %v758_v28 = vmax.f32 %v744_v23, 0.0 }
  0xd7   : > { %v3707_v20 = vpop.f32.mrf.mxu1 }
  0xd8   : > { %v754_v21 = vadd.f32 %v3707_v20, %v3160_v19  ;;  %v757_v29 = vmax.f32 %v739_v26, 0.0 }
  0xd9   : > { %v748_v22 = vpop.f32.mrf.mxu1 }
  0xda   : > { %v760_v24 = vmax.f32 %v754_v21, 0.0  ;;  %v749_v25 = vadd.f32 %v3160_v19, %v748_v22  ;;  %v260_v19 = vld [vmem:[%s6471_s0 + $0x160] sm:$0xff] }
  0xdc   : > { %v759_v27 = vmax.f32 %v749_v25, 0.0  ;;  %3708 = vmatprep.subr.mxu0 %v760_v24  ;;  %4271 = vmatprep.subr.mxu1 %v760_v24  ;;  %v4647_v10 = vpop.f32.mrf.mxu0  ;;  %v261_v25 = vld [vmem:[%s6471_s0 + $0x168] sm:$0xff] }
  0xdd   : > { %3709 = vmatpush3.msra.mxu0 %v760_v24  ;;  %4275 = vmatpush3.msra.mxu1 %v760_v24 }
  0xde   : > { %3710 = vmatprep.subr.mxu0 %v759_v27  ;;  %4272 = vmatprep.subr.mxu1 %v759_v27  ;;  %v3699_v11 = vpop.f32.mrf.mxu0 }
  0xdf   : > { %3711 = vmatpush3.msra.mxu0 %v759_v27  ;;  %4276 = vmatpush3.msra.mxu1 %v759_v27  ;;  %v439_v27 = vld [vmem:[%s6472_s1 + $0x348] sm:$0xff]  ;;  %v404_v11 = vld [vmem:[%s6472_s1 + $0x158] sm:$0xff] }
  0xe0   : > { %3712 = vmatprep.subr.mxu0 %v758_v28  ;;  %4273 = vmatprep.subr.mxu1 %v758_v28 }
  0xe1   : > { %3713 = vmatpush3.msra.mxu0 %v758_v28  ;;  %4277 = vmatpush3.msra.mxu1 %v758_v28  ;;  %v262_v28 = vld [vmem:[%s6471_s0 + $0x170] sm:$0xff] }
  0xe2   : > { %3714 = vmatprep.subr.mxu0 %v757_v29  ;;  %4274 = vmatprep.subr.mxu1 %v757_v29 }
  0xe3   : > { %3715 = vmatpush3.msra.mxu0 %v757_v29  ;;  %4278 = vmatpush3.msra.mxu1 %v757_v29  ;;  %v436_v29 = vld [vmem:[%s6472_s1 + $0x318] sm:$0xff] }
  0xe4   : > { %3717 = vmatmul.mubr.msk.f32.vlgmr.msra.gmra.mxu0 %vm761_vm4, %v228_v30  ;;  %3741 = vmatmul.mubr.msk.f32.vlgmr.msra.gmra.mxu1 %vm761_vm4, %v244_v31  ;;  %v435_v31 = vld [vmem:[%s6472_s1 + $0x310] sm:$0xff] }
  0xe5   : > { %3719 = vmatprep.mubr.msk.f32.mxu0 %vm761_vm4, %v229_v32  ;;  %3743 = vmatprep.mubr.msk.f32.mxu1 %vm761_vm4, %v245_v33  ;;  %v432_v33 = vld [vmem:[%s6472_s1 + $0x2e0] sm:$0xff] }
  0xe6   : > { %3764 = vmatprep.subr.mxu0 %v306_v34 }
  0xe7   : > { %3765 = vmatpush3.msra.mxu0 %v306_v34 }
  0xe8   : > { %3720 = vmatmul.mubr.msk.f32.gmra.mxu0 %vm761_vm4, %v230_v35  ;;  %3744 = vmatmul.mubr.msk.f32.gmra.mxu1 %vm761_vm4, %v246_v36  ;;  %v263_v36 = vld [vmem:[%s6471_s0 + $0x178] sm:$0xff] }
  0xe9   : > { %3722 = vmatprep.mubr.msk.f32.mxu0 %vm761_vm4, %v231_v37  ;;  %3746 = vmatprep.mubr.msk.f32.mxu1 %vm761_vm4, %v247_v38  ;;  %v431_v38 = vld [vmem:[%s6472_s1 + $0x2d8] sm:$0xff] }
  0xea   : > { %3766 = vmatprep.subr.mxu0 %v305_v39 }
  0xeb   : > { %3767 = vmatpush3.msra.mxu0 %v305_v39  ;;  %v264_v39 = vld [vmem:[%s6471_s0 + $0x180] sm:$0xff] }
  0xec   : > { %3723 = vmatmul.mubr.msk.f32.gmra.mxu0 %vm761_vm4, %v232_v40  ;;  %3747 = vmatmul.mubr.msk.f32.gmra.mxu1 %vm761_vm4, %v248_v41  ;;  %v428_v40 = vld [vmem:[%s6472_s1 + $0x2a8] sm:$0xff] }
  0xed   : > { %3725 = vmatprep.mubr.msk.f32.mxu0 %vm761_vm4, %v233_v42  ;;  %3749 = vmatprep.mubr.msk.f32.mxu1 %vm761_vm4, %v249_v43  ;;  %v427_v42 = vld [vmem:[%s6472_s1 + $0x2a0] sm:$0xff] }
  0xee   : > { %3768 = vmatprep.subr.mxu0 %v304_v44 }
  0xef   : > { %3769 = vmatpush3.msra.mxu0 %v304_v44  ;;  %v424_v44 = vld [vmem:[%s6472_s1 + $0x270] sm:$0xff] }
  0xf0   : > { %3726 = vmatmul.mubr.msk.f32.gmra.mxu0 %vm761_vm4, %v234_v45  ;;  %3750 = vmatmul.mubr.msk.f32.gmra.mxu1 %vm761_vm4, %v250_v46 }
  0xf1   : > { %3728 = vmatprep.mubr.msk.f32.mxu0 %vm761_vm4, %v235_v47  ;;  %3752 = vmatprep.mubr.msk.f32.mxu1 %vm761_vm4, %v251_v48  ;;  %v265_v47 = vld [vmem:[%s6471_s0 + $0x188] sm:$0xff] }
  0xf2   : > { %3770 = vmatprep.subr.mxu0 %v303_v49 }
  0xf3   : > { %3771 = vmatpush3.msra.mxu0 %v303_v49  ;;  %v423_v49 = vld [vmem:[%s6472_s1 + $0x268] sm:$0xff] }
  0xf4   : > { %3729 = vmatmul.mubr.msk.f32.gmra.mxu0 %vm761_vm4, %v236_v50  ;;  %3753 = vmatmul.mubr.msk.f32.gmra.mxu1 %vm761_vm4, %v252_v51  ;;  %v266_v50 = vld [vmem:[%s6471_s0 + $0x190] sm:$0xff]  ;;  %v420_v51 = vld [vmem:[%s6472_s1 + $0x238] sm:$0xff] }
  0xf5   : > { %3731 = vmatprep.mubr.msk.f32.mxu0 %vm761_vm4, %v237_v52  ;;  %3755 = vmatprep.mubr.msk.f32.mxu1 %vm761_vm4, %v253_v53  ;;  %v419_v53 = vld [vmem:[%s6472_s1 + $0x230] sm:$0xff] }
  0xf6   : > { %3772 = vmatprep.subr.mxu0 %v302_v54 }
  0xf7   : > { %3773 = vmatpush3.msra.mxu0 %v302_v54 }
  0xf8   : > { %3732 = vmatmul.mubr.msk.f32.gmra.mxu0 %vm761_vm4, %v238_v55  ;;  %3756 = vmatmul.mubr.msk.f32.gmra.mxu1 %vm761_vm4, %v254_v56  ;;  %v416_v55 = vld [vmem:[%s6472_s1 + $0x200] sm:$0xff] }
  0xf9   : > { %3734 = vmatprep.mubr.msk.f32.mxu0 %vm761_vm4, %v239_v57  ;;  %3758 = vmatprep.mubr.msk.f32.mxu1 %vm761_vm4, %v255_v58  ;;  %v267_v58 = vld [vmem:[%s6471_s0 + $0x198] sm:$0xff] }
  0xfa   : > { %3774 = vmatprep.subr.mxu0 %v301_v59 }
  0xfb   : > { %3775 = vmatpush3.msra.mxu0 %v301_v59 }
  0xfc   : > { %3735 = vmatmul.mubr.msk.f32.gmra.mxu0 %vm761_vm4, %v240_v60  ;;  %3759 = vmatmul.mubr.msk.f32.gmra.mxu1 %vm761_vm4, %v256_v61  ;;  %v415_v60 = vld [vmem:[%s6472_s1 + $0x1f8] sm:$0xff]  ;;  %v268_v61 = vld [vmem:[%s6471_s0 + $0x1a0] sm:$0xff] }
  0xfd   : > { %3737 = vmatprep.mubr.msk.f32.mxu0 %vm761_vm4, %v241_v62  ;;  %3761 = vmatprep.mubr.msk.f32.mxu1 %vm761_vm4, %v257_v63  ;;  %v412_v62 = vld [vmem:[%s6472_s1 + $0x1c8] sm:$0xff] }
  0xfe   : > { %3776 = vmatprep.subr.mxu0 %v300_v0 }
  0xff   : > { %3777 = vmatpush3.msra.mxu0 %v300_v0  ;;  %v411_v0 = vld [vmem:[%s6472_s1 + $0x1c0] sm:$0xff] }
 0x100   : > { %3738 = vmatmul.mubr.msk.f32.gmra.mxu0 %vm761_vm4, %v242_v2  ;;  %3762 = vmatmul.mubr.msk.f32.gmra.mxu1 %vm761_vm4, %v258_v3  ;;  %v408_v3 = vld [vmem:[%s6472_s1 + $0x190] sm:$0xff] }
 0x101   : > { %3778 = vmatprep.subr.mxu0 %v299_v4 }
 0x102   : > { %3779 = vmatpush3.msra.mxu0 %v299_v4 }
 0x103   : > { %3780 = vmatprep.subr.mxu0 %v298_v5 }
 0x104   : > { %3781 = vmatpush3.msra.mxu0 %v298_v5 }
 0x105   : > { %3782 = vmatprep.subr.mxu0 %v297_v6 }
 0x106   : > { %3783 = vmatpush3.msra.mxu0 %v297_v6  ;;  %v269_v6 = vld [vmem:[%s6471_s0 + $0x1a8] sm:$0xff] }
 0x107   : > { %3784 = vmatprep.subr.mxu0 %v296_v7 }
 0x108   : > { %3785 = vmatpush3.msra.mxu0 %v296_v7 }
 0x109   : > { %3786 = vmatprep.subr.mxu0 %v295_v8 }
 0x10a   : > { %3787 = vmatpush3.msra.mxu0 %v295_v8  ;;  %v407_v8 = vld [vmem:[%s6472_s1 + $0x188] sm:$0xff] }
 0x10b   : > { %3788 = vmatprep.subr.mxu0 %v294_v9 }
 0x10c   : > { %3789 = vmatpush3.msra.mxu0 %v294_v9  ;;  %v270_v9 = vld [vmem:[%s6471_s0 + $0x1b0] sm:$0xff] }
 0x10d   : > { %3790 = vmatprep.subr.mxu0 %v293_v12 }
 0x10e   : > { %3791 = vmatpush3.msra.mxu0 %v293_v12 }
 0x10f   : > { %3792 = vmatprep.subr.mxu0 %v292_v13 }
 0x110   : > { %3793 = vmatpush3.msra.mxu0 %v292_v13  ;;  %v403_v13 = vld [vmem:[%s6472_s1 + $0x150] sm:$0xff] }
 0x111   : > { %3794 = vmatprep.subr.mxu0 %v291_v14 }
 0x112   : > { %3795 = vmatpush3.msra.mxu0 %v291_v14 }
 0x113   : > { %1726 = vmatprep.subr.mxu0 %v440_v15  ;;  %v400_v15 = vld [vmem:[%s6472_s1 + $0x120] sm:$0xff] }
 0x1a4   : > { %v3718_v16 = vpop.f32.mrf.mxu0  ;;  %v4664_v18 = vpop.f32.mrf.mxu1 }
 0x1a5   : > { %v1084_v23 = vmul.f32 %v3718_v16, %v260_v19  ;;  %v271_v19 = vld [vmem:[%s6471_s0 + $0x1b8] sm:$0xff] }
 0x1a6   : > { %v924_v20 = vpop.f32.mrf.mxu0  ;;  %v4669_v21 = vpop.f32.mrf.mxu1 }
 0x1a7   : > { %v1083_v22 = vmul.f32 %v924_v20, %v259_v17 }
 0x1a8   : > { %v3721_v24 = vpop.f32.mrf.mxu0  ;;  %v4674_v26 = vpop.f32.mrf.mxu1 }
 0x1a9   : > { %3796 = vmatprep.mubr.f32.mxu0 %v1083_v22  ;;  %v1086_v34 = vmul.f32 %v3721_v24, %v262_v28  ;;  %v399_v22 = vld [vmem:[%s6472_s1 + $0x118] sm:$0xff]  ;;  %v396_v24 = vld [vmem:[%s6472_s1 + $0xe8] sm:$0xff] }
 0x1aa   : > { %v934_v30 = vpop.f32.mrf.mxu0  ;;  %3797 = vmatmul.mubr.f32.vlgmr.msra.gmra.mxu0 %v1084_v23  ;;  %v4694_v37 = vpop.f32.mrf.mxu1  ;;  %v272_v23 = vld [vmem:[%s6471_s0 + $0x1c0] sm:$0xff] }
 0x1ab   : > { %v1085_v32 = vmul.f32 %v934_v30, %v261_v25  ;;  %1727 = vmatpush1.msra.mxu0 %v439_v27  ;;  %v395_v27 = vld [vmem:[%s6472_s1 + $0xe0] sm:$0xff] }
 0x1ac   : > { %v3724_v35 = vpop.f32.mrf.mxu0  ;;  %1728 = vmatprep.subr.mxu0 %v436_v29  ;;  %v4714_v48 = vpop.f32.mrf.mxu1  ;;  %v392_v29 = vld [vmem:[%s6472_s1 + $0xb0] sm:$0xff] }
 0x1ad   : > { %3799 = vmatprep.mubr.f32.mxu0 %v1085_v32  ;;  %1729 = vmatpush1.msra.mxu0 %v435_v31  ;;  %v1088_v45 = vmul.f32 %v3724_v35, %v264_v39  ;;  %v273_v32 = vld [vmem:[%s6471_s0 + $0x1c8] sm:$0xff] }
 0x1ae   : > { %v944_v41 = vpop.f32.mrf.mxu0  ;;  %3800 = vmatmul.mubr.f32.gmra.mxu0 %v1086_v34  ;;  %1730 = vmatprep.subr.mxu0 %v432_v33  ;;  %v4734_v59 = vpop.f32.mrf.mxu1  ;;  %v275_v33 = vld [vmem:[%s6471_s0 + $0x1d8] sm:$0xff]  ;;  %v391_v35 = vld [vmem:[%s6472_s1 + $0xa8] sm:$0xff] }
 0x1af   : > { %v1087_v43 = vmul.f32 %v944_v41, %v263_v36  ;;  %1731 = vmatpush1.msra.mxu0 %v431_v38  ;;  %v274_v36 = vld [vmem:[%s6471_s0 + $0x1d0] sm:$0xff]  ;;  %v388_v38 = vld [vmem:[%s6472_s1 + $0x78] sm:$0xff] }
 0x1b0   : > { %v3727_v46 = vpop.f32.mrf.mxu0  ;;  %1732 = vmatprep.subr.mxu0 %v428_v40  ;;  %v4754_v7 = vpop.f32.mrf.mxu1  ;;  %v387_v40 = vld [vmem:[%s6472_s1 + $0x70] sm:$0xff] }
 0x1b1   : > { %3802 = vmatprep.mubr.f32.mxu0 %v1087_v43  ;;  %1733 = vmatpush1.msra.mxu0 %v427_v42  ;;  %v1090_v56 = vmul.f32 %v3727_v46, %v266_v50  ;;  %v1099_v42 = vmul.f32 %v4669_v21, %v275_v33  ;;  %v384_v43 = vld [vmem:[%s6472_s1 + $0x40] sm:$0xff] }
 0x1b2   : > { %v954_v52 = vpop.f32.mrf.mxu0  ;;  %3803 = vmatmul.mubr.f32.gmra.mxu0 %v1088_v45  ;;  %1734 = vmatprep.subr.mxu0 %v424_v44  ;;  %v4774_v20 = vpop.f32.mrf.mxu1  ;;  %v277_v45 = vld [vmem:[%s6471_s0 + $0x1e8] sm:$0xff]  ;;  %v276_v21 = vld [vmem:[%s6471_s0 + $0x1e0] sm:$0xff] }
 0x1b3   : > { %v1089_v54 = vmul.f32 %v954_v52, %v265_v47  ;;  %1735 = vmatpush1.msra.mxu0 %v423_v49  ;;  %v383_v47 = vld [vmem:[%s6472_s1 + $0x38] sm:$0xff]  ;;  %v380_v49 = vld [vmem:[%s6472_s1 + $0x8] sm:$0xff]  ;;  %v379_v50 = vld [vmem:[%s6472_s1] sm:$0xff]  ;;  %v1100_v52 = vmul.f32 %v4664_v18, %v276_v21 }
 0x1b4   : > { %v3730_v57 = vpop.f32.mrf.mxu0  ;;  %1736 = vmatprep.subr.mxu0 %v420_v51  ;;  %v3754_v34 = vpop.f32.mrf.mxu1  ;;  %v1101_v51 = vmul.f32 %v4694_v37, %v277_v45  ;;  %v281_v18 = vld [vmem:[%s6471_s0 + $0x208] sm:$0xff] }
 0x1b5   : > { %3805 = vmatprep.mubr.f32.mxu0 %v1089_v54  ;;  %1737 = vmatpush1.msra.mxu0 %v419_v53  ;;  %v1092_v4 = vmul.f32 %v3730_v57, %v268_v61  ;;  %v279_v53 = vld [vmem:[%s6471_s0 + $0x1f8] sm:$0xff] }
 0x1b6   : > { %v964_v63 = vpop.f32.mrf.mxu0  ;;  %3806 = vmatmul.mubr.f32.gmra.mxu0 %v1090_v56  ;;  %1738 = vmatprep.subr.mxu0 %v416_v55  ;;  %v1044_v46 = vpop.f32.mrf.mxu1  ;;  %v278_v55 = vld [vmem:[%s6471_s0 + $0x1f0] sm:$0xff]  ;;  %v1103_v37 = vmul.f32 %v4734_v59, %v279_v53  ;;  %v283_v59 = vld [vmem:[%s6471_s0 + $0x218] sm:$0xff] }
 0x1b7   : > { %v1091_v2 = vmul.f32 %v964_v63, %v267_v58  ;;  %1739 = vmatpush1.msra.mxu0 %v415_v60  ;;  %v1102_v56 = vmul.f32 %v4674_v26, %v278_v55  ;;  %v280_v58 = vld [vmem:[%s6471_s0 + $0x200] sm:$0xff]  ;;  %v1105_v60 = vmul.f32 %v4774_v20, %v281_v18  ;;  %v1107_v63 = vmul.f32 %v1044_v46, %v283_v59  ;;  %v338_v18 = vld [vmem:[%s6471_s0 + $0x3d0] sm:$0xff]  ;;  %v337_v59 = vld [vmem:[%s6471_s0 + $0x3c8] sm:$0xff] }
 0x1b8   : > { %v3733_v5 = vpop.f32.mrf.mxu0  ;;  %1740 = vmatprep.subr.mxu0 %v412_v62  ;;  %v3757_v54 = vpop.f32.mrf.mxu1  ;;  %v1104_v61 = vmul.f32 %v4714_v48, %v280_v58  ;;  %v282_v62 = vld [vmem:[%s6471_s0 + $0x210] sm:$0xff]  ;;  %v284_v48 = vld [vmem:[%s6471_s0 + $0x220] sm:$0xff] }
 0x1b9   : > { %3808 = vmatprep.mubr.f32.mxu0 %v1091_v2  ;;  %1741 = vmatpush1.msra.mxu0 %v411_v0  ;;  %v1094_v16 = vmul.f32 %v3733_v5, %v270_v9  ;;  %v1106_v0 = vmul.f32 %v4754_v7, %v282_v62  ;;  %v285_v2 = vld [vmem:[%s6471_s0 + $0x228] sm:$0xff]  ;;  %v1108_v5 = vmul.f32 %v3754_v34, %v284_v48  ;;  %v286_v7 = vld [vmem:[%s6471_s0 + $0x230] sm:$0xff]  ;;  %v336_v58 = vld [vmem:[%s6471_s0 + $0x3c0] sm:$0xff] }
 0x1ba   : > { %v974_v12 = vpop.f32.mrf.mxu0  ;;  %3809 = vmatmul.mubr.f32.gmra.mxu0 %v1092_v4  ;;  %1742 = vmatprep.subr.mxu0 %v408_v3  ;;  %v1054_v57 = vpop.f32.mrf.mxu1 }
 0x1bb   : > { %v1093_v14 = vmul.f32 %v974_v12, %v269_v6  ;;  %1743 = vmatpush1.msra.mxu0 %v407_v8  ;;  %v1109_v4 = vmul.f32 %v1054_v57, %v285_v2  ;;  %v287_v6 = vld [vmem:[%s6471_s0 + $0x238] sm:$0xff]  ;;  %v289_v12 = vld [vmem:[%s6471_s0 + $0x248] sm:$0xff] }
 0x1bc   : > { %v3736_v17 = vpop.f32.mrf.mxu0  ;;  %1744 = vmatprep.subr.mxu0 %v404_v11  ;;  %v3760_v26 = vpop.f32.mrf.mxu1  ;;  %v1110_v11 = vmul.f32 %v3757_v54, %v286_v7 }
 0x1bd   : > { %3811 = vmatprep.mubr.f32.mxu0 %v1093_v14  ;;  %1745 = vmatpush1.msra.mxu0 %v403_v13  ;;  %v1096_v30 = vmul.f32 %v3736_v17, %v272_v23  ;;  %v288_v14 = vld [vmem:[%s6471_s0 + $0x240] sm:$0xff] }
 0x1be   : > { %v984_v25 = vpop.f32.mrf.mxu0  ;;  %3812 = vmatmul.mubr.f32.gmra.mxu0 %v1094_v16  ;;  %1746 = vmatprep.subr.mxu0 %v400_v15  ;;  %v1064_v3 = vpop.f32.mrf.mxu1  ;;  %v1112_v16 = vmul.f32 %v3760_v26, %v288_v14  ;;  %v224_v17 = vld [vmem:[%s6471_s0 + $0x40] sm:$0x1] }
 0x1bf   : > { %v1095_v28 = vmul.f32 %v984_v25, %v271_v19  ;;  %1747 = vmatpush1.msra.mxu0 %v399_v22  ;;  %v1111_v9 = vmul.f32 %v1064_v3, %v287_v6  ;;  %v290_v19 = vld [vmem:[%s6471_s0 + $0x250] sm:$0xff]  ;;  %v647_v20 = vadd.f32 %v4647_v10, %v224_v17  ;;  %v3347_v6 = vld [vmem:[%s4889_s14 + $0x68] sm:$0xff]  }
 0x1c0   : > { %v3739_v31 = vpop.f32.mrf.mxu0  ;;  %1748 = vmatprep.subr.mxu0 %v396_v24  ;;  %v3763_v8 = vpop.f32.mrf.mxu1  ;;  %v4892_v24 = vld [vmem:[%s4889_s14 + $0xc0] sm:$0xff]   ;;  %v3261_v17 = vunpack.c.l.bf16 %v3347_v6 }
 0x1c1   : > { %3814 = vmatprep.mubr.f32.mxu0 %v1095_v28  ;;  %1749 = vmatpush1.msra.mxu0 %v395_v27  ;;  %v1098_v44 = vmul.f32 %v3739_v31, %v274_v36  ;;  %v1114_v22 = vmul.f32 %v3763_v8, %v290_v19  ;;  %v4880_v23 = vmax.f32 %v647_v20, 0.0  ;;  %v3305_v10 = vunpack.c.l.bf16 %v4892_v24 }
 0x1c2   : > { %v994_v39 = vpop.f32.mrf.mxu0  ;;  %3815 = vmatmul.mubr.f32.gmra.mxu0 %v1096_v30  ;;  %1750 = vmatprep.subr.mxu0 %v392_v29  ;;  %v1074_v13 = vpop.f32.mrf.mxu1 }
 0x1c3   : > { %v1097_v41 = vmul.f32 %v994_v39, %v273_v32  ;;  %1751 = vmatpush1.msra.mxu0 %v391_v35  ;;  %v1113_v15 = vmul.f32 %v1074_v13, %v289_v12  ;;  %3876 = vmatprep.mubr.f32.mxu1 %v3305_v10  ;;  %v3262_v12 = vunpack.c.h.bf16 %v3347_v6 }
 0x1c4   : > { %1752 = vmatprep.subr.mxu0 %v388_v38 }
 0x1c5   : > { %3817 = vmatprep.mubr.f32.mxu0 %v1097_v41  ;;  %1753 = vmatpush1.msra.mxu0 %v387_v40 }
 0x1c6   : > { %3818 = vmatmul.mubr.f32.gmra.mxu0 %v1098_v44  ;;  %1754 = vmatprep.subr.mxu0 %v384_v43 }
 0x1c7   : > { %3820 = vmatprep.mubr.f32.mxu0 %v1099_v42  ;;  %1755 = vmatpush1.msra.mxu0 %v383_v47 }
 0x1c8   : > { %1756 = vmatprep.subr.mxu0 %v380_v49 }
 0x1c9   : > { %1757 = vmatpush1.msra.mxu0 %v379_v50 }
 0x1ca   : > { %3821 = vmatmul.mubr.f32.gmra.mxu0 %v1100_v52  ;;  %3956 = vmatprep.subr.mxu0 %v6476_v1 }
 0x1cb   : > { %3823 = vmatprep.mubr.f32.mxu0 %v1101_v51 }
 0x1ce   : > { %3824 = vmatmul.mubr.f32.gmra.mxu0 %v1102_v56 }
 0x1cf   : > { %3826 = vmatprep.mubr.f32.mxu0 %v1103_v37  ;;  %v3349_v37 = vld [vmem:[%s4889_s14 + $0x78] sm:$0xff]  }
 0x1d0   : > { %v3270_v57 = vunpack.c.h.bf16 %v3349_v37  ;;  %v3269_v62 = vunpack.c.l.bf16 %v3349_v37  ;;  %v330_v37 = vld [vmem:[%s6471_s0 + $0x390] sm:$0xff] }
 0x1d2   : > { %3827 = vmatmul.mubr.f32.gmra.mxu0 %v1104_v61 }
 0x1d3   : > { %3829 = vmatprep.mubr.f32.mxu0 %v1105_v60  ;;  %v3348_v60 = vld [vmem:[%s4889_s14 + $0x70] sm:$0xff]  }
 0x1d4   : > { %v3266_v2 = vunpack.c.h.bf16 %v3348_v60  ;;  %v3265_v8 = vunpack.c.l.bf16 %v3348_v60 }
 0x1d6   : > { %3830 = vmatmul.mubr.f32.gmra.mxu0 %v1106_v0 }
 0x1d7   : > { %3832 = vmatprep.mubr.f32.mxu0 %v1107_v63  ;;  %v335_v63 = vld [vmem:[%s6471_s0 + $0x3b8] sm:$0xff] }
 0x1da   : > { %3833 = vmatmul.mubr.f32.gmra.mxu0 %v1108_v5  ;;  %v334_v5 = vld [vmem:[%s6471_s0 + $0x3b0] sm:$0xff] }
 0x1db   : > { %3835 = vmatprep.mubr.f32.mxu0 %v1109_v4 }
 0x1de   : > { %3836 = vmatmul.mubr.f32.gmra.mxu0 %v1110_v11  ;;  %v333_v11 = vld [vmem:[%s6471_s0 + $0x3a8] sm:$0xff] }
 0x1df   : > { %3838 = vmatprep.mubr.f32.mxu0 %v1111_v9 }
 0x1e2   : > { %3839 = vmatmul.mubr.f32.gmra.mxu0 %v1112_v16  ;;  %v3346_v16 = vld [vmem:[%s4889_s14 + $0x60] sm:$0xff]  }
 0x1e3   : > { %3841 = vmatprep.mubr.f32.mxu0 %v1113_v15  ;;  %v332_v15 = vld [vmem:[%s6471_s0 + $0x3a0] sm:$0xff]  ;;  %v3258_v10 = vunpack.c.h.bf16 %v3346_v16 }
 0x1e6   : > { %3842 = vmatmul.mubr.f32.gmra.mxu0 %v1114_v22  ;;  %v331_v22 = vld [vmem:[%s6471_s0 + $0x398] sm:$0xff] }
 0x1e7   : > { %1790 = vmatprep.mubr.f32.mxu0 %v6476_v1 }
 0x1ea   : > { %1791 = vmatmul.mubr.f32.vlgmr.msra.gmra.mxu0 %v4880_v23 }
 0x1eb   : > { %3988 = vmatprep.mubr.msk.f32.mxu0 %vm4393_vm2, %v6476_v1 }
 0x26a   : > { %v4895_v25 = vpop.f32.mrf.mxu0 }
 0x26c   : > { %v4897_v27 = vpop.f32.mrf.mxu0 }
 0x26e   : > { %v4899_v28 = vpop.f32.mrf.mxu0 }
 0x270   : > { %v4901_v29 = vpop.f32.mrf.mxu0 }
 0x272   : > { %v4903_v30 = vpop.f32.mrf.mxu0 }
 0x274   : > { %v4905_v31 = vpop.f32.mrf.mxu0 }
 0x276   : > { %v4907_v32 = vpop.f32.mrf.mxu0 }
 0x278   : > { %v4909_v33 = vpop.f32.mrf.mxu0 }
 0x27a   : > { %v4911_v34 = vpop.f32.mrf.mxu0 }
 0x27c   : > { %v4913_v35 = vpop.f32.mrf.mxu0 }
 0x27e   : > { %v4915_v36 = vpop.f32.mrf.mxu0 }
 0x280   : > { %v4917_v38 = vpop.f32.mrf.mxu0 }
 0x282   : > { %v4919_v39 = vpop.f32.mrf.mxu0 }
 0x284   : > { %v4921_v40 = vpop.f32.mrf.mxu0 }
 0x286   : > { %v4923_v41 = vpop.f32.mrf.mxu0 }
 0x288   : > { %v4925_v42 = vpop.f32.mrf.mxu0 }
 0x28a   : > { %v4927_v43 = vpop.f32.mrf.mxu0 }
 0x28c   : > { %v4929_v44 = vpop.f32.mrf.mxu0 }
 0x28e   : > { %v4931_v45 = vpop.f32.mrf.mxu0 }
 0x290   : > { %v4933_v46 = vpop.f32.mrf.mxu0 }
 0x292   : > { %v4935_v47 = vpop.f32.mrf.mxu0 }
 0x294   : > { %v4937_v21 = vpop.f32.mrf.mxu0 }
 0x296   : > { %v3831_v49 = vpop.f32.mrf.mxu0 }
 0x298   : > { %v4939_v50 = vpop.f32.mrf.mxu0 }
 0x29a   : > { %v3834_v51 = vpop.f32.mrf.mxu0 }
 0x29c   : > { %v1301_v52 = vpop.f32.mrf.mxu0 }
 0x29e   : > { %v3837_v53 = vpop.f32.mrf.mxu0 }
 0x29f   : > { %v1317_v13 = vadd.f32 %v3837_v53, %v334_v5  ;;  %v1307_v53 = vadd.f32 %v3834_v51, %v332_v15  ;;  %v1297_v51 = vadd.f32 %v3831_v49, %v330_v37  ;;  %v323_v15 = vld [vmem:[%s6471_s0 + $0x358] sm:$0xff] }
 0x2a0   : > { %v1311_v54 = vpop.f32.mrf.mxu0 }
 0x2a1   : > { %v1312_v19 = vadd.f32 %v1311_v54, %v333_v11  ;;  %v1302_v54 = vadd.f32 %v1301_v52, %v331_v22  ;;  %v324_v11 = vld [vmem:[%s6471_s0 + $0x360] sm:$0xff]  ;;  %v1262_v22 = vadd.f32 %v4929_v44, %v323_v15 }
 0x2a2   : > { %v3840_v55 = vpop.f32.mrf.mxu0 }
 0x2a3   : > { %v1327_v3 = vadd.f32 %v3840_v55, %v336_v58  ;;  %v1367_v55 = vmul.f32 %v3262_v12, %v1317_v13  ;;  %v329_v58 = vld [vmem:[%s6471_s0 + $0x388] sm:$0xff]  ;;  %v3342_v12 = vld [vmem:[%s4889_s14 + $0x40] sm:$0xff]  }
 0x2a4   : > { %v1321_v56 = vpop.f32.mrf.mxu0  ;;  %v1292_v52 = vadd.f32 %v4939_v50, %v329_v58 }
 0x2a5   : > { %v1322_v7 = vadd.f32 %v1321_v56, %v335_v63  ;;  %v1369_v14 = vmul.f32 %v3266_v2, %v1327_v3  ;;  %v3345_v56 = vld [vmem:[%s4889_s14 + $0x58] sm:$0xff]  }
 0x2a6   : > { %v3843_v61 = vpop.f32.mrf.mxu0  ;;  %v3254_v60 = vunpack.c.h.bf16 %v3345_v56 }
 0x2a7   : > { %v1337_v26 = vadd.f32 %v3843_v61, %v338_v18  ;;  %v1368_v20 = vmul.f32 %v3265_v8, %v1322_v7  ;;  %v3257_v18 = vunpack.c.l.bf16 %v3346_v16  ;;  %v1365_v61 = vmul.f32 %v3258_v10, %v1307_v53  ;;  %v325_v8 = vld [vmem:[%s6471_s0 + $0x368] sm:$0xff] }
 0x2a8   : > { %v1331_v0 = vpop.f32.mrf.mxu0  ;;  %v1363_v3 = vmul.f32 %v3254_v60, %v1297_v51  ;;  %v1272_v13 = vadd.f32 %v4933_v46, %v325_v8  ;;  %v1267_v16 = vadd.f32 %v4927_v43, %v324_v11  ;;  %v3241_v46 = vunpack.c.l.bf16 %v3342_v12  ;;  %v321_v53 = vld [vmem:[%s6471_s0 + $0x348] sm:$0xff] }
 0x2a9   : > { %v1371_v48 = vmul.f32 %v3270_v57, %v1337_v26  ;;  %v1332_v4 = vadd.f32 %v1331_v0, %v337_v59  ;;  %v1366_v57 = vmul.f32 %v3261_v17, %v1312_v19  ;;  %v328_v59 = vld [vmem:[%s6471_s0 + $0x380] sm:$0xff]  ;;  %v3344_v26 = vld [vmem:[%s4889_s14 + $0x50] sm:$0xff]   ;;  %v1364_v63 = vmul.f32 %v3257_v18, %v1302_v54  ;;  %v327_v0 = vld [vmem:[%s6471_s0 + $0x378] sm:$0xff] }
 0x2aa   : > { %v3250_v49 = vunpack.c.h.bf16 %v3344_v26  ;;  %v1287_v2 = vadd.f32 %v4935_v47, %v328_v59  ;;  %v3249_v50 = vunpack.c.l.bf16 %v3344_v26  ;;  %v1282_v5 = vadd.f32 %v4937_v21, %v327_v0  ;;  %v322_v19 = vld [vmem:[%s6471_s0 + $0x350] sm:$0xff]  ;;  %v320_v18 = vld [vmem:[%s6471_s0 + $0x340] sm:$0xff] }
 0x2ab   : > { %v1370_v9 = vmul.f32 %v3269_v62, %v1332_v4  ;;  %3844 = vmatprep.subr.mxu1 %v1371_v48  ;;  %v3253_v62 = vunpack.c.l.bf16 %v3345_v56  ;;  %v3343_v4 = vld [vmem:[%s4889_s14 + $0x48] sm:$0xff]   ;;  %v3340_v54 = vld [vmem:[%s4889_s14 + $0x30] sm:$0xff]   ;;  %v1356_v58 = vmul.f32 %v3241_v46, %v1262_v22  ;;  %v3306_v60 = vunpack.c.h.bf16 %v4892_v24 }
 0x2ac   : > { %3845 = vmatpush3.msra.mxu1 %v1371_v48  ;;  %v326_v48 = vld [vmem:[%s6471_s0 + $0x370] sm:$0xff]  ;;  %v3246_v47 = vunpack.c.h.bf16 %v3343_v4  ;;  %v3245_v21 = vunpack.c.l.bf16 %v3343_v4  ;;  %v3359_v56 = vld [vmem:[%s4889_s14 + $0xc8] sm:$0xff]   ;;  %v1247_v59 = vadd.f32 %v4919_v39, %v320_v18  ;;  %v3233_v24 = vunpack.c.l.bf16 %v3340_v54 }
 0x2ad   : > { %3846 = vmatprep.subr.mxu1 %v1370_v9  ;;  %v1362_v6 = vmul.f32 %v3253_v62, %v1292_v52  ;;  %v1277_v7 = vadd.f32 %v4931_v45, %v326_v48  ;;  %v3242_v45 = vunpack.c.h.bf16 %v3342_v12  ;;  %v3309_v51 = vunpack.c.l.bf16 %v3359_v56  ;;  %v3360_v62 = vld [vmem:[%s4889_s14 + $0xd0] sm:$0xff]   ;;  %v3339_v52 = vld [vmem:[%s4889_s14 + $0x28] sm:$0xff]  }
 0x2ae   : > { %3847 = vmatpush3.msra.mxu1 %v1370_v9  ;;  %v1361_v9 = vmul.f32 %v3250_v49, %v1287_v2  ;;  %v1358_v10 = vmul.f32 %v3245_v21, %v1272_v13  ;;  %v3310_v49 = vunpack.c.h.bf16 %v3359_v56  ;;  %v317_v39 = vld [vmem:[%s6471_s0 + $0x328] sm:$0xff]  ;;  %v3313_v2 = vunpack.c.l.bf16 %v3360_v62  ;;  %v3362_v13 = vld [vmem:[%s4889_s14 + $0xe0] sm:$0xff]  }
 0x2af   : > { %3848 = vmatprep.subr.mxu1 %v1369_v14  ;;  %v1359_v17 = vmul.f32 %v3246_v47, %v1277_v7  ;;  %v1357_v37 = vmul.f32 %v3242_v45, %v1267_v16  ;;  %v1232_v8 = vadd.f32 %v4917_v38, %v317_v39  ;;  %v3314_v7 = vunpack.c.h.bf16 %v3360_v62  ;;  %v314_v38 = vld [vmem:[%s6471_s0 + $0x310] sm:$0xff] }
 0x2b0   : > { %3849 = vmatpush3.msra.mxu1 %v1369_v14  ;;  %v1360_v14 = vmul.f32 %v3249_v50, %v1282_v5  ;;  %v3361_v50 = vld [vmem:[%s4889_s14 + $0xd8] sm:$0xff]   ;;  %v3338_v5 = vld [vmem:[%s4889_s14 + $0x20] sm:$0xff]   ;;  %v1217_v46 = vadd.f32 %v4907_v32, %v314_v38  ;;  %v3322_v56 = vunpack.c.h.bf16 %v3362_v13 }
 0x2b1   : > { %3850 = vmatprep.subr.mxu1 %v1368_v20  ;;  %v3226_v11 = vunpack.c.h.bf16 %v3338_v5  ;;  %v3225_v15 = vunpack.c.l.bf16 %v3338_v5  ;;  %v311_v32 = vld [vmem:[%s6471_s0 + $0x2f8] sm:$0xff]  ;;  %v5106_v38 = vld [vmem:[%s6472_s1 + $0x320] sm:$0xff] }
 0x2b2   : > { %3851 = vmatpush3.msra.mxu1 %v1368_v20  ;;  %v3341_v20 = vld [vmem:[%s4889_s14 + $0x38] sm:$0xff]  }
 0x2b3   : > { %3852 = vmatprep.subr.mxu1 %v1367_v55  ;;  %v3238_v43 = vunpack.c.h.bf16 %v3341_v20  ;;  %v3237_v44 = vunpack.c.l.bf16 %v3341_v20 }
 0x2b4   : > { %3853 = vmatpush3.msra.mxu1 %v1367_v55  ;;  %v1257_v55 = vadd.f32 %v4923_v41, %v322_v19  ;;  %v319_v41 = vld [vmem:[%s6471_s0 + $0x338] sm:$0xff]  ;;  %v3321_v19 = vunpack.c.l.bf16 %v3362_v13  ;;  %v5100_v13 = vld [vmem:[%s6472_s1 + $0x328] sm:$0xff] }
 0x2b5   : > { %3854 = vmatprep.subr.mxu1 %v1366_v57 }
 0x2b6   : > { %3855 = vmatpush3.msra.mxu1 %v1366_v57  ;;  %v1252_v57 = vadd.f32 %v4925_v42, %v321_v53  ;;  %v1355_v26 = vmul.f32 %v3238_v43, %v1257_v55  ;;  %v318_v42 = vld [vmem:[%s6471_s0 + $0x330] sm:$0xff] }
 0x2b7   : > { %3856 = vmatprep.subr.mxu1 %v1365_v61  ;;  %v1237_v48 = vadd.f32 %v4915_v36, %v318_v42  ;;  %v315_v36 = vld [vmem:[%s6471_s0 + $0x318] sm:$0xff]  ;;  %v3336_v53 = vld [vmem:[%s4889_s14 + $0x10] sm:$0xff]  }
 0x2b8   : > { %3857 = vmatpush3.msra.mxu1 %v1365_v61  ;;  %v3234_v61 = vunpack.c.h.bf16 %v3340_v54  ;;  %v1354_v0 = vmul.f32 %v3237_v44, %v1252_v57  ;;  %v1222_v45 = vadd.f32 %v4913_v35, %v315_v36  ;;  %v312_v35 = vld [vmem:[%s6471_s0 + $0x300] sm:$0xff]  ;;  %v3218_v54 = vunpack.c.h.bf16 %v3336_v53  ;;  %v3351_v36 = vld [vmem:[%s4889_s14 + $0x88] sm:$0xff]  }
 0x2b9   : > { %3858 = vmatprep.subr.mxu1 %v1364_v63  ;;  %v1207_v44 = vadd.f32 %v4903_v30, %v312_v35  ;;  %v309_v30 = vld [vmem:[%s6471_s0 + $0x2e8] sm:$0xff]  ;;  %v3354_v35 = vld [vmem:[%s4889_s14 + $0xa0] sm:$0xff]  }
 0x2ba   : > { %3859 = vmatpush3.msra.mxu1 %v1364_v63  ;;  %v1242_v63 = vadd.f32 %v4921_v40, %v319_v41  ;;  %v1353_v4 = vmul.f32 %v3234_v61, %v1247_v59  ;;  %v316_v40 = vld [vmem:[%s6471_s0 + $0x320] sm:$0xff]  ;;  %v3217_v41 = vunpack.c.l.bf16 %v3336_v53  ;;  %v5150_v53 = vld [vmem:[%s6472_s1 + $0x248] sm:$0xff] }
 0x2bb   : > { %3860 = vmatprep.subr.mxu1 %v1363_v3  ;;  %v1227_v12 = vadd.f32 %v4911_v34, %v316_v40  ;;  %v313_v34 = vld [vmem:[%s6471_s0 + $0x308] sm:$0xff]  ;;  %v3350_v40 = vld [vmem:[%s4889_s14 + $0x80] sm:$0xff]  }
 0x2bc   : > { %3861 = vmatpush3.msra.mxu1 %v1363_v3  ;;  %v3230_v3 = vunpack.c.h.bf16 %v3339_v52  ;;  %v1352_v47 = vmul.f32 %v3233_v24, %v1242_v63  ;;  %v1212_v55 = vadd.f32 %v4909_v33, %v313_v34  ;;  %v310_v33 = vld [vmem:[%s6471_s0 + $0x2f0] sm:$0xff]  ;;  %v3365_v24 = vld [vmem:[%s4889_s14 + $0xf8] sm:$0xff]   ;;  %v3208_v63 = vld [vmem:[%s4889_s14] sm:$0xff]  }
 0x2bd   : > { %3862 = vmatprep.subr.mxu1 %v1362_v6  ;;  %v1349_v22 = vmul.f32 %v3226_v11, %v1227_v12  ;;  %v1197_v42 = vadd.f32 %v4899_v28, %v310_v33  ;;  %v307_v28 = vld [vmem:[%s6471_s0 + $0x2d8] sm:$0xff]  ;;  %v3277_v11 = vunpack.c.l.bf16 %v3351_v36 }
 0x2be   : > { %3863 = vmatpush3.msra.mxu1 %v1362_v6  ;;  %v3229_v6 = vunpack.c.l.bf16 %v3339_v52  ;;  %v1351_v21 = vmul.f32 %v3230_v3, %v1237_v48  ;;  %v1345_v52 = vmul.f32 %v3218_v54, %v1207_v44  ;;  %v3333_v3 = vunpack.c.l.bf16 %v3365_v24  ;;  %v5094_v12 = vld [vmem:[%s6472_s1 + $0x358] sm:$0xff]  ;;  %v5181_v44 = vld [vmem:[%s6472_s1 + $0x1d0] sm:$0xff] }
 0x2bf   : > { %3864 = vmatprep.subr.mxu1 %v1361_v9  ;;  %v3210_v48 = vunpack.c.h.bf16 %v3208_v63  ;;  %v1182_v5 = vadd.f32 %v4897_v27, %v307_v28  ;;  %v5089_v27 = vld [vmem:[%s6472_s1 + $0x360] sm:$0xff]  ;;  %v5125_v34 = vld [vmem:[%s6472_s1 + $0x2b8] sm:$0xff]  ;;  %6578 = vst [vmem:[#allocation4_spill] sm:$0xff] %v5181_v44 }
 0x2c0   : > { %3865 = vmatpush3.msra.mxu1 %v1361_v9  ;;  %v3317_v9 = vunpack.c.l.bf16 %v3361_v50  ;;  %v1350_v16 = vmul.f32 %v3229_v6, %v1232_v8  ;;  %v3334_v8 = vunpack.c.h.bf16 %v3365_v24  ;;  %v5175_v54 = vld [vmem:[%s6472_s1 + $0x1d8] sm:$0xff]  ;;  %v5231_v24 = vld [vmem:[%s6472_s1 + $0xf0] sm:$0xff] }
 0x2c1   : > { %3866 = vmatprep.subr.mxu1 %v1360_v14  ;;  %6577 = vst [vmem:[#allocation3_spill] sm:$0xff] %v5175_v54  ;;  %6586 = vst [vmem:[#allocation12_spill] sm:$0xff] %v5231_v24 }
 0x2c2   : > { %3867 = vmatpush3.msra.mxu1 %v1360_v14  ;;  %v3337_v14 = vld [vmem:[%s4889_s14 + $0x18] sm:$0xff]  }
 0x2c3   : > { %3868 = vmatprep.subr.mxu1 %v1359_v17  ;;  %v3222_v20 = vunpack.c.h.bf16 %v3337_v14  ;;  %v3221_v43 = vunpack.c.l.bf16 %v3337_v14  ;;  %v3278_v14 = vunpack.c.h.bf16 %v3351_v36  ;;  %v5331_v36 = vld [vmem:[%s6472_s1 + $0x2c0] sm:$0xff] }
 0x2c4   : > { %3869 = vmatpush3.msra.mxu1 %v1359_v17  ;;  %v3318_v17 = vunpack.c.h.bf16 %v3361_v50  ;;  %6602 = vst [vmem:[#allocation28_spill] sm:$0xff] %v5331_v36 }
 0x2c5   : > { %3870 = vmatprep.subr.mxu1 %v1358_v10  ;;  %v1347_v57 = vmul.f32 %v3222_v20, %v1217_v46  ;;  %v1346_v61 = vmul.f32 %v3221_v43, %v1212_v55  ;;  %v5137_v46 = vld [vmem:[%s6472_s1 + $0x280] sm:$0xff] }
 0x2c6   : > { %3871 = vmatpush3.msra.mxu1 %v1358_v10  ;;  %v3363_v10 = vld [vmem:[%s4889_s14 + $0xe8] sm:$0xff]   ;;  %v5156_v43 = vld [vmem:[%s6472_s1 + $0x240] sm:$0xff] }
 0x2c7   : > { %3872 = vmatprep.subr.mxu1 %v1357_v37  ;;  %v3325_v18 = vunpack.c.l.bf16 %v3363_v10  ;;  %v3326_v59 = vunpack.c.h.bf16 %v3363_v10  ;;  %v5143_v10 = vld [vmem:[%s6472_s1 + $0x278] sm:$0xff] }
 0x2c8   : > { %3873 = vmatpush3.msra.mxu1 %v1357_v37  ;;  %v1348_v37 = vmul.f32 %v3225_v15, %v1222_v45  ;;  %v5112_v15 = vld [vmem:[%s6472_s1 + $0x2f0] sm:$0xff] }
 0x2c9   : > { %3874 = vmatprep.subr.mxu1 %v1356_v58 }
 0x2ca   : > { %3875 = vmatpush3.msra.mxu1 %v1356_v58  ;;  %v3364_v58 = vld [vmem:[%s4889_s14 + $0xf0] sm:$0xff]  }
 0x2cb   : > { %3877 = vmatmul.mubr.f32.vlgmr.msra.gmra.mxu1 %v3306_v60  ;;  %3900 = vmatprep.subr.mxu1 %v1355_v26  ;;  %v3335_v60 = vld [vmem:[%s4889_s14 + $0x8] sm:$0xff]  }
 0x2cc   : > { %3901 = vmatpush3.msra.mxu1 %v1355_v26  ;;  %3879 = vmatprep.mubr.f32.mxu1 %v3309_v51  ;;  %v1202_v51 = vadd.f32 %v4905_v31, %v311_v32  ;;  %v3329_v26 = vunpack.c.l.bf16 %v3364_v58  ;;  %v3214_v62 = vunpack.c.h.bf16 %v3335_v60  ;;  %v308_v31 = vld [vmem:[%s6471_s0 + $0x2e0] sm:$0xff]  ;;  %v5168_v32 = vld [vmem:[%s6472_s1 + $0x208] sm:$0xff] }
 0x2cd   : > { %3902 = vmatprep.subr.mxu1 %v1354_v0  ;;  %6576 = vst [vmem:[#allocation2_spill] sm:$0xff] %v5168_v32 }
 0x2ce   : > { %3903 = vmatpush3.msra.mxu1 %v1354_v0  ;;  %v3213_v0 = vunpack.c.l.bf16 %v3335_v60  ;;  %v1344_v39 = vmul.f32 %v3217_v41, %v1202_v51  ;;  %v1343_v50 = vmul.f32 %v3214_v62, %v1197_v42  ;;  %v5193_v60 = vld [vmem:[%s6472_s1 + $0x198] sm:$0xff]  ;;  %v3356_v41 = vld [vmem:[%s4889_s14 + $0xb0] sm:$0xff]   ;;  %v5200_v51 = vld [vmem:[%s6472_s1 + $0x168] sm:$0xff] }
 0x2cf   : > { %3880 = vmatmul.mubr.f32.gmra.mxu1 %v3310_v49  ;;  %3904 = vmatprep.subr.mxu1 %v1353_v4  ;;  %v1192_v49 = vadd.f32 %v4901_v29, %v309_v30  ;;  %v3209_v29 = vunpack.c.l.bf16 %v3208_v63  ;;  %6580 = vst [vmem:[#allocation6_spill] sm:$0xff] %v5193_v60  ;;  %6581 = vst [vmem:[#allocation7_spill] sm:$0xff] %v5200_v51  ;;  %v5212_v30 = vld [vmem:[%s6472_s1 + $0x130] sm:$0xff]  ;;  %v5218_v62 = vld [vmem:[%s6472_s1 + $0x128] sm:$0xff] }
 0x2d0   : > { %3905 = vmatpush3.msra.mxu1 %v1353_v4  ;;  %3882 = vmatprep.mubr.f32.mxu1 %v3313_v2  ;;  %v3330_v2 = vunpack.c.h.bf16 %v3364_v58  ;;  %v1187_v4 = vadd.f32 %v4895_v25, %v308_v31  ;;  %v5187_v58 = vld [vmem:[%s6472_s1 + $0x1a0] sm:$0xff]  ;;  %6583 = vst [vmem:[#allocation9_spill] sm:$0xff] %v5212_v30  ;;  %6584 = vst [vmem:[#allocation10_spill] sm:$0xff] %v5218_v62  ;;  %v3357_v42 = vld [vmem:[%s4889_s14 + $0xb8] sm:$0xff]   ;;  %v3298_v31 = vunpack.c.h.bf16 %v3356_v41 }
 0x2d1   : > { %3906 = vmatprep.subr.mxu1 %v1352_v47  ;;  %v1342_v6 = vmul.f32 %v3213_v0, %v1192_v49  ;;  %v1340_v25 = vmul.f32 %v3209_v29, %v1182_v5  ;;  %6579 = vst [vmem:[#allocation5_spill] sm:$0xff] %v5187_v58  ;;  %v5237_v63 = vld [vmem:[%s6472_s1 + $0xc0] sm:$0xff]  ;;  %v3301_v0 = vunpack.c.l.bf16 %v3357_v42  ;;  %v5243_v49 = vld [vmem:[%s6472_s1 + $0xb8] sm:$0xff]  ;;  %v3302_v28 = vunpack.c.h.bf16 %v3357_v42  ;;  %v5295_v29 = vld [vmem:[%s6472_s1 + $0x368] sm:$0xff] }
 0x2d2   : > { %3907 = vmatpush3.msra.mxu1 %v1352_v47  ;;  %v3273_v47 = vunpack.c.l.bf16 %v3350_v40  ;;  %6587 = vst [vmem:[#allocation13_spill] sm:$0xff] %v5237_v63  ;;  %6588 = vst [vmem:[#allocation14_spill] sm:$0xff] %v5243_v49  ;;  %v5301_v5 = vld [vmem:[%s6472_s1 + $0x338] sm:$0xff] }
 0x2d3   : > { %3883 = vmatmul.mubr.f32.gmra.mxu1 %v3314_v7  ;;  %3908 = vmatprep.subr.mxu1 %v1351_v21  ;;  %v1341_v7 = vmul.f32 %v3210_v48, %v1187_v4  ;;  %v5267_v48 = vld [vmem:[%s6472_s1 + $0x48] sm:$0xff]  ;;  %v5273_v4 = vld [vmem:[%s6472_s1 + $0x18] sm:$0xff]  ;;  %6596 = vst [vmem:[#allocation22_spill] sm:$0xff] %v5295_v29  ;;  %6597 = vst [vmem:[#allocation23_spill] sm:$0xff] %v5301_v5 }
 0x2d4   : > { %3909 = vmatpush3.msra.mxu1 %v1351_v21  ;;  %3885 = vmatprep.mubr.f32.mxu1 %v3317_v9  ;;  %v3274_v9 = vunpack.c.h.bf16 %v3350_v40  ;;  %v3352_v21 = vld [vmem:[%s4889_s14 + $0x90] sm:$0xff]   ;;  %6592 = vst [vmem:[#allocation18_spill] sm:$0xff] %v5267_v48  ;;  %6593 = vst [vmem:[#allocation19_spill] sm:$0xff] %v5273_v4 }
 0x2d5   : > { %3910 = vmatprep.subr.mxu1 %v1350_v16  ;;  %v3281_v45 = vunpack.c.l.bf16 %v3352_v21  ;;  %v3282_v20 = vunpack.c.h.bf16 %v3352_v21  ;;  %v5290_v40 = vld [vmem:[%s6472_s1 + $0x370] sm:$0xff] }
 0x2d6   : > { %3911 = vmatpush3.msra.mxu1 %v1350_v16  ;;  %v5118_v16 = vld [vmem:[%s6472_s1 + $0x2e8] sm:$0xff]  ;;  %6595 = vst [vmem:[#allocation21_spill] sm:$0xff] %v5290_v40  ;;  %v5355_v21 = vld [vmem:[%s6472_s1 + $0x250] sm:$0xff] }
 0x2d7   : > { %3886 = vmatmul.mubr.f32.gmra.mxu1 %v3318_v17  ;;  %3912 = vmatprep.subr.mxu1 %v1349_v22  ;;  %v3353_v17 = vld [vmem:[%s4889_s14 + $0x98] sm:$0xff]   ;;  %6606 = vst [vmem:[#allocation32_spill] sm:$0xff] %v5355_v21 }
 0x2d8   : > { %3913 = vmatpush3.msra.mxu1 %v1349_v22  ;;  %3888 = vmatprep.mubr.f32.mxu1 %v3321_v19  ;;  %v5131_v19 = vld [vmem:[%s6472_s1 + $0x2b0] sm:$0xff]  ;;  %v3285_v22 = vunpack.c.l.bf16 %v3353_v17  ;;  %v3286_v55 = vunpack.c.h.bf16 %v3353_v17  ;;  %v5373_v17 = vld [vmem:[%s6472_s1 + $0x1e8] sm:$0xff] }
 0x2d9   : > { %3914 = vmatprep.subr.mxu1 %v1348_v37  ;;  %6609 = vst [vmem:[#allocation35_spill] sm:$0xff] %v5373_v17 }
 0x2da   : > { %3915 = vmatpush3.msra.mxu1 %v1348_v37  ;;  %v5162_v37 = vld [vmem:[%s6472_s1 + $0x210] sm:$0xff] }
 0x2db   : > { %3889 = vmatmul.mubr.f32.gmra.mxu1 %v3322_v56  ;;  %3916 = vmatprep.subr.mxu1 %v1347_v57  ;;  %v3289_v56 = vunpack.c.l.bf16 %v3354_v35 }
 0x2dc   : > { %3917 = vmatpush3.msra.mxu1 %v1347_v57  ;;  %3891 = vmatprep.mubr.f32.mxu1 %v3325_v18  ;;  %v3355_v18 = vld [vmem:[%s4889_s14 + $0xa8] sm:$0xff]   ;;  %v3290_v57 = vunpack.c.h.bf16 %v3354_v35  ;;  %s215_s14 = scalar_lea.vmem %s6475_s4, %s3158_s17 }
 0x2dd   : > { %3918 = vmatprep.subr.mxu1 %v1346_v61  ;;  %v3293_v33 = vunpack.c.l.bf16 %v3355_v18  ;;  %v5391_v35 = vld [vmem:[%s6472_s1 + $0x1a8] sm:$0xff] }
 0x2de   : > { %3919 = vmatpush3.msra.mxu1 %v1346_v61  ;;  %v5206_v61 = vld [vmem:[%s6472_s1 + $0x160] sm:$0xff]  ;;  %6612 = vst [vmem:[#allocation38_spill] sm:$0xff] %v5391_v35 }
 0x2df   : > { %3892 = vmatmul.mubr.f32.gmra.mxu1 %v3326_v59  ;;  %3920 = vmatprep.subr.mxu1 %v1345_v52  ;;  %6582 = vst [vmem:[#allocation8_spill] sm:$0xff] %v5206_v61  ;;  %v3294_v59 = vunpack.c.h.bf16 %v3355_v18  ;;  %v5409_v18 = vld [vmem:[%s6472_s1 + $0x140] sm:$0xff] }
 0x2e0   : > { %3921 = vmatpush3.msra.mxu1 %v1345_v52  ;;  %3894 = vmatprep.mubr.f32.mxu1 %v3329_v26  ;;  %v3297_v26 = vunpack.c.l.bf16 %v3356_v41  ;;  %v5225_v52 = vld [vmem:[%s6472_s1 + $0xf8] sm:$0xff]  ;;  %6615 = vst [vmem:[#allocation41_spill] sm:$0xff] %v5409_v18  ;;  %v5427_v41 = vld [vmem:[%s6472_s1 + $0x100] sm:$0xff] }
 0x2e1   : > { %3922 = vmatprep.subr.mxu1 %v1344_v39  ;;  %6585 = vst [vmem:[#allocation11_spill] sm:$0xff] %v5225_v52  ;;  %6618 = vst [vmem:[#allocation44_spill] sm:$0xff] %v5427_v41 }
 0x2e2   : > { %3923 = vmatpush3.msra.mxu1 %v1344_v39  ;;  %v5249_v39 = vld [vmem:[%s6472_s1 + $0x88] sm:$0xff] }
 0x2e3   : > { %3895 = vmatmul.mubr.f32.gmra.mxu1 %v3330_v2  ;;  %3924 = vmatprep.subr.mxu1 %v1343_v50  ;;  %6589 = vst [vmem:[#allocation15_spill] sm:$0xff] %v5249_v39  ;;  %v5255_v2 = vld [vmem:[%s6472_s1 + $0x80] sm:$0xff] }
 0x2e4   : > { %3925 = vmatpush3.msra.mxu1 %v1343_v50  ;;  %3897 = vmatprep.mubr.f32.mxu1 %v3333_v3  ;;  %6590 = vst [vmem:[#allocation16_spill] sm:$0xff] %v5255_v2  ;;  %v5261_v3 = vld [vmem:[%s6472_s1 + $0x50] sm:$0xff] }
 0x2e5   : > { %3926 = vmatprep.subr.mxu1 %v1342_v6  ;;  %6591 = vst [vmem:[#allocation17_spill] sm:$0xff] %v5261_v3  ;;  %v5279_v50 = vld [vmem:[%s6472_s1 + $0x10] sm:$0xff] }
 0x2e6   : > { %3927 = vmatpush3.msra.mxu1 %v1342_v6  ;;  %6594 = vst [vmem:[#allocation20_spill] sm:$0xff] %v5279_v50  ;;  %v5307_v6 = vld [vmem:[%s6472_s1 + $0x330] sm:$0xff] }
 0x2e7   : > { %3898 = vmatmul.mubr.f32.gmra.mxu1 %v3334_v8  ;;  %3928 = vmatprep.subr.mxu1 %v1341_v7  ;;  %6598 = vst [vmem:[#allocation24_spill] sm:$0xff] %v5307_v6  ;;  %v5313_v8 = vld [vmem:[%s6472_s1 + $0x300] sm:$0xff] }
 0x2e8   : > { %3929 = vmatpush3.msra.mxu1 %v1341_v7  ;;  %3932 = vmatprep.mubr.f32.mxu1 %v3273_v47  ;;  %6599 = vst [vmem:[#allocation25_spill] sm:$0xff] %v5313_v8  ;;  %v5319_v47 = vld [vmem:[%s6472_s1 + $0x2f8] sm:$0xff]  ;;  %v5325_v7 = vld [vmem:[%s6472_s1 + $0x2c8] sm:$0xff] }
 0x2e9   : > { %3930 = vmatprep.subr.mxu1 %v1340_v25  ;;  %6600 = vst [vmem:[#allocation26_spill] sm:$0xff] %v5319_v47  ;;  %6601 = vst [vmem:[#allocation27_spill] sm:$0xff] %v5325_v7 }
 0x2ea   : > { %3931 = vmatpush3.msra.mxu1 %v1340_v25  ;;  %v5337_v25 = vld [vmem:[%s6472_s1 + $0x290] sm:$0xff] }
 0x2eb   : > { %3933 = vmatmul.mubr.f32.vlgmr.msra.gmra.mxu1 %v3274_v9  ;;  %1797 = vmatprep.subr.mxu1 %v5089_v27  ;;  %6603 = vst [vmem:[#allocation29_spill] sm:$0xff] %v5337_v25  ;;  %v5343_v9 = vld [vmem:[%s6472_s1 + $0x288] sm:$0xff] }
 0x2ec   : > { %1798 = vmatpush1.msra.mxu1 %v5094_v12  ;;  %3935 = vmatprep.mubr.f32.mxu1 %v3277_v11  ;;  %6604 = vst [vmem:[#allocation30_spill] sm:$0xff] %v5343_v9  ;;  %v5349_v11 = vld [vmem:[%s6472_s1 + $0x258] sm:$0xff] }
 0x2ed   : > { %1799 = vmatprep.subr.mxu1 %v5100_v13  ;;  %6605 = vst [vmem:[#allocation31_spill] sm:$0xff] %v5349_v11 }
 0x2ee   : > { %1800 = vmatpush1.msra.mxu1 %v5106_v38 }
 0x2ef   : > { %3936 = vmatmul.mubr.f32.gmra.mxu1 %v3278_v14  ;;  %1801 = vmatprep.subr.mxu1 %v5112_v15  ;;  %v5361_v14 = vld [vmem:[%s6472_s1 + $0x220] sm:$0xff] }
 0x2f0   : > { %1802 = vmatpush1.msra.mxu1 %v5118_v16  ;;  %3938 = vmatprep.mubr.f32.mxu1 %v3281_v45  ;;  %6607 = vst [vmem:[#allocation33_spill] sm:$0xff] %v5361_v14  ;;  %v5367_v45 = vld [vmem:[%s6472_s1 + $0x218] sm:$0xff] }
 0x2f1   : > { %1803 = vmatprep.subr.mxu1 %v5125_v34  ;;  %6608 = vst [vmem:[#allocation34_spill] sm:$0xff] %v5367_v45 }
 0x2f2   : > { %1804 = vmatpush1.msra.mxu1 %v5131_v19 }
 0x2f3   : > { %3939 = vmatmul.mubr.f32.gmra.mxu1 %v3282_v20  ;;  %1805 = vmatprep.subr.mxu1 %v5137_v46  ;;  %v5379_v20 = vld [vmem:[%s6472_s1 + $0x1e0] sm:$0xff] }
 0x2f4   : > { %1806 = vmatpush1.msra.mxu1 %v5143_v10  ;;  %3941 = vmatprep.mubr.f32.mxu1 %v3285_v22  ;;  %6610 = vst [vmem:[#allocation36_spill] sm:$0xff] %v5379_v20  ;;  %v5385_v22 = vld [vmem:[%s6472_s1 + $0x1b0] sm:$0xff] }
 0x2f5   : > { %1807 = vmatprep.subr.mxu1 %v5150_v53  ;;  %6611 = vst [vmem:[#allocation37_spill] sm:$0xff] %v5385_v22 }
 0x2f6   : > { %1808 = vmatpush1.msra.mxu1 %v5156_v43 }
 0x2f7   : > { %3942 = vmatmul.mubr.f32.gmra.mxu1 %v3286_v55  ;;  %1809 = vmatprep.subr.mxu1 %v5162_v37  ;;  %v5397_v55 = vld [vmem:[%s6472_s1 + $0x178] sm:$0xff] }
 0x2f8   : > { %1810 = vmatpush1.msra.mxu1 %v5168_v32  ;;  %3944 = vmatprep.mubr.f32.mxu1 %v3289_v56  ;;  %6613 = vst [vmem:[#allocation39_spill] sm:$0xff] %v5397_v55  ;;  %v5403_v56 = vld [vmem:[%s6472_s1 + $0x170] sm:$0xff] }
 0x2f9   : > { %1811 = vmatprep.subr.mxu1 %v5175_v54  ;;  %6614 = vst [vmem:[#allocation40_spill] sm:$0xff] %v5403_v56 }
 0x2fa   : > { %1812 = vmatpush1.msra.mxu1 %v5181_v44 }
 0x2fb   : > { %3945 = vmatmul.mubr.f32.gmra.mxu1 %v3290_v57  ;;  %1813 = vmatprep.subr.mxu1 %v5187_v58  ;;  %v5415_v57 = vld [vmem:[%s6472_s1 + $0x138] sm:$0xff] }
 0x2fc   : > { %1814 = vmatpush1.msra.mxu1 %v5193_v60  ;;  %3947 = vmatprep.mubr.f32.mxu1 %v3293_v33  ;;  %6616 = vst [vmem:[#allocation42_spill] sm:$0xff] %v5415_v57  ;;  %v5421_v33 = vld [vmem:[%s6472_s1 + $0x108] sm:$0xff] }
 0x2fd   : > { %1815 = vmatprep.subr.mxu1 %v5200_v51  ;;  %6617 = vst [vmem:[#allocation43_spill] sm:$0xff] %v5421_v33 }
 0x2fe   : > { %1816 = vmatpush1.msra.mxu1 %v5206_v61 }
 0x2ff   : > { %3948 = vmatmul.mubr.f32.gmra.mxu1 %v3294_v59  ;;  %1817 = vmatprep.subr.mxu1 %v5212_v30  ;;  %v5433_v59 = vld [vmem:[%s6472_s1 + $0xd0] sm:$0xff] }
 0x300   : > { %1818 = vmatpush1.msra.mxu1 %v5218_v62  ;;  %3950 = vmatprep.mubr.f32.mxu1 %v3297_v26  ;;  %6619 = vst [vmem:[#allocation45_spill] sm:$0xff] %v5433_v59 }
 0x301   : > { %1819 = vmatprep.subr.mxu1 %v5225_v52 }
 0x302   : > { %1820 = vmatpush1.msra.mxu1 %v5231_v24 }
 0x303   : > { %3951 = vmatmul.mubr.f32.gmra.mxu1 %v3298_v31  ;;  %1821 = vmatprep.subr.mxu1 %v5237_v63 }
 0x304   : > { %1822 = vmatpush1.msra.mxu1 %v5243_v49  ;;  %3953 = vmatprep.mubr.f32.mxu1 %v3301_v0 }
 0x305   : > { %1823 = vmatprep.subr.mxu1 %v5249_v39 }
 0x306   : > { %1824 = vmatpush1.msra.mxu1 %v5255_v2 }
 0x307   : > { %3954 = vmatmul.mubr.f32.gmra.mxu1 %v3302_v28  ;;  %1825 = vmatprep.subr.mxu1 %v5261_v3  ;;  %v6620_v3 = vmov 0.0  }
 0x308   : > { %1826 = vmatpush1.msra.mxu1 %v5267_v48  ;;  %1861 = vmatprep.mubr.f32.mxu1 %v6476_v1 }
 0x309   : > { %1827 = vmatprep.subr.mxu1 %v5273_v4 }
 0x30a   : > { %1828 = vmatpush1.msra.mxu1 %v5279_v50 }
 0x30b   : > { %1862 = vmatmul.mubr.f32.vlgmr.msra.gmra.mxu1 %v4880_v23  ;;  %1941 = vmatprep.subr.mxu1 %v5290_v40 }
 0x30c   : > { %2005 = vmatprep.mubr.f32.mxu1 %v6476_v1  ;;  %1942 = vmatpush1.msra.mxu1 %v5295_v29 }
 0x30d   : > { %1943 = vmatprep.subr.mxu1 %v5301_v5 }
 0x30e   : > { %1944 = vmatpush1.msra.mxu1 %v5307_v6 }
 0x30f   : > { %1945 = vmatprep.subr.mxu1 %v5313_v8 }
 0x310   : > { %1946 = vmatpush1.msra.mxu1 %v5319_v47 }
 0x311   : > { %1947 = vmatprep.subr.mxu1 %v5325_v7 }
 0x312   : > { %1948 = vmatpush1.msra.mxu1 %v5331_v36 }
 0x313   : > { %1949 = vmatprep.subr.mxu1 %v5337_v25 }
 0x314   : > { %1950 = vmatpush1.msra.mxu1 %v5343_v9 }
 0x315   : > { %1951 = vmatprep.subr.mxu1 %v5349_v11 }
 0x316   : > { %1952 = vmatpush1.msra.mxu1 %v5355_v21 }
 0x317   : > { %1953 = vmatprep.subr.mxu1 %v5361_v14 }
 0x318   : > { %1954 = vmatpush1.msra.mxu1 %v5367_v45 }
 0x319   : > { %1955 = vmatprep.subr.mxu1 %v5373_v17 }
 0x31a   : > { %1956 = vmatpush1.msra.mxu1 %v5379_v20 }
 0x31b   : > { %1957 = vmatprep.subr.mxu1 %v5385_v22 }
 0x31c   : > { %1958 = vmatpush1.msra.mxu1 %v5391_v35 }
 0x31d   : > { %1959 = vmatprep.subr.mxu1 %v5397_v55 }
 0x31e   : > { %1960 = vmatpush1.msra.mxu1 %v5403_v56 }
 0x31f   : > { %1961 = vmatprep.subr.mxu1 %v5409_v18 }
 0x320   : > { %1962 = vmatpush1.msra.mxu1 %v5415_v57 }
 0x321   : > { %1963 = vmatprep.subr.mxu1 %v5421_v33 }
 0x322   : > { %1964 = vmatpush1.msra.mxu1 %v5427_v41 }
 0x323   : > { %1965 = vmatprep.subr.mxu1 %v5433_v59 }
 0x38b   : > { %v5437_v26 = vpop.f32.mrf.mxu1 }
 0x38d   : > { %v5439_v42 = vpop.f32.mrf.mxu1 }
 0x38f   : > { %v5441_v31 = vpop.f32.mrf.mxu1 }
 0x391   : > { %v5443_v0 = vpop.f32.mrf.mxu1 }
 0x393   : > { %v3884_v28 = vpop.f32.mrf.mxu1 }
 0x395   : > { %v1522_v1 = vpop.f32.mrf.mxu1 }
 0x397   : > { %v3887_v33 = vpop.f32.mrf.mxu1 }
 0x399   : > { %v1532_v57 = vpop.f32.mrf.mxu1 }
 0x39b   : > { %v3890_v18 = vpop.f32.mrf.mxu1 }
 0x39d   : > { %v1542_v56 = vpop.f32.mrf.mxu1 }
 0x39f   : > { %v3893_v55 = vpop.f32.mrf.mxu1 }
 0x3a1   : > { %v1552_v35 = vpop.f32.mrf.mxu1 }
 0x3a3   : > { %v3896_v22 = vpop.f32.mrf.mxu1 }
 0x3a5   : > { %v1562_v41 = vpop.f32.mrf.mxu1 }
 0x3a7   : > { %v3899_v20 = vpop.f32.mrf.mxu1 }
 0x3a9   : > { %v1572_v59 = vpop.f32.mrf.mxu1 }
 0x3ab   : > { %v3934_v17 = vpop.f32.mrf.mxu1 }
 0x3ad   : > { %v1647_v45 = vpop.f32.mrf.mxu1 }
 0x3af   : > { %v3937_v14 = vpop.f32.mrf.mxu1 }
 0x3b1   : > { %v1657_v21 = vpop.f32.mrf.mxu1 }
 0x3b3   : > { %v3940_v11 = vpop.f32.mrf.mxu1 }
 0x3b5   : > { %v1667_v9 = vpop.f32.mrf.mxu1 }
 0x3b7   : > { %v3943_v25 = vpop.f32.mrf.mxu1 }
 0x3b9   : > { %v1677_v36 = vpop.f32.mrf.mxu1 }
 0x3bb   : > { %v3946_v7 = vpop.f32.mrf.mxu1 }
 0x3bd   : > { %v1687_v47 = vpop.f32.mrf.mxu1 }
 0x3bf   : > { %v3949_v8 = vpop.f32.mrf.mxu1 }
 0x3c1   : > { %v1697_v6 = vpop.f32.mrf.mxu1 }
 0x3c3   : > { %v3952_v5 = vpop.f32.mrf.mxu1 }
 0x3c4   : > { %v5451_v2 = vadd.f32 %v3952_v5, %v3896_v22  ;;  %v5467_v5 = vadd.f32 %v3946_v7, %v3890_v18  ;;  %v5483_v7 = vadd.f32 %v3940_v11, %v3884_v28  ;;  %v5514_v11 = vld [vmem:[%s6472_s1 + $0x378] sm:$0xff]  ;;  %v5559_v22 = vld [vmem:[%s6472_s1 + $0x228] sm:$0xff] }
 0x3c5   : > { %v1707_v29 = vpop.f32.mrf.mxu1  ;;  %6624 = vst [vmem:[#allocation49_spill] sm:$0xff] %v5559_v22  ;;  %v5587_v18 = vld [vmem:[%s6472_s1 + $0x148] sm:$0xff] }
 0x3c6   : > { %v5455_v39 = vadd.f32 %v1707_v29, %v1562_v41  ;;  %v5471_v29 = vadd.f32 %v1687_v47, %v1542_v56  ;;  %v5487_v47 = vadd.f32 %v1667_v9, %v1522_v1  ;;  %v5502_v1 = vadd.f32 %v3934_v17, %v5437_v26  ;;  %v5545_v17 = vld [vmem:[%s6472_s1 + $0x298] sm:$0xff]  ;;  %v5580_v56 = vld [vmem:[%s6472_s1 + $0x180] sm:$0xff]  ;;  %6628 = vst [vmem:[#allocation53_spill] sm:$0xff] %v5587_v18  ;;  %v5622_v26 = vld [vmem:[%s6472_s1 + $0x90] sm:$0xff] }
 0x3c7   : > { %v3955_v40 = vpop.f32.mrf.mxu1  ;;  %v5507_v9 = vadd.f32 %v1647_v45, %v5439_v42  ;;  %v5538_v45 = vld [vmem:[%s6472_s1 + $0x2d0] sm:$0xff]  ;;  %6622 = vst [vmem:[#allocation47_spill] sm:$0xff] %v5545_v17  ;;  %6627 = vst [vmem:[#allocation52_spill] sm:$0xff] %v5580_v56  ;;  %v5608_v41 = vld [vmem:[%s6472_s1 + $0xd8] sm:$0xff] }
 0x3c8   : > { %v5445_v50 = vadd.f32 %v3955_v40, %v3899_v20  ;;  %v5459_v40 = vadd.f32 %v3949_v8, %v3893_v55  ;;  %v5475_v8 = vadd.f32 %v3943_v25, %v3887_v33  ;;  %v5492_v25 = vadd.f32 %v3937_v14, %v5441_v31  ;;  %v5531_v14 = vld [vmem:[%s6472_s1 + $0x308] sm:$0xff]  ;;  %6621 = vst [vmem:[#allocation46_spill] sm:$0xff] %v5538_v45  ;;  %v5552_v20 = vld [vmem:[%s6472_s1 + $0x260] sm:$0xff]  ;;  %v5573_v55 = vld [vmem:[%s6472_s1 + $0x1b8] sm:$0xff] }
 0x3c9   : > { %v1717_v4 = vpop.f32.mrf.mxu1  ;;  %6623 = vst [vmem:[#allocation48_spill] sm:$0xff] %v5552_v20  ;;  %6626 = vst [vmem:[#allocation51_spill] sm:$0xff] %v5573_v55  ;;  %v5603_v33 = vld [vmem:[%s6472_s1 + $0xc8] sm:$0xff]  ;;  %v5627_v42 = vld [vmem:[%s6472_s1 + $0xa0] sm:$0xff] }
 0x3ca   : > { %v5447_v48 = vadd.f32 %v1717_v4, %v1572_v59  ;;  %3957 = vmatpush3.msra.mxu0 %v5445_v50  ;;  %v5463_v4 = vadd.f32 %v1697_v6, %v1552_v35  ;;  %v5479_v6 = vadd.f32 %v1677_v36, %v1532_v57  ;;  %v5497_v36 = vadd.f32 %v1657_v21, %v5443_v0  ;;  %v5522_v21 = vld [vmem:[%s6472_s1 + $0x340] sm:$0xff]  ;;  %v5566_v35 = vld [vmem:[%s6472_s1 + $0x1f0] sm:$0xff]  ;;  %v5615_v59 = vld [vmem:[%s6472_s1 + $0x98] sm:$0xff] }
 0x3cb   : > { %3958 = vmatprep.subr.mxu0 %v6620_v3  ;;  %6625 = vst [vmem:[#allocation50_spill] sm:$0xff] %v5566_v35  ;;  %v5594_v57 = vld [vmem:[%s6472_s1 + $0x110] sm:$0xff]  ;;  %6630 = vst [vmem:[#allocation55_spill] sm:$0xff] %v5608_v41  ;;  %1966 = vmatpush1.msra.mxu1 %v5603_v33  ;;  %v5634_v31 = vld [vmem:[%s6472_s1 + $0x60] sm:$0xff] }
 0x3cc   : > { %3959 = vmatpush3.msra.mxu0 %v5447_v48  ;;  %6629 = vst [vmem:[#allocation54_spill] sm:$0xff] %v5594_v57  ;;  %1967 = vmatprep.subr.mxu1 %v5615_v59  ;;  %6631 = vst [vmem:[#allocation56_spill] sm:$0xff] %v5627_v42  ;;  %v5641_v0 = vld [vmem:[%s6472_s1 + $0x58] sm:$0xff]  ;;  %v5646_v28 = vld [vmem:[%s6472_s1 + $0x68] sm:$0xff] }
 0x3cd   : > { %3960 = vmatprep.subr.mxu0 %v6620_v3  ;;  %1968 = vmatpush1.msra.mxu1 %v5622_v26  ;;  %6632 = vst [vmem:[#allocation57_spill] sm:$0xff] %v5646_v28 }
 0x3ce   : > { %3961 = vmatpush3.msra.mxu0 %v5451_v2  ;;  %1969 = vmatprep.subr.mxu1 %v5634_v31 }
 0x3cf   : > { %3962 = vmatprep.subr.mxu0 %v6620_v3  ;;  %1970 = vmatpush1.msra.mxu1 %v5641_v0 }
 0x3d0   : > { %3963 = vmatpush3.msra.mxu0 %v5455_v39 }
 0x3d1   : > { %3964 = vmatprep.subr.mxu0 %v6620_v3 }
 0x3d2   : > { %3965 = vmatpush3.msra.mxu0 %v5459_v40 }
 0x3d3   : > { %3966 = vmatprep.subr.mxu0 %v6620_v3 }
 0x3d4   : > { %3967 = vmatpush3.msra.mxu0 %v5463_v4 }
 0x3d5   : > { %3968 = vmatprep.subr.mxu0 %v6620_v3 }
 0x3d6   : > { %3969 = vmatpush3.msra.mxu0 %v5467_v5 }
 0x3d7   : > { %3970 = vmatprep.subr.mxu0 %v6620_v3 }
 0x3d8   : > { %3971 = vmatpush3.msra.mxu0 %v5471_v29 }
 0x3d9   : > { %3972 = vmatprep.subr.mxu0 %v6620_v3 }
 0x3da   : > { %3973 = vmatpush3.msra.mxu0 %v5475_v8 }
 0x3db   : > { %3974 = vmatprep.subr.mxu0 %v6620_v3 }
 0x3dc   : > { %3975 = vmatpush3.msra.mxu0 %v5479_v6 }
 0x3dd   : > { %3976 = vmatprep.subr.mxu0 %v6620_v3 }
 0x3de   : > { %3977 = vmatpush3.msra.mxu0 %v5483_v7 }
 0x3df   : > { %3978 = vmatprep.subr.mxu0 %v6620_v3 }
 0x3e0   : > { %3979 = vmatpush3.msra.mxu0 %v5487_v47 }
 0x3e1   : > { %3980 = vmatprep.subr.mxu0 %v6620_v3 }
 0x3e2   : > { %3981 = vmatpush3.msra.mxu0 %v5492_v25 }
 0x3e3   : > { %3982 = vmatprep.subr.mxu0 %v6620_v3 }
 0x3e4   : > { %3983 = vmatpush3.msra.mxu0 %v5497_v36 }
 0x3e5   : > { %3984 = vmatprep.subr.mxu0 %v6620_v3 }
 0x3e6   : > { %3985 = vmatpush3.msra.mxu0 %v5502_v1 }
 0x3e7   : > { %3986 = vmatprep.subr.mxu0 %v6620_v3 }
 0x3e8   : > { %3987 = vmatpush3.msra.mxu0 %v5507_v9 }
 0x3e9   : > { %3989 = vmatmul.mubr.f32.vlgmr.msra.gmra.mxu0 %v4880_v23  ;;  %3991 = vmatprep.subr.mxu0 %v6620_v3 }
 0x3ea   : > { %3992 = vmatpush3.msra.mxu0 %v5514_v11  ;;  %4023 = vmatprep.mubr.msk.f32.mxu0 %vm4393_vm2, %v6620_v3 }
 0x3eb   : > { %3993 = vmatprep.subr.mxu0 %v6620_v3 }
 0x3ec   : > { %3994 = vmatpush3.msra.mxu0 %v5522_v21 }
 0x3ed   : > { %3995 = vmatprep.subr.mxu0 %v6620_v3 }
 0x3ee   : > { %3996 = vmatpush3.msra.mxu0 %v5531_v14 }
 0x3ef   : > { %3997 = vmatprep.subr.mxu0 %v6620_v3 }
 0x3f0   : > { %3998 = vmatpush3.msra.mxu0 %v5538_v45  ;;  %v5694_v45 = vld [vmem:[%s6472_s1 + $0x318] sm:$0xff] }
 0x3f1   : > { %3999 = vmatprep.subr.mxu0 %v6620_v3 }
 0x3f2   : > { %4000 = vmatpush3.msra.mxu0 %v5545_v17 }
 0x3f3   : > { %4001 = vmatprep.subr.mxu0 %v6620_v3 }
 0x3f4   : > { %4002 = vmatpush3.msra.mxu0 %v5552_v20 }
 0x3f5   : > { %4003 = vmatprep.subr.mxu0 %v6620_v3 }
 0x3f6   : > { %4004 = vmatpush3.msra.mxu0 %v5559_v22 }
 0x3f7   : > { %4005 = vmatprep.subr.mxu0 %v6620_v3 }
 0x3f8   : > { %4006 = vmatpush3.msra.mxu0 %v5566_v35 }
 0x3f9   : > { %4007 = vmatprep.subr.mxu0 %v6620_v3 }
 0x3fa   : > { %4008 = vmatpush3.msra.mxu0 %v5573_v55  ;;  %v5681_v55 = vld [vmem:[%s6471_s0 + $0x4f0] sm:$0x1] }
 0x3fb   : > { %4009 = vmatprep.subr.mxu0 %v6620_v3 }
 0x3fc   : > { %4010 = vmatpush3.msra.mxu0 %v5580_v56 }
 0x3fd   : > { %4011 = vmatprep.subr.mxu0 %v6620_v3 }
 0x3fe   : > { %4012 = vmatpush3.msra.mxu0 %v5587_v18  ;;  %v1792_v18 = vpop.f32.mrf.mxu0 }
 0x3ff   : > { %4013 = vmatprep.subr.mxu0 %v6620_v3 }
 0x400   : > { %4014 = vmatpush3.msra.mxu0 %v5594_v57  ;;  %v5665_v57 = vld [vmem:[%s6472_s1 + $0x30] sm:$0xff]  ;;  %v5676_v56 = vpop.f32.mrf.mxu0 }
 0x401   : > { %4015 = vmatprep.subr.mxu0 %v6620_v3  ;;  %6633 = vst [vmem:[#allocation58_spill] sm:$0xff] %v5665_v57 }
 0x402   : > { %4016 = vmatpush3.msra.mxu0 %v5608_v41  ;;  %v5660_v41 = vld [vmem:[%s6472_s1 + $0x20] sm:$0xff] }
 0x403   : > { %4017 = vmatprep.subr.mxu0 %v6620_v3 }
 0x404   : > { %4018 = vmatpush3.msra.mxu0 %v5627_v42  ;;  %v5653_v42 = vld [vmem:[%s6472_s1 + $0x28] sm:$0xff] }
 0x405   : > { %4019 = vmatprep.subr.mxu0 %v6620_v3  ;;  %1971 = vmatprep.subr.mxu1 %v5653_v42 }
 0x406   : > { %4020 = vmatpush3.msra.mxu0 %v5646_v28  ;;  %1972 = vmatpush1.msra.mxu1 %v5660_v41  ;;  %v5672_v28 = vld [vmem:[%s6472_s1 + $0x350] sm:$0xff] }
 0x407   : > { %4021 = vmatprep.subr.mxu0 %v6620_v3  ;;  %2107 = vmatprep.subr.mxu1 %v5672_v28 }
 0x408   : > { %4022 = vmatpush3.msra.mxu0 %v5665_v57 }
 0x409   : > { %2178 = vmatprep.subr.mxu0 %v5089_v27  ;;  %v5687_v27 = vld [vmem:[%s6472_s1 + $0x348] sm:$0xff] }
 0x4a9   : > { %v1934_v35 = vpop.f32.mrf.mxu0 }
 0x4aa   : > { %v1938_v22 = vadd.f32 %v1934_v35, %v1792_v18  ;;  %v5771_v35 = vld [vmem:[%s6472_s1 + $0x1f8] sm:$0xff]  ;;  %v5778_v18 = vld [vmem:[%s6472_s1 + $0x1c8] sm:$0xff] }
 0x4ab   : > { %v3990_v57 = vpop.f32.mrf.mxu0  ;;  %6634 = vst [vmem:[#allocation59_spill] sm:$0xff] %v5771_v35  ;;  %6635 = vst [vmem:[#allocation60_spill] sm:$0xff] %v5778_v18 }
 0x4ac   : > { %v1939_v20 = vadd.f32 %v1938_v22, %v5681_v55  ;;  %v5764_v22 = vld [vmem:[%s6472_s1 + $0x200] sm:$0xff] }
 0x4ad   : > { %v5785_v57 = vld [vmem:[%s6472_s1 + $0x1c0] sm:$0xff] }
 0x4ae   : > { %v1940_v17 = vmax.f32 %v1939_v20, 0.0  ;;  %v5757_v20 = vld [vmem:[%s6472_s1 + $0x230] sm:$0xff]  ;;  %6636 = vst [vmem:[#allocation61_spill] sm:$0xff] %v5785_v57 }
 0x4b0   : > { %2006 = vmatmul.mubr.f32.vlgmr.msra.gmra.mxu1 %v1940_v17  ;;  %4024 = vmatmul.mubr.f32.vlgmr.msra.gmra.mxu0 %v1940_v17  ;;  %v5701_v17 = vld [vmem:[%s6472_s1 + $0x310] sm:$0xff] }
 0x4b1   : > { %2108 = vmatpush1.msra.mxu1 %v5687_v27  ;;  %2179 = vmatpush1.msra.mxu0 %v5094_v12  ;;  %v5708_v12 = vld [vmem:[%s6472_s1 + $0x2e0] sm:$0xff] }
 0x4b2   : > { %2109 = vmatprep.subr.mxu1 %v5694_v45  ;;  %2180 = vmatprep.subr.mxu0 %v5100_v13  ;;  %v5715_v13 = vld [vmem:[%s6472_s1 + $0x2d8] sm:$0xff] }
 0x4b3   : > { %2110 = vmatpush1.msra.mxu1 %v5701_v17  ;;  %2181 = vmatpush1.msra.mxu0 %v5106_v38  ;;  %v5722_v38 = vld [vmem:[%s6472_s1 + $0x2a8] sm:$0xff] }
 0x4b4   : > { %2111 = vmatprep.subr.mxu1 %v5708_v12  ;;  %2182 = vmatprep.subr.mxu0 %v5112_v15  ;;  %v5729_v15 = vld [vmem:[%s6472_s1 + $0x2a0] sm:$0xff] }
 0x4b5   : > { %2112 = vmatpush1.msra.mxu1 %v5715_v13  ;;  %2183 = vmatpush1.msra.mxu0 %v5118_v16  ;;  %v5736_v16 = vld [vmem:[%s6472_s1 + $0x270] sm:$0xff] }
 0x4b6   : > { %2113 = vmatprep.subr.mxu1 %v5722_v38  ;;  %2184 = vmatprep.subr.mxu0 %v5125_v34  ;;  %v5743_v34 = vld [vmem:[%s6472_s1 + $0x268] sm:$0xff] }
 0x4b7   : > { %2114 = vmatpush1.msra.mxu1 %v5729_v15  ;;  %2185 = vmatpush1.msra.mxu0 %v5131_v19  ;;  %v5750_v19 = vld [vmem:[%s6472_s1 + $0x238] sm:$0xff] }
 0x4b8   : > { %2115 = vmatprep.subr.mxu1 %v5736_v16  ;;  %2186 = vmatprep.subr.mxu0 %v5137_v46 }
 0x4b9   : > { %2116 = vmatpush1.msra.mxu1 %v5743_v34  ;;  %2187 = vmatpush1.msra.mxu0 %v5143_v10 }
 0x4ba   : > { %2117 = vmatprep.subr.mxu1 %v5750_v19  ;;  %2188 = vmatprep.subr.mxu0 %v5150_v53 }
 0x4bb   : > { %2118 = vmatpush1.msra.mxu1 %v5757_v20  ;;  %2189 = vmatpush1.msra.mxu0 %v5156_v43 }
 0x4bc   : > { %2119 = vmatprep.subr.mxu1 %v5764_v22  ;;  %2190 = vmatprep.subr.mxu0 %v5162_v37 }
 0x4bd   : > { %2120 = vmatpush1.msra.mxu1 %v5771_v35  ;;  %2191 = vmatpush1.msra.mxu0 %v5168_v32  ;;  %v5792_v32 = vld [vmem:[%s6472_s1 + $0x190] sm:$0xff] }
 0x4be   : > { %2121 = vmatprep.subr.mxu1 %v5778_v18  ;;  %2192 = vmatprep.subr.mxu0 %v5175_v54  ;;  %6637 = vst [vmem:[#allocation62_spill] sm:$0xff] %v5792_v32  ;;  %v5799_v54 = vld [vmem:[%s6472_s1 + $0x188] sm:$0xff] }
 0x4bf   : > { %2122 = vmatpush1.msra.mxu1 %v5785_v57  ;;  %2193 = vmatpush1.msra.mxu0 %v5181_v44  ;;  %6638 = vst [vmem:[#allocation63_spill] sm:$0xff] %v5799_v54  ;;  %v5806_v44 = vld [vmem:[%s6472_s1 + $0x158] sm:$0xff] }
 0x4c0   : > { %2123 = vmatprep.subr.mxu1 %v5792_v32  ;;  %2194 = vmatprep.subr.mxu0 %v5187_v58  ;;  %6639 = vst [vmem:[#allocation64_spill] sm:$0xff] %v5806_v44  ;;  %v5813_v58 = vld [vmem:[%s6472_s1 + $0x150] sm:$0xff] }
 0x4c1   : > { %2124 = vmatpush1.msra.mxu1 %v5799_v54  ;;  %2195 = vmatpush1.msra.mxu0 %v5193_v60  ;;  %6640 = vst [vmem:[#allocation65_spill] sm:$0xff] %v5813_v58  ;;  %v5820_v60 = vld [vmem:[%s6472_s1 + $0x120] sm:$0xff] }
 0x4c2   : > { %2125 = vmatprep.subr.mxu1 %v5806_v44  ;;  %2196 = vmatprep.subr.mxu0 %v5200_v51  ;;  %6641 = vst [vmem:[#allocation66_spill] sm:$0xff] %v5820_v60  ;;  %v5827_v51 = vld [vmem:[%s6472_s1 + $0x118] sm:$0xff] }
 0x4c3   : > { %2126 = vmatpush1.msra.mxu1 %v5813_v58  ;;  %2197 = vmatpush1.msra.mxu0 %v5206_v61  ;;  %6642 = vst [vmem:[#allocation67_spill] sm:$0xff] %v5827_v51  ;;  %v5834_v61 = vld [vmem:[%s6472_s1 + $0xe8] sm:$0xff] }
 0x4c4   : > { %2127 = vmatprep.subr.mxu1 %v5820_v60  ;;  %2198 = vmatprep.subr.mxu0 %v5212_v30  ;;  %6643 = vst [vmem:[#allocation68_spill] sm:$0xff] %v5834_v61  ;;  %v5841_v30 = vld [vmem:[%s6472_s1 + $0xe0] sm:$0xff] }
 0x4c5   : > { %2128 = vmatpush1.msra.mxu1 %v5827_v51  ;;  %2199 = vmatpush1.msra.mxu0 %v5218_v62  ;;  %6644 = vst [vmem:[#allocation69_spill] sm:$0xff] %v5841_v30  ;;  %v5848_v62 = vld [vmem:[%s6472_s1 + $0xb0] sm:$0xff] }
 0x4c6   : > { %2129 = vmatprep.subr.mxu1 %v5834_v61  ;;  %2200 = vmatprep.subr.mxu0 %v5225_v52  ;;  %6645 = vst [vmem:[#allocation70_spill] sm:$0xff] %v5848_v62  ;;  %v5855_v52 = vld [vmem:[%s6472_s1 + $0xa8] sm:$0xff] }
 0x4c7   : > { %2130 = vmatpush1.msra.mxu1 %v5841_v30  ;;  %2201 = vmatpush1.msra.mxu0 %v5231_v24  ;;  %6646 = vst [vmem:[#allocation71_spill] sm:$0xff] %v5855_v52  ;;  %v5862_v24 = vld [vmem:[%s6472_s1 + $0x78] sm:$0xff]  ;;  %v6648_v30 = vld [vmem:[#allocation15_spill] sm:$0xff] }
 0x4c8   : > { %2131 = vmatprep.subr.mxu1 %v5848_v62  ;;  %2202 = vmatprep.subr.mxu0 %v5237_v63  ;;  %6647 = vst [vmem:[#allocation72_spill] sm:$0xff] %v5862_v24  ;;  %v5869_v63 = vld [vmem:[%s6472_s1 + $0x70] sm:$0xff] }
 0x4c9   : > { %2132 = vmatpush1.msra.mxu1 %v5855_v52  ;;  %2203 = vmatpush1.msra.mxu0 %v5243_v49  ;;  %6649 = vst [vmem:[#allocation73_spill] sm:$0xff] %v5869_v63  ;;  %v6650_v62 = vld [vmem:[#allocation16_spill] sm:$0xff]  ;;  %v5876_v49 = vld [vmem:[%s6472_s1 + $0x40] sm:$0xff]  ;;  %v6652_v52 = vld [vmem:[#allocation17_spill] sm:$0xff] }
 0x4ca   : > { %2133 = vmatprep.subr.mxu1 %v5862_v24  ;;  %2204 = vmatprep.subr.mxu0 %v6648_v30  ;;  %6651 = vst [vmem:[#allocation74_spill] sm:$0xff] %v5876_v49  ;;  %v5883_v30 = vld [vmem:[%s6472_s1 + $0x38] sm:$0xff]  ;;  %v6654_v24 = vld [vmem:[#allocation18_spill] sm:$0xff] }
 0x4cb   : > { %2134 = vmatpush1.msra.mxu1 %v5869_v63  ;;  %2205 = vmatpush1.msra.mxu0 %v6650_v62  ;;  %6653 = vst [vmem:[#allocation75_spill] sm:$0xff] %v5883_v30  ;;  %v5890_v62 = vld [vmem:[%s6472_s1 + $0x8] sm:$0xff] }
 0x4cc   : > { %2135 = vmatprep.subr.mxu1 %v5876_v49  ;;  %2206 = vmatprep.subr.mxu0 %v6652_v52  ;;  %6655 = vst [vmem:[#allocation76_spill] sm:$0xff] %v5890_v62  ;;  %v6656_v63 = vld [vmem:[#allocation19_spill] sm:$0xff]  ;;  %v5897_v52 = vld [vmem:[%s6472_s1] sm:$0xff] }
 0x4cd   : > { %2136 = vmatpush1.msra.mxu1 %v5883_v30  ;;  %2207 = vmatpush1.msra.mxu0 %v6654_v24  ;;  %6657 = vst [vmem:[#allocation77_spill] sm:$0xff] %v5897_v52  ;;  %v6658_v30 = vld [vmem:[#allocation20_spill] sm:$0xff]  ;;  %v6659_v24 = vld [vmem:[#allocation21_spill] sm:$0xff] }
 0x4ce   : > { %2137 = vmatprep.subr.mxu1 %v5890_v62  ;;  %2208 = vmatprep.subr.mxu0 %v6656_v63  ;;  %v1863_v62 = vpop.f32.mrf.mxu1  ;;  %v5908_v63 = vld [vmem:[%s6471_s0 + $0x4f8] sm:$0x1] }
 0x4cf   : > { %2138 = vmatpush1.msra.mxu1 %v5897_v52  ;;  %2171 = vmatprep.mubr.f32.mxu1 %v6620_v3 }
 0x4d0   : > { %2209 = vmatpush1.msra.mxu0 %v6658_v30  ;;  %2242 = vmatprep.mubr.f32.mxu0 %v6620_v3  ;;  %v1865_v49 = vpop.f32.mrf.mxu1 }
 0x4d1   : > { %4026 = vmatprep.subr.mxu1 %v6620_v3  ;;  %2322 = vmatprep.subr.mxu0 %v6659_v24  ;;  %v5915_v24 = vld [vmem:[%s6471_s0 + $0x500] sm:$0x1] }
 0x4d2   : > { %6660 = vst [vmem:[#allocation78_spill] sm:$0xff] %v5915_v24 }
 0x570   : > { %v2007_v61 = vpop.f32.mrf.mxu1  ;;  %v2078_v51 = vpop.f32.mrf.mxu0 }
 0x571   : > { %v2082_v52 = vadd.f32 %v2007_v61, %v5676_v56 }
 0x572   : > { %v2009_v60 = vpop.f32.mrf.mxu1  ;;  %v4025_v58 = vpop.f32.mrf.mxu0 }
 0x573   : > { %v2083_v30 = vadd.f32 %v2082_v52, %v5908_v63  ;;  %v2090_v54 = vadd.f32 %v2009_v60, %v1863_v62  ;;  %v5921_v58 = vld [vmem:[%s6471_s0 + $0x510] sm:$0x1] }
 0x575   : > { %v3198_v44 = vmul.f32 -1.442695, %v2083_v30  ;;  %v2091_v32 = vadd.f32 %v2090_v54, %v5915_v24  ;;  %v5926_v30 = vld [vmem:[%s6471_s0 + $0x508] sm:$0x1] }
 0x577   : > { %4290 = vpow2.f32 %v3198_v44  ;;  %v3199_v57 = vmul.f32 -1.442695, %v2091_v32  ;;  %v2099_v44 = vadd.f32 %v1865_v49, %v5921_v58  ;;  %v2098_v32 = vadd.f32 %v2078_v51, %v5926_v30  ;;  %v6661_v51 = vld [vmem:[#allocation22_spill] sm:$0xff]  ;;  %v6662_v49 = vld [vmem:[#allocation23_spill] sm:$0xff] }
 0x579   : > { %4292 = vpow2.f32 %v3199_v57 }
 0x584   : > { %v4291_v18 = vpop.eup %4290 }
 0x585   : > { %v2087_v35 = vadd.f32 1.0, %v4291_v18 }
 0x586   : > { %v4293_v61 = vpop.eup %4292 }
 0x587   : > { %4294 = vrcp.f32 %v2087_v35  ;;  %v2095_v60 = vadd.f32 1.0, %v4293_v61 }
 0x589   : > { %4296 = vrcp.f32 %v2095_v60  ;;  %v6664_v60 = vld [vmem:[#allocation25_spill] sm:$0xff] }
 0x594   : > { %v4295_v54 = vpop.eup %4294 }
 0x595   : > { %v2100_v62 = vmul.f32 %v4295_v54, %v2099_v44  ;;  %v6665_v44 = vld [vmem:[#allocation26_spill] sm:$0xff]  ;;  %v6666_v54 = vld [vmem:[#allocation27_spill] sm:$0xff] }
 0x596   : > { %v4297_v56 = vpop.eup %4296 }
 0x597   : > { %v2101_v52 = vadd.f32 %v2100_v62, %v2098_v32  ;;  %v2103_v35 = vsub.f32 1.0, %v4297_v56  ;;  %v2105_v61 = vmul.f32 %v4297_v56, %v4880_v23  ;;  %v6663_v23 = vld [vmem:[#allocation24_spill] sm:$0xff]  ;;  %v6668_v62 = vld [vmem:[#allocation29_spill] sm:$0xff]  ;;  %v6670_v56 = vld [vmem:[#allocation31_spill] sm:$0xff] }
 0x598   : > { %v6667_v32 = vld [vmem:[#allocation28_spill] sm:$0xff] }
 0x599   : > { %4298 = vtanh.f32 %v2101_v52  ;;  %v6669_v52 = vld [vmem:[#allocation30_spill] sm:$0xff] }
 0x5a6   : > { %v4299_v18 = vpop.eup %4298 }
 0x5a7   : > { %v2104_v57 = vmul.f32 %v4299_v18, %v2103_v35  ;;  %v6671_v35 = vld [vmem:[#allocation32_spill] sm:$0xff]  ;;  %v6672_v18 = vld [vmem:[#allocation33_spill] sm:$0xff] }
 0x5a9   : > { %v5931_v24 = vadd.f32 %v2105_v61, %v2104_v57  ;;  %v6673_v57 = vld [vmem:[#allocation34_spill] sm:$0xff]  ;;  %v6674_v61 = vld [vmem:[#allocation35_spill] sm:$0xff] }
 0x5ab   : > { %2172 = vmatmul.mubr.f32.vlgmr.msra.gmra.mxu1 %v5931_v24  ;;  %2243 = vmatmul.mubr.f32.vlgmr.msra.gmra.mxu0 %v5931_v24 }
 0x5ac   : > { %4027 = vmatpush3.msra.mxu1 %v5445_v50  ;;  %4058 = vmatprep.mubr.msk.f32.mxu1 %vm4393_vm2, %v6620_v3 }
 0x5ad   : > { %4028 = vmatprep.subr.mxu1 %v6620_v3  ;;  %2323 = vmatpush1.msra.mxu0 %v6661_v51  ;;  %v6675_v51 = vld [vmem:[#allocation36_spill] sm:$0xff] }
 0x5ae   : > { %4029 = vmatpush3.msra.mxu1 %v5447_v48  ;;  %2324 = vmatprep.subr.mxu0 %v6662_v49  ;;  %v6676_v49 = vld [vmem:[#allocation37_spill] sm:$0xff] }
 0x5af   : > { %4030 = vmatprep.subr.mxu1 %v6620_v3  ;;  %2325 = vmatpush1.msra.mxu0 %v6663_v23  ;;  %v6677_v23 = vld [vmem:[#allocation38_spill] sm:$0xff] }
 0x5b0   : > { %4031 = vmatpush3.msra.mxu1 %v5451_v2  ;;  %2326 = vmatprep.subr.mxu0 %v6664_v60  ;;  %v6678_v60 = vld [vmem:[#allocation39_spill] sm:$0xff] }
 0x5b1   : > { %4032 = vmatprep.subr.mxu1 %v6620_v3  ;;  %2327 = vmatpush1.msra.mxu0 %v6665_v44  ;;  %v6679_v44 = vld [vmem:[#allocation40_spill] sm:$0xff] }
 0x5b2   : > { %4033 = vmatpush3.msra.mxu1 %v5455_v39  ;;  %2328 = vmatprep.subr.mxu0 %v6666_v54  ;;  %v6680_v54 = vld [vmem:[#allocation41_spill] sm:$0xff] }
 0x5b3   : > { %4034 = vmatprep.subr.mxu1 %v6620_v3  ;;  %2329 = vmatpush1.msra.mxu0 %v6667_v32  ;;  %v6681_v32 = vld [vmem:[#allocation42_spill] sm:$0xff] }
 0x5b4   : > { %4035 = vmatpush3.msra.mxu1 %v5459_v40  ;;  %2330 = vmatprep.subr.mxu0 %v6668_v62  ;;  %v6682_v62 = vld [vmem:[#allocation43_spill] sm:$0xff] }
 0x5b5   : > { %4036 = vmatprep.subr.mxu1 %v6620_v3  ;;  %2331 = vmatpush1.msra.mxu0 %v6669_v52  ;;  %v6683_v52 = vld [vmem:[#allocation44_spill] sm:$0xff] }
 0x5b6   : > { %4037 = vmatpush3.msra.mxu1 %v5463_v4  ;;  %2332 = vmatprep.subr.mxu0 %v6670_v56  ;;  %v6684_v56 = vld [vmem:[#allocation45_spill] sm:$0xff] }
 0x5b7   : > { %4038 = vmatprep.subr.mxu1 %v6620_v3  ;;  %2333 = vmatpush1.msra.mxu0 %v6671_v35  ;;  %v6685_v35 = vld [vmem:[#allocation46_spill] sm:$0xff] }
 0x5b8   : > { %4039 = vmatpush3.msra.mxu1 %v5467_v5  ;;  %2334 = vmatprep.subr.mxu0 %v6672_v18  ;;  %v6686_v18 = vld [vmem:[#allocation47_spill] sm:$0xff] }
 0x5b9   : > { %4040 = vmatprep.subr.mxu1 %v6620_v3  ;;  %2335 = vmatpush1.msra.mxu0 %v6673_v57  ;;  %v6687_v57 = vld [vmem:[#allocation48_spill] sm:$0xff] }
 0x5ba   : > { %4041 = vmatpush3.msra.mxu1 %v5471_v29  ;;  %2336 = vmatprep.subr.mxu0 %v6674_v61  ;;  %v6688_v61 = vld [vmem:[#allocation49_spill] sm:$0xff] }
 0x5bb   : > { %4042 = vmatprep.subr.mxu1 %v6620_v3  ;;  %2337 = vmatpush1.msra.mxu0 %v6675_v51  ;;  %v6690_v51 = vld [vmem:[#allocation51_spill] sm:$0xff] }
 0x5bc   : > { %4043 = vmatpush3.msra.mxu1 %v5475_v8  ;;  %2338 = vmatprep.subr.mxu0 %v6676_v49  ;;  %v6691_v49 = vld [vmem:[#allocation52_spill] sm:$0xff] }
 0x5bd   : > { %4044 = vmatprep.subr.mxu1 %v6620_v3  ;;  %2339 = vmatpush1.msra.mxu0 %v6677_v23  ;;  %v6692_v23 = vld [vmem:[#allocation53_spill] sm:$0xff] }
 0x5be   : > { %4045 = vmatpush3.msra.mxu1 %v5479_v6  ;;  %2340 = vmatprep.subr.mxu0 %v6678_v60  ;;  %v6693_v60 = vld [vmem:[#allocation54_spill] sm:$0xff] }
 0x5bf   : > { %4046 = vmatprep.subr.mxu1 %v6620_v3  ;;  %2341 = vmatpush1.msra.mxu0 %v6679_v44  ;;  %v6694_v44 = vld [vmem:[#allocation55_spill] sm:$0xff] }
 0x5c0   : > { %4047 = vmatpush3.msra.mxu1 %v5483_v7  ;;  %2342 = vmatprep.subr.mxu0 %v6680_v54  ;;  %v6695_v54 = vld [vmem:[#allocation56_spill] sm:$0xff] }
 0x5c1   : > { %4048 = vmatprep.subr.mxu1 %v6620_v3  ;;  %2343 = vmatpush1.msra.mxu0 %v6681_v32  ;;  %v6696_v32 = vld [vmem:[#allocation57_spill] sm:$0xff] }
 0x5c2   : > { %4049 = vmatpush3.msra.mxu1 %v5487_v47  ;;  %2344 = vmatprep.subr.mxu0 %v6682_v62  ;;  %v6697_v62 = vld [vmem:[#allocation58_spill] sm:$0xff] }
 0x5c3   : > { %4050 = vmatprep.subr.mxu1 %v6620_v3  ;;  %2345 = vmatpush1.msra.mxu0 %v6683_v52  ;;  %v4352_v52 = vld [vmem:[%s6472_s1 + $0x360] sm:$0xff] }
 0x5c4   : > { %4051 = vmatpush3.msra.mxu1 %v5492_v25  ;;  %2346 = vmatprep.subr.mxu0 %v6684_v56 }
 0x5c5   : > { %4052 = vmatprep.subr.mxu1 %v6620_v3  ;;  %2347 = vmatpush1.msra.mxu0 %v5603_v33 }
 0x5c6   : > { %4053 = vmatpush3.msra.mxu1 %v5497_v36  ;;  %2348 = vmatprep.subr.mxu0 %v5615_v59 }
 0x5c7   : > { %4054 = vmatprep.subr.mxu1 %v6620_v3  ;;  %2349 = vmatpush1.msra.mxu0 %v5622_v26 }
 0x5c8   : > { %4055 = vmatpush3.msra.mxu1 %v5502_v1  ;;  %2350 = vmatprep.subr.mxu0 %v5634_v31 }
 0x5c9   : > { %4056 = vmatprep.subr.mxu1 %v6620_v3  ;;  %2351 = vmatpush1.msra.mxu0 %v5641_v0 }
 0x5ca   : > { %4057 = vmatpush3.msra.mxu1 %v5507_v9  ;;  %2352 = vmatprep.subr.mxu0 %v5653_v42 }
 0x5cb   : > { %4059 = vmatmul.mubr.f32.vlgmr.msra.gmra.mxu1 %v5931_v24  ;;  %4061 = vmatprep.subr.mxu1 %v6620_v3 }
 0x5cc   : > { %4062 = vmatpush3.msra.mxu1 %v5514_v11  ;;  %2353 = vmatpush1.msra.mxu0 %v5660_v41 }
 0x5cd   : > { %4063 = vmatprep.subr.mxu1 %v6620_v3  ;;  %2386 = vmatprep.mubr.f32.mxu0 %v6620_v3 }
 0x5ce   : > { %4064 = vmatpush3.msra.mxu1 %v5522_v21  ;;  %4093 = vmatprep.mubr.msk.f32.mxu1 %vm4393_vm2, %v6620_v3 }
 0x5cf   : > { %4065 = vmatprep.subr.mxu1 %v6620_v3  ;;  %2488 = vmatprep.subr.mxu0 %v5672_v28  ;;  %v6689_v28 = vld [vmem:[#allocation50_spill] sm:$0xff] }
 0x5d0   : > { %4066 = vmatpush3.msra.mxu1 %v5531_v14 }
 0x5d1   : > { %4067 = vmatprep.subr.mxu1 %v6620_v3 }
 0x5d2   : > { %4068 = vmatpush3.msra.mxu1 %v6685_v35 }
 0x5d3   : > { %4069 = vmatprep.subr.mxu1 %v6620_v3 }
 0x5d4   : > { %4070 = vmatpush3.msra.mxu1 %v6686_v18 }
 0x5d5   : > { %4071 = vmatprep.subr.mxu1 %v6620_v3 }
 0x5d6   : > { %4072 = vmatpush3.msra.mxu1 %v6687_v57 }
 0x5d7   : > { %4073 = vmatprep.subr.mxu1 %v6620_v3 }
 0x5d8   : > { %4074 = vmatpush3.msra.mxu1 %v6688_v61 }
 0x5d9   : > { %4075 = vmatprep.subr.mxu1 %v6620_v3 }
 0x5da   : > { %4076 = vmatpush3.msra.mxu1 %v6689_v28 }
 0x5db   : > { %4077 = vmatprep.subr.mxu1 %v6620_v3 }
 0x5dc   : > { %4078 = vmatpush3.msra.mxu1 %v6690_v51 }
 0x5dd   : > { %4079 = vmatprep.subr.mxu1 %v6620_v3 }
 0x5de   : > { %4080 = vmatpush3.msra.mxu1 %v6691_v49 }
 0x5df   : > { %4081 = vmatprep.subr.mxu1 %v6620_v3 }
 0x5e0   : > { %4082 = vmatpush3.msra.mxu1 %v6692_v23 }
 0x5e1   : > { %4083 = vmatprep.subr.mxu1 %v6620_v3 }
 0x5e2   : > { %4084 = vmatpush3.msra.mxu1 %v6693_v60 }
 0x5e3   : > { %4085 = vmatprep.subr.mxu1 %v6620_v3 }
 0x5e4   : > { %4086 = vmatpush3.msra.mxu1 %v6694_v44 }
 0x5e5   : > { %4087 = vmatprep.subr.mxu1 %v6620_v3 }
 0x5e6   : > { %4088 = vmatpush3.msra.mxu1 %v6695_v54 }
 0x5e7   : > { %4089 = vmatprep.subr.mxu1 %v6620_v3 }
 0x5e8   : > { %4090 = vmatpush3.msra.mxu1 %v6696_v32 }
 0x5e9   : > { %4091 = vmatprep.subr.mxu1 %v6620_v3 }
 0x5ea   : > { %4092 = vmatpush3.msra.mxu1 %v6697_v62  ;;  %v4353_v62 = vld [vmem:[%s6472_s1 + $0x358] sm:$0xff] }
 0x5eb   : > { %2559 = vmatprep.subr.mxu1 %v4352_v52  ;;  %v4354_v52 = vld [vmem:[%s6472_s1 + $0x328] sm:$0xff] }
 0x66b   : > { %v2173_v56 = vpop.f32.mrf.mxu1 }
 0x66d   : > { %v6039_v60 = vpop.f32.mrf.mxu1 }
 0x68b   : > { %v2315_v44 = vpop.f32.mrf.mxu1 }
 0x68c   : > { %v2319_v23 = vadd.f32 %v2315_v44, %v2173_v56  ;;  %v6713_v44 = vld [vmem:[#allocation9_spill] sm:$0xff]  ;;  %v6716_v56 = vld [vmem:[#allocation68_spill] sm:$0xff] }
 0x68d   : > { %v4060_v49 = vpop.f32.mrf.mxu1 }
 0x68e   : > { %v2320_v54 = vadd.f32 %v2319_v23, %v5681_v55  ;;  %v6711_v49 = vld [vmem:[#allocation8_spill] sm:$0xff]  ;;  %v6712_v23 = vld [vmem:[#allocation66_spill] sm:$0xff] }
 0x690   : > { %v2321_v51 = vmax.f32 %v2320_v54, 0.0  ;;  %v6714_v54 = vld [vmem:[#allocation67_spill] sm:$0xff] }
 0x692   : > { %2387 = vmatmul.mubr.f32.vlgmr.msra.gmra.mxu0 %v2321_v51  ;;  %4094 = vmatmul.mubr.f32.vlgmr.msra.gmra.mxu1 %v2321_v51  ;;  %v4355_v51 = vld [vmem:[%s6472_s1 + $0x320] sm:$0xff] }
 0x693   : > { %2489 = vmatpush1.msra.mxu0 %v5687_v27  ;;  %2560 = vmatpush1.msra.mxu1 %v4353_v62  ;;  %v4356_v27 = vld [vmem:[%s6472_s1 + $0x2f0] sm:$0xff]  ;;  %v6715_v62 = vld [vmem:[#allocation10_spill] sm:$0xff] }
 0x694   : > { %2490 = vmatprep.subr.mxu0 %v5694_v45  ;;  %2561 = vmatprep.subr.mxu1 %v4354_v52  ;;  %v4357_v45 = vld [vmem:[%s6472_s1 + $0x2e8] sm:$0xff] }
 0x695   : > { %2491 = vmatpush1.msra.mxu0 %v5701_v17  ;;  %2562 = vmatpush1.msra.mxu1 %v4355_v51  ;;  %v4358_v17 = vld [vmem:[%s6472_s1 + $0x2b8] sm:$0xff]  ;;  %v6717_v52 = vld [vmem:[#allocation11_spill] sm:$0xff] }
 0x696   : > { %2492 = vmatprep.subr.mxu0 %v5708_v12  ;;  %2563 = vmatprep.subr.mxu1 %v4356_v27  ;;  %v4359_v12 = vld [vmem:[%s6472_s1 + $0x2b0] sm:$0xff]  ;;  %v6718_v51 = vld [vmem:[#allocation69_spill] sm:$0xff] }
 0x697   : > { %2493 = vmatpush1.msra.mxu0 %v5715_v13  ;;  %2564 = vmatpush1.msra.mxu1 %v4357_v45  ;;  %v6698_v13 = vld [vmem:[#allocation59_spill] sm:$0xff]  ;;  %v6719_v27 = vld [vmem:[#allocation12_spill] sm:$0xff]  ;;  %v6720_v45 = vld [vmem:[#allocation70_spill] sm:$0xff] }
 0x698   : > { %2494 = vmatprep.subr.mxu0 %v5722_v38  ;;  %2565 = vmatprep.subr.mxu1 %v4358_v17  ;;  %v6699_v38 = vld [vmem:[#allocation2_spill] sm:$0xff]  ;;  %v6721_v17 = vld [vmem:[#allocation13_spill] sm:$0xff] }
 0x699   : > { %2495 = vmatpush1.msra.mxu0 %v5729_v15  ;;  %2566 = vmatpush1.msra.mxu1 %v4359_v12  ;;  %v6701_v15 = vld [vmem:[#allocation3_spill] sm:$0xff] }
 0x69a   : > { %2496 = vmatprep.subr.mxu0 %v5736_v16  ;;  %2567 = vmatprep.subr.mxu1 %v5137_v46  ;;  %v6700_v46 = vld [vmem:[#allocation60_spill] sm:$0xff]  ;;  %v6722_v12 = vld [vmem:[#allocation71_spill] sm:$0xff] }
 0x69b   : > { %2497 = vmatpush1.msra.mxu0 %v5743_v34  ;;  %2568 = vmatpush1.msra.mxu1 %v5143_v10  ;;  %v6702_v10 = vld [vmem:[#allocation61_spill] sm:$0xff]  ;;  %v6703_v16 = vld [vmem:[#allocation4_spill] sm:$0xff] }
 0x69c   : > { %2498 = vmatprep.subr.mxu0 %v5750_v19  ;;  %2569 = vmatprep.subr.mxu1 %v5150_v53  ;;  %v6704_v53 = vld [vmem:[#allocation62_spill] sm:$0xff]  ;;  %v6705_v34 = vld [vmem:[#allocation5_spill] sm:$0xff] }
 0x69d   : > { %2499 = vmatpush1.msra.mxu0 %v5757_v20  ;;  %2570 = vmatpush1.msra.mxu1 %v5156_v43  ;;  %v6706_v43 = vld [vmem:[#allocation63_spill] sm:$0xff]  ;;  %v6707_v19 = vld [vmem:[#allocation6_spill] sm:$0xff] }
 0x69e   : > { %2500 = vmatprep.subr.mxu0 %v5764_v22  ;;  %2571 = vmatprep.subr.mxu1 %v5162_v37  ;;  %v6708_v37 = vld [vmem:[#allocation64_spill] sm:$0xff]  ;;  %v6709_v20 = vld [vmem:[#allocation7_spill] sm:$0xff]  ;;  %v6710_v22 = vld [vmem:[#allocation65_spill] sm:$0xff] }
 0x69f   : > { %2501 = vmatpush1.msra.mxu0 %v6698_v13  ;;  %2572 = vmatpush1.msra.mxu1 %v6699_v38  ;;  %v6723_v13 = vld [vmem:[#allocation14_spill] sm:$0xff]  ;;  %v6724_v38 = vld [vmem:[#allocation72_spill] sm:$0xff] }
 0x6a0   : > { %2502 = vmatprep.subr.mxu0 %v6700_v46  ;;  %2573 = vmatprep.subr.mxu1 %v6701_v15  ;;  %v6725_v46 = vld [vmem:[#allocation15_spill] sm:$0xff]  ;;  %v6726_v15 = vld [vmem:[#allocation73_spill] sm:$0xff] }
 0x6a1   : > { %2503 = vmatpush1.msra.mxu0 %v6702_v10  ;;  %2574 = vmatpush1.msra.mxu1 %v6703_v16  ;;  %v6727_v10 = vld [vmem:[#allocation16_spill] sm:$0xff]  ;;  %v6728_v16 = vld [vmem:[#allocation74_spill] sm:$0xff] }
 0x6a2   : > { %2504 = vmatprep.subr.mxu0 %v6704_v53  ;;  %2575 = vmatprep.subr.mxu1 %v6705_v34  ;;  %v6729_v53 = vld [vmem:[#allocation17_spill] sm:$0xff]  ;;  %v6730_v34 = vld [vmem:[#allocation75_spill] sm:$0xff] }
 0x6a3   : > { %2505 = vmatpush1.msra.mxu0 %v6706_v43  ;;  %2576 = vmatpush1.msra.mxu1 %v6707_v19  ;;  %v6731_v43 = vld [vmem:[#allocation18_spill] sm:$0xff]  ;;  %v6732_v19 = vld [vmem:[#allocation76_spill] sm:$0xff] }
 0x6a4   : > { %2506 = vmatprep.subr.mxu0 %v6708_v37  ;;  %2577 = vmatprep.subr.mxu1 %v6709_v20  ;;  %v6733_v37 = vld [vmem:[#allocation19_spill] sm:$0xff]  ;;  %v6734_v20 = vld [vmem:[#allocation77_spill] sm:$0xff] }
 0x6a5   : > { %2507 = vmatpush1.msra.mxu0 %v6710_v22  ;;  %2578 = vmatpush1.msra.mxu1 %v6711_v49  ;;  %v6735_v22 = vld [vmem:[#allocation20_spill] sm:$0xff]  ;;  %v6736_v49 = vld [vmem:[#allocation21_spill] sm:$0xff] }
 0x6a6   : > { %2508 = vmatprep.subr.mxu0 %v6712_v23  ;;  %2579 = vmatprep.subr.mxu1 %v6713_v44  ;;  %v2244_v23 = vpop.f32.mrf.mxu0 }
 0x6a7   : > { %2509 = vmatpush1.msra.mxu0 %v6714_v54  ;;  %2580 = vmatpush1.msra.mxu1 %v6715_v62 }
 0x6a8   : > { %2510 = vmatprep.subr.mxu0 %v6716_v56  ;;  %2581 = vmatprep.subr.mxu1 %v6717_v52  ;;  %v2246_v44 = vpop.f32.mrf.mxu0 }
 0x6a9   : > { %2511 = vmatpush1.msra.mxu0 %v6718_v51  ;;  %2582 = vmatpush1.msra.mxu1 %v6719_v27 }
 0x6aa   : > { %2512 = vmatprep.subr.mxu0 %v6720_v45  ;;  %2583 = vmatprep.subr.mxu1 %v6721_v17 }
 0x6ab   : > { %2513 = vmatpush1.msra.mxu0 %v6722_v12  ;;  %2584 = vmatpush1.msra.mxu1 %v6723_v13  ;;  %v6737_v12 = vld [vmem:[#allocation78_spill] sm:$0xff] }
 0x6ac   : > { %2514 = vmatprep.subr.mxu0 %v6724_v38  ;;  %2585 = vmatprep.subr.mxu1 %v6725_v46 }
 0x6ad   : > { %2515 = vmatpush1.msra.mxu0 %v6726_v15  ;;  %2586 = vmatpush1.msra.mxu1 %v6727_v10 }
 0x6ae   : > { %2516 = vmatprep.subr.mxu0 %v6728_v16  ;;  %2587 = vmatprep.subr.mxu1 %v6729_v53  ;;  %v2480_v53 = vadd.f32 %v2246_v44, %v5921_v58  ;;  %v4360_v44 = vld [vmem:[%s6472_s1 + $0x368] sm:$0xff] }
 0x6af   : > { %2517 = vmatpush1.msra.mxu0 %v6730_v34  ;;  %2588 = vmatpush1.msra.mxu1 %v6731_v43 }
 0x6b0   : > { %2518 = vmatprep.subr.mxu0 %v6732_v19  ;;  %2589 = vmatprep.subr.mxu1 %v6733_v37 }
 0x6b1   : > { %2519 = vmatpush1.msra.mxu0 %v6734_v20  ;;  %2552 = vmatprep.mubr.f32.mxu0 %v6620_v3 }
 0x6b2   : > { %2590 = vmatpush1.msra.mxu1 %v6735_v22  ;;  %2623 = vmatprep.mubr.f32.mxu1 %v6620_v3 }
 0x6b3   : > { %4096 = vmatprep.subr.mxu0 %v6620_v3  ;;  %2703 = vmatprep.subr.mxu1 %v6736_v49 }
 0x752   : > { %v2388_v54 = vpop.f32.mrf.mxu0  ;;  %v2459_v62 = vpop.f32.mrf.mxu1 }
 0x753   : > { %v2463_v56 = vadd.f32 %v2388_v54, %v6039_v60  ;;  %v2479_v60 = vadd.f32 %v2459_v62, %v5926_v30  ;;  %v4363_v62 = vld [vmem:[%s6472_s1 + $0x300] sm:$0xff] }
 0x754   : > { %v2390_v52 = vpop.f32.mrf.mxu0  ;;  %v4095_v51 = vpop.f32.mrf.mxu1 }
 0x755   : > { %v2464_v27 = vadd.f32 %v2463_v56, %v5908_v63  ;;  %v2471_v17 = vadd.f32 %v2390_v52, %v2244_v23  ;;  %v4365_v56 = vld [vmem:[%s6472_s1 + $0x2c8] sm:$0xff]  ;;  %v4367_v52 = vld [vmem:[%s6472_s1 + $0x290] sm:$0xff]  ;;  %v4369_v51 = vld [vmem:[%s6472_s1 + $0x258] sm:$0xff] }
 0x757   : > { %v3200_v45 = vmul.f32 -1.442695, %v2464_v27  ;;  %v2472_v13 = vadd.f32 %v2471_v17, %v6737_v12  ;;  %v4371_v27 = vld [vmem:[%s6472_s1 + $0x220] sm:$0xff]  ;;  %v4375_v17 = vld [vmem:[%s6472_s1 + $0x1b0] sm:$0xff] }
 0x759   : > { %4300 = vpow2.f32 %v3200_v45  ;;  %v3201_v38 = vmul.f32 -1.442695, %v2472_v13  ;;  %v4373_v45 = vld [vmem:[%s6472_s1 + $0x1e8] sm:$0xff]  ;;  %v4377_v13 = vld [vmem:[%s6472_s1 + $0x178] sm:$0xff] }
 0x75b   : > { %4302 = vpow2.f32 %v3201_v38  ;;  %v4379_v38 = vld [vmem:[%s6472_s1 + $0x140] sm:$0xff] }
 0x766   : > { %v4301_v46 = vpop.eup %4300 }
 0x767   : > { %v2468_v15 = vadd.f32 1.0, %v4301_v46  ;;  %v4381_v46 = vld [vmem:[%s6472_s1 + $0x108] sm:$0xff] }
 0x768   : > { %v4303_v10 = vpop.eup %4302 }
 0x769   : > { %4304 = vrcp.f32 %v2468_v15  ;;  %v2476_v16 = vadd.f32 1.0, %v4303_v10  ;;  %v4383_v15 = vld [vmem:[%s6472_s1 + $0xd0] sm:$0xff] }
 0x76a   : > { %v346_v10 = vld [vmem:[%s6471_s0 + $0x410] sm:$0xff] }
 0x76b   : > { %4306 = vrcp.f32 %v2476_v16  ;;  %v345_v16 = vld [vmem:[%s6471_s0 + $0x408] sm:$0xff] }
 0x776   : > { %v4305_v34 = vpop.eup %4304 }
 0x777   : > { %v2481_v43 = vmul.f32 %v4305_v34, %v2480_v53  ;;  %v344_v53 = vld [vmem:[%s6471_s0 + $0x400] sm:$0xff]  ;;  %v343_v34 = vld [vmem:[%s6471_s0 + $0x3f8] sm:$0xff] }
 0x778   : > { %v4307_v37 = vpop.eup %4306 }
 0x779   : > { %v2482_v19 = vadd.f32 %v2481_v43, %v2479_v60  ;;  %v2484_v20 = vsub.f32 1.0, %v4307_v37  ;;  %v2486_v23 = vmul.f32 %v4307_v37, %v5931_v24  ;;  %v4361_v24 = vld [vmem:[%s6472_s1 + $0x338] sm:$0xff]  ;;  %v342_v60 = vld [vmem:[%s6471_s0 + $0x3f0] sm:$0xff]  ;;  %v341_v43 = vld [vmem:[%s6471_s0 + $0x3e8] sm:$0xff] }
 0x77a   : > { %v339_v37 = vld [vmem:[%s6471_s0 + $0x3d8] sm:$0xff] }
 0x77b   : > { %4308 = vtanh.f32 %v2482_v19  ;;  %v340_v19 = vld [vmem:[%s6471_s0 + $0x3e0] sm:$0xff] }
 0x788   : > { %v4309_v22 = vpop.eup %4308 }
 0x789   : > { %v2485_v49 = vmul.f32 %v4309_v22, %v2484_v20  ;;  %v371_v20 = vld [vmem:[%s6471_s0 + $0x4d8] sm:$0xff]  ;;  %v370_v22 = vld [vmem:[%s6471_s0 + $0x4d0] sm:$0xff] }
 0x78b   : > { %v6128_v54 = vadd.f32 %v2486_v23, %v2485_v49  ;;  %v369_v49 = vld [vmem:[%s6471_s0 + $0x4c8] sm:$0xff]  ;;  %v368_v23 = vld [vmem:[%s6471_s0 + $0x4c0] sm:$0xff] }
 0x78d   : > { %2553 = vmatmul.mubr.f32.vlgmr.msra.gmra.mxu0 %v6128_v54  ;;  %2624 = vmatmul.mubr.f32.vlgmr.msra.gmra.mxu1 %v6128_v54 }
 0x78e   : > { %4097 = vmatpush3.msra.mxu0 %v5445_v50  ;;  %4128 = vmatprep.mubr.msk.f32.mxu0 %vm4393_vm2, %v6620_v3  ;;  %v4362_v50 = vld [vmem:[%s6472_s1 + $0x330] sm:$0xff] }
 0x78f   : > { %4098 = vmatprep.subr.mxu0 %v6620_v3  ;;  %2704 = vmatpush1.msra.mxu1 %v4360_v44  ;;  %v367_v44 = vld [vmem:[%s6471_s0 + $0x4b8] sm:$0xff] }
 0x790   : > { %4099 = vmatpush3.msra.mxu0 %v5447_v48  ;;  %2705 = vmatprep.subr.mxu1 %v4361_v24  ;;  %v4364_v48 = vld [vmem:[%s6472_s1 + $0x2f8] sm:$0xff]  ;;  %v366_v24 = vld [vmem:[%s6471_s0 + $0x4b0] sm:$0xff] }
 0x791   : > { %4100 = vmatprep.subr.mxu0 %v6620_v3  ;;  %2706 = vmatpush1.msra.mxu1 %v4362_v50  ;;  %v365_v50 = vld [vmem:[%s6471_s0 + $0x4a8] sm:$0xff] }
 0x792   : > { %4101 = vmatpush3.msra.mxu0 %v5451_v2  ;;  %2707 = vmatprep.subr.mxu1 %v4363_v62  ;;  %v4366_v2 = vld [vmem:[%s6472_s1 + $0x2c0] sm:$0xff] }
 0x793   : > { %4102 = vmatprep.subr.mxu0 %v6620_v3  ;;  %2708 = vmatpush1.msra.mxu1 %v4364_v48  ;;  %v364_v62 = vld [vmem:[%s6471_s0 + $0x4a0] sm:$0xff]  ;;  %v363_v48 = vld [vmem:[%s6471_s0 + $0x498] sm:$0xff] }
 0x794   : > { %4103 = vmatpush3.msra.mxu0 %v5455_v39  ;;  %2709 = vmatprep.subr.mxu1 %v4365_v56  ;;  %v4368_v39 = vld [vmem:[%s6472_s1 + $0x288] sm:$0xff]  ;;  %v362_v56 = vld [vmem:[%s6471_s0 + $0x490] sm:$0xff] }
 0x795   : > { %4104 = vmatprep.subr.mxu0 %v6620_v3  ;;  %2710 = vmatpush1.msra.mxu1 %v4366_v2  ;;  %v361_v2 = vld [vmem:[%s6471_s0 + $0x488] sm:$0xff] }
 0x796   : > { %4105 = vmatpush3.msra.mxu0 %v5459_v40  ;;  %2711 = vmatprep.subr.mxu1 %v4367_v52  ;;  %v4370_v40 = vld [vmem:[%s6472_s1 + $0x250] sm:$0xff]  ;;  %v360_v52 = vld [vmem:[%s6471_s0 + $0x480] sm:$0xff] }
 0x797   : > { %4106 = vmatprep.subr.mxu0 %v6620_v3  ;;  %2712 = vmatpush1.msra.mxu1 %v4368_v39  ;;  %v359_v39 = vld [vmem:[%s6471_s0 + $0x478] sm:$0xff] }
 0x798   : > { %4107 = vmatpush3.msra.mxu0 %v5463_v4  ;;  %2713 = vmatprep.subr.mxu1 %v4369_v51  ;;  %v4372_v4 = vld [vmem:[%s6472_s1 + $0x218] sm:$0xff] }
 0x799   : > { %4108 = vmatprep.subr.mxu0 %v6620_v3  ;;  %2714 = vmatpush1.msra.mxu1 %v4370_v40 }
 0x79a   : > { %4109 = vmatpush3.msra.mxu0 %v5467_v5  ;;  %2715 = vmatprep.subr.mxu1 %v4371_v27  ;;  %v4374_v5 = vld [vmem:[%s6472_s1 + $0x1e0] sm:$0xff] }
 0x79b   : > { %4110 = vmatprep.subr.mxu0 %v6620_v3  ;;  %2716 = vmatpush1.msra.mxu1 %v4372_v4 }
 0x79c   : > { %4111 = vmatpush3.msra.mxu0 %v5471_v29  ;;  %2717 = vmatprep.subr.mxu1 %v4373_v45  ;;  %v4376_v29 = vld [vmem:[%s6472_s1 + $0x1a8] sm:$0xff] }
 0x79d   : > { %4112 = vmatprep.subr.mxu0 %v6620_v3  ;;  %2718 = vmatpush1.msra.mxu1 %v4374_v5 }
 0x79e   : > { %4113 = vmatpush3.msra.mxu0 %v5475_v8  ;;  %2719 = vmatprep.subr.mxu1 %v4375_v17  ;;  %v4378_v8 = vld [vmem:[%s6472_s1 + $0x170] sm:$0xff] }
 0x79f   : > { %4114 = vmatprep.subr.mxu0 %v6620_v3  ;;  %2720 = vmatpush1.msra.mxu1 %v4376_v29 }
 0x7a0   : > { %4115 = vmatpush3.msra.mxu0 %v5479_v6  ;;  %2721 = vmatprep.subr.mxu1 %v4377_v13  ;;  %v4380_v6 = vld [vmem:[%s6472_s1 + $0x138] sm:$0xff] }
 0x7a1   : > { %4116 = vmatprep.subr.mxu0 %v6620_v3  ;;  %2722 = vmatpush1.msra.mxu1 %v4378_v8 }
 0x7a2   : > { %4117 = vmatpush3.msra.mxu0 %v5483_v7  ;;  %2723 = vmatprep.subr.mxu1 %v4379_v38  ;;  %v4382_v7 = vld [vmem:[%s6472_s1 + $0x100] sm:$0xff] }
 0x7a3   : > { %4118 = vmatprep.subr.mxu0 %v6620_v3  ;;  %2724 = vmatpush1.msra.mxu1 %v4380_v6 }
 0x7a4   : > { %4119 = vmatpush3.msra.mxu0 %v5487_v47  ;;  %2725 = vmatprep.subr.mxu1 %v4381_v46  ;;  %v6738_v47 = vld [vmem:[#allocation51_spill] sm:$0xff] }
 0x7a5   : > { %4120 = vmatprep.subr.mxu0 %v6620_v3  ;;  %2726 = vmatpush1.msra.mxu1 %v4382_v7 }
 0x7a6   : > { %4121 = vmatpush3.msra.mxu0 %v5492_v25  ;;  %2727 = vmatprep.subr.mxu1 %v4383_v15  ;;  %v6739_v25 = vld [vmem:[#allocation52_spill] sm:$0xff] }
 0x7a7   : > { %4122 = vmatprep.subr.mxu0 %v6620_v3  ;;  %2728 = vmatpush1.msra.mxu1 %v5603_v33 }
 0x7a8   : > { %4123 = vmatpush3.msra.mxu0 %v5497_v36  ;;  %2729 = vmatprep.subr.mxu1 %v5615_v59  ;;  %v6740_v36 = vld [vmem:[#allocation53_spill] sm:$0xff] }
 0x7a9   : > { %4124 = vmatprep.subr.mxu0 %v6620_v3  ;;  %2730 = vmatpush1.msra.mxu1 %v5622_v26 }
 0x7aa   : > { %4125 = vmatpush3.msra.mxu0 %v5502_v1  ;;  %2731 = vmatprep.subr.mxu1 %v5634_v31  ;;  %v6741_v1 = vld [vmem:[#allocation54_spill] sm:$0xff] }
 0x7ab   : > { %4126 = vmatprep.subr.mxu0 %v6620_v3  ;;  %2732 = vmatpush1.msra.mxu1 %v5641_v0  ;;  %v354_v0 = vld [vmem:[%s6471_s0 + $0x450] sm:$0xff] }
 0x7ac   : > { %4127 = vmatpush3.msra.mxu0 %v5507_v9  ;;  %2733 = vmatprep.subr.mxu1 %v5653_v42  ;;  %v6742_v9 = vld [vmem:[#allocation55_spill] sm:$0xff] }
 0x7ad   : > { %4129 = vmatmul.mubr.f32.vlgmr.msra.gmra.mxu0 %v6128_v54  ;;  %4131 = vmatprep.subr.mxu0 %v6620_v3 }
 0x7ae   : > { %4132 = vmatpush3.msra.mxu0 %v5514_v11  ;;  %2734 = vmatpush1.msra.mxu1 %v5660_v41  ;;  %v6743_v11 = vld [vmem:[#allocation56_spill] sm:$0xff] }
 0x7af   : > { %4133 = vmatprep.subr.mxu0 %v6620_v3  ;;  %2767 = vmatprep.mubr.f32.mxu1 %v6620_v3 }
 0x7b0   : > { %4134 = vmatpush3.msra.mxu0 %v5522_v21  ;;  %4163 = vmatprep.mubr.msk.f32.mxu0 %vm4393_vm2, %v6620_v3  ;;  %v6744_v21 = vld [vmem:[#allocation58_spill] sm:$0xff] }
 0x7b1   : > { %4135 = vmatprep.subr.mxu0 %v6620_v3  ;;  %4166 = vmatprep.subr.mxu1 %v6620_v3 }
 0x7b2   : > { %4136 = vmatpush3.msra.mxu0 %v5531_v14 }
 0x7b3   : > { %4137 = vmatprep.subr.mxu0 %v6620_v3 }
 0x7b4   : > { %4138 = vmatpush3.msra.mxu0 %v6685_v35  ;;  %v352_v35 = vld [vmem:[%s6471_s0 + $0x440] sm:$0xff] }
 0x7b5   : > { %4139 = vmatprep.subr.mxu0 %v6620_v3 }
 0x7b6   : > { %4140 = vmatpush3.msra.mxu0 %v6686_v18  ;;  %v351_v18 = vld [vmem:[%s6471_s0 + $0x438] sm:$0xff] }
 0x7b7   : > { %4141 = vmatprep.subr.mxu0 %v6620_v3 }
 0x7b8   : > { %4142 = vmatpush3.msra.mxu0 %v6687_v57  ;;  %v350_v57 = vld [vmem:[%s6471_s0 + $0x430] sm:$0xff] }
 0x7b9   : > { %4143 = vmatprep.subr.mxu0 %v6620_v3 }
 0x7ba   : > { %4144 = vmatpush3.msra.mxu0 %v6688_v61  ;;  %v349_v61 = vld [vmem:[%s6471_s0 + $0x428] sm:$0xff] }
 0x7bb   : > { %4145 = vmatprep.subr.mxu0 %v6620_v3 }
 0x7bc   : > { %4146 = vmatpush3.msra.mxu0 %v6689_v28  ;;  %v348_v28 = vld [vmem:[%s6471_s0 + $0x420] sm:$0xff] }
 0x7bd   : > { %4147 = vmatprep.subr.mxu0 %v6620_v3 }
 0x7be   : > { %4148 = vmatpush3.msra.mxu0 %v6738_v47 }
 0x7bf   : > { %4149 = vmatprep.subr.mxu0 %v6620_v3 }
 0x7c0   : > { %4150 = vmatpush3.msra.mxu0 %v6739_v25 }
 0x7c1   : > { %4151 = vmatprep.subr.mxu0 %v6620_v3 }
 0x7c2   : > { %4152 = vmatpush3.msra.mxu0 %v6740_v36 }
 0x7c3   : > { %4153 = vmatprep.subr.mxu0 %v6620_v3 }
 0x7c4   : > { %4154 = vmatpush3.msra.mxu0 %v6741_v1 }
 0x7c5   : > { %4155 = vmatprep.subr.mxu0 %v6620_v3 }
 0x7c6   : > { %4156 = vmatpush3.msra.mxu0 %v6742_v9 }
 0x7c7   : > { %4157 = vmatprep.subr.mxu0 %v6620_v3 }
 0x7c8   : > { %4158 = vmatpush3.msra.mxu0 %v6743_v11 }
 0x7c9   : > { %4159 = vmatprep.subr.mxu0 %v6620_v3 }
 0x7ca   : > { %4160 = vmatpush3.msra.mxu0 %v6696_v32  ;;  %v347_v32 = vld [vmem:[%s6471_s0 + $0x418] sm:$0xff] }
 0x7cb   : > { %4161 = vmatprep.subr.mxu0 %v6620_v3 }
 0x7cc   : > { %4162 = vmatpush3.msra.mxu0 %v6744_v21 }
 0x7cd   : > { %4201 = vmatprep.subr.mxu0 %v6620_v3 }
 0x84d   : > { %v2554_v14 = vpop.f32.mrf.mxu0  ;;  %v2625_v51 = vpop.f32.mrf.mxu1 }
 0x84f   : > { %v6282_v33 = vpop.f32.mrf.mxu0  ;;  %v2627_v40 = vpop.f32.mrf.mxu1 }
 0x850   : > { %v2861_v25 = vadd.f32 %v2627_v40, %v5921_v58  ;;  %v358_v58 = vld [vmem:[%s6471_s0 + $0x470] sm:$0xff] }
 0x86d   : > { %v2696_v41 = vpop.f32.mrf.mxu0 }
 0x86e   : > { %v2700_v59 = vadd.f32 %v2696_v41, %v2554_v14 }
 0x86f   : > { %v4130_v26 = vpop.f32.mrf.mxu0 }
 0x870   : > { %v2701_v42 = vadd.f32 %v2700_v59, %v5681_v55  ;;  %v353_v55 = vld [vmem:[%s6471_s0 + $0x448] sm:$0xff]  ;;  %v511_v59 = vld [vmem:[%s4451_s30 + $0xa0] sm:$0xff]  ;;  %v510_v26 = vld [vmem:[%s4451_s30 + $0x98] sm:$0xff] }
 0x872   : > { %v2702_v31 = vmax.f32 %v2701_v42, 0.0  ;;  %v509_v42 = vld [vmem:[%s4451_s30 + $0x90] sm:$0xff] }
 0x874   : > { %2768 = vmatmul.mubr.f32.vlgmr.msra.gmra.mxu1 %v2702_v31  ;;  %4164 = vmatmul.mubr.f32.vlgmr.msra.gmra.mxu0 %v2702_v31  ;;  %v508_v31 = vld [vmem:[%s4451_s30 + $0x88] sm:$0xff] }
 0x875   : > { %4198 = vmatprep.mubr.msk.f32.mxu1 %vm4393_vm2, %v6620_v3  ;;  %4233 = vmatprep.mubr.msk.f32.mxu0 %vm4393_vm2, %v6620_v3 }
 0x876   : > { %4167 = vmatpush3.msra.mxu1 %v354_v0  ;;  %4202 = vmatpush3.msra.mxu0 %v371_v20  ;;  %v507_v0 = vld [vmem:[%s4451_s30 + $0x80] sm:$0xff]  ;;  %v496_v20 = vld [vmem:[%s4451_s30 + $0x28] sm:$0xff] }
 0x877   : > { %4168 = vmatprep.subr.mxu1 %v6620_v3  ;;  %4203 = vmatprep.subr.mxu0 %v6620_v3 }
 0x878   : > { %4169 = vmatpush3.msra.mxu1 %v353_v55  ;;  %4204 = vmatpush3.msra.mxu0 %v370_v22  ;;  %v506_v55 = vld [vmem:[%s4451_s30 + $0x78] sm:$0xff]  ;;  %v372_v22 = vld [vmem:[%s6471_s0 + $0x4e0] sm:$0x1] }
 0x879   : > { %4170 = vmatprep.subr.mxu1 %v6620_v3  ;;  %4205 = vmatprep.subr.mxu0 %v6620_v3 }
 0x87a   : > { %4171 = vmatpush3.msra.mxu1 %v352_v35  ;;  %4206 = vmatpush3.msra.mxu0 %v369_v49  ;;  %v505_v35 = vld [vmem:[%s4451_s30 + $0x70] sm:$0xff] }
 0x87b   : > { %4172 = vmatprep.subr.mxu1 %v6620_v3  ;;  %4207 = vmatprep.subr.mxu0 %v6620_v3 }
 0x87c   : > { %4173 = vmatpush3.msra.mxu1 %v351_v18  ;;  %4208 = vmatpush3.msra.mxu0 %v368_v23  ;;  %v504_v18 = vld [vmem:[%s4451_s30 + $0x68] sm:$0xff] }
 0x87d   : > { %4174 = vmatprep.subr.mxu1 %v6620_v3  ;;  %4209 = vmatprep.subr.mxu0 %v6620_v3 }
 0x87e   : > { %4175 = vmatpush3.msra.mxu1 %v350_v57  ;;  %4210 = vmatpush3.msra.mxu0 %v367_v44  ;;  %v503_v57 = vld [vmem:[%s4451_s30 + $0x60] sm:$0xff] }
 0x87f   : > { %4176 = vmatprep.subr.mxu1 %v6620_v3  ;;  %4211 = vmatprep.subr.mxu0 %v6620_v3 }
 0x880   : > { %4177 = vmatpush3.msra.mxu1 %v349_v61  ;;  %4212 = vmatpush3.msra.mxu0 %v366_v24  ;;  %v502_v61 = vld [vmem:[%s4451_s30 + $0x58] sm:$0xff]  ;;  %v3080_v24 = vlaneseq }
 0x881   : > { %4178 = vmatprep.subr.mxu1 %v6620_v3  ;;  %4213 = vmatprep.subr.mxu0 %v6620_v3 }
 0x882   : > { %4179 = vmatpush3.msra.mxu1 %v348_v28  ;;  %4214 = vmatpush3.msra.mxu0 %v365_v50  ;;  %v501_v28 = vld [vmem:[%s4451_s30 + $0x50] sm:$0xff]  ;;  %v3081_v50 = vshrl.u32 %v3080_v24, 7 }
 0x883   : > { %4180 = vmatprep.subr.mxu1 %v6620_v3  ;;  %4215 = vmatprep.subr.mxu0 %v6620_v3 }
 0x884   : > { %4181 = vmatpush3.msra.mxu1 %v347_v32  ;;  %4216 = vmatpush3.msra.mxu0 %v364_v62  ;;  %v500_v32 = vld [vmem:[%s4451_s30 + $0x48] sm:$0xff] }
 0x885   : > { %4182 = vmatprep.subr.mxu1 %v6620_v3  ;;  %4217 = vmatprep.subr.mxu0 %v6620_v3  ;;  %v373_v62 = vld [vmem:[%s6471_s0 + $0x4e8] sm:$0x1] }
 0x886   : > { %4183 = vmatpush3.msra.mxu1 %v346_v10  ;;  %4218 = vmatpush3.msra.mxu0 %v363_v48  ;;  %v499_v10 = vld [vmem:[%s4451_s30 + $0x40] sm:$0xff]  ;;  %v3082_v48 = vsub.s32 0, %v3081_v50 }
 0x887   : > { %4184 = vmatprep.subr.mxu1 %v6620_v3  ;;  %4219 = vmatprep.subr.mxu0 %v6620_v3 }
 0x888   : > { %4185 = vmatpush3.msra.mxu1 %v345_v16  ;;  %4220 = vmatpush3.msra.mxu0 %v362_v56  ;;  %v498_v16 = vld [vmem:[%s4451_s30 + $0x38] sm:$0xff] }
 0x889   : > { %4186 = vmatprep.subr.mxu1 %v6620_v3  ;;  %4221 = vmatprep.subr.mxu0 %v6620_v3 }
 0x88a   : > { %4187 = vmatpush3.msra.mxu1 %v344_v53  ;;  %4222 = vmatpush3.msra.mxu0 %v361_v2  ;;  %v355_v53 = vld [vmem:[%s6471_s0 + $0x458] sm:$0x1] }
 0x88b   : > { %4188 = vmatprep.subr.mxu1 %v6620_v3  ;;  %4223 = vmatprep.subr.mxu0 %v6620_v3 }
 0x88c   : > { %4189 = vmatpush3.msra.mxu1 %v343_v34  ;;  %4224 = vmatpush3.msra.mxu0 %v360_v52 }
 0x88d   : > { %4190 = vmatprep.subr.mxu1 %v6620_v3  ;;  %4225 = vmatprep.subr.mxu0 %v6620_v3 }
 0x88e   : > { %4191 = vmatpush3.msra.mxu1 %v342_v60  ;;  %4226 = vmatpush3.msra.mxu0 %v359_v39 }
 0x88f   : > { %4192 = vmatprep.subr.mxu1 %v6620_v3  ;;  %4227 = vmatprep.subr.mxu0 %v6620_v3 }
 0x890   : > { %4193 = vmatpush3.msra.mxu1 %v341_v43  ;;  %4228 = vmatpush3.msra.mxu0 %v358_v58 }
 0x891   : > { %4194 = vmatprep.subr.mxu1 %v6620_v3  ;;  %4229 = vmatprep.subr.mxu0 %v6620_v3 }
 0x892   : > { %4195 = vmatpush3.msra.mxu1 %v340_v19 }
 0x893   : > { %4196 = vmatprep.subr.mxu1 %v6620_v3 }
 0x894   : > { %4197 = vmatpush3.msra.mxu1 %v339_v37  ;;  %v497_v37 = vld [vmem:[%s4451_s30 + $0x30] sm:$0xff] }
 0x895   : > { %4236 = vmatprep.subr.mxu1 %v6620_v3 }
 0x934   : > { %v2769_v27 = vpop.f32.mrf.mxu1  ;;  %v2840_v4 = vpop.f32.mrf.mxu0 }
 0x935   : > { %v2844_v45 = vadd.f32 %v2769_v27, %v6282_v33  ;;  %v2860_v1 = vadd.f32 %v2840_v4, %v5926_v30  ;;  %v357_v30 = vld [vmem:[%s6471_s0 + $0x468] sm:$0xff] }
 0x936   : > { %v2771_v5 = vpop.f32.mrf.mxu1  ;;  %v4165_v17 = vpop.f32.mrf.mxu0  ;;  %4230 = vmatpush3.msra.mxu0 %v357_v30 }
 0x937   : > { %v2845_v29 = vadd.f32 %v2844_v45, %v5908_v63  ;;  %v2852_v8 = vadd.f32 %v2771_v5, %v2625_v51  ;;  %4231 = vmatprep.subr.mxu0 %v6620_v3 }
 0x939   : > { %v3202_v13 = vmul.f32 -1.442695, %v2845_v29  ;;  %v2853_v38 = vadd.f32 %v2852_v8, %v6737_v12 }
 0x93b   : > { %4310 = vpow2.f32 %v3202_v13  ;;  %v3203_v6 = vmul.f32 -1.442695, %v2853_v38 }
 0x93d   : > { %4312 = vpow2.f32 %v3203_v6 }
 0x948   : > { %v4311_v46 = vpop.eup %4310 }
 0x949   : > { %v2849_v7 = vadd.f32 1.0, %v4311_v46 }
 0x94a   : > { %v4313_v15 = vpop.eup %4312 }
 0x94b   : > { %4314 = vrcp.f32 %v2849_v7  ;;  %v2857_v47 = vadd.f32 1.0, %v4313_v15 }
 0x94d   : > { %4316 = vrcp.f32 %v2857_v47 }
 0x958   : > { %v4315_v36 = vpop.eup %4314 }
 0x959   : > { %v2862_v9 = vmul.f32 %v4315_v36, %v2861_v25 }
 0x95a   : > { %v4317_v11 = vpop.eup %4316 }
 0x95b   : > { %v2863_v63 = vadd.f32 %v2862_v9, %v2860_v1  ;;  %v2865_v21 = vsub.f32 1.0, %v4317_v11  ;;  %v2867_v33 = vmul.f32 %v4317_v11, %v6128_v54  ;;  %v356_v54 = vld [vmem:[%s6471_s0 + $0x460] sm:$0xff] }
 0x95c   : > { %4232 = vmatpush3.msra.mxu0 %v356_v54 }
 0x95d   : > { %4318 = vtanh.f32 %v2863_v63 }
 0x96a   : > { %v4319_v12 = vpop.eup %4318 }
 0x96b   : > { %v2866_v14 = vmul.f32 %v4319_v12, %v2865_v21 }
 0x96d   : > { %v2868_v41 = vadd.f32 %v2867_v33, %v2866_v14 }
 0x96f   : > { %4199 = vmatmul.mubr.f32.vlgmr.msra.gmra.mxu1 %v2868_v41 }
 0x970   : > { %4268 = vmatprep.mubr.msk.f32.mxu1 %vm4393_vm2, %v6620_v3  ;;  %4237 = vmatpush3.msra.mxu1 %v511_v59 }
 0x971   : > { %4238 = vmatprep.subr.mxu1 %v6620_v3 }
 0x972   : > { %4239 = vmatpush3.msra.mxu1 %v510_v26 }
 0x973   : > { %4240 = vmatprep.subr.mxu1 %v6620_v3 }
 0x974   : > { %4241 = vmatpush3.msra.mxu1 %v509_v42 }
 0x975   : > { %4242 = vmatprep.subr.mxu1 %v6620_v3 }
 0x976   : > { %4243 = vmatpush3.msra.mxu1 %v508_v31 }
 0x977   : > { %4244 = vmatprep.subr.mxu1 %v6620_v3 }
 0x978   : > { %4245 = vmatpush3.msra.mxu1 %v507_v0 }
 0x979   : > { %4246 = vmatprep.subr.mxu1 %v6620_v3 }
 0x97a   : > { %4247 = vmatpush3.msra.mxu1 %v506_v55 }
 0x97b   : > { %4248 = vmatprep.subr.mxu1 %v6620_v3 }
 0x97c   : > { %4249 = vmatpush3.msra.mxu1 %v505_v35 }
 0x97d   : > { %4250 = vmatprep.subr.mxu1 %v6620_v3 }
 0x97e   : > { %4251 = vmatpush3.msra.mxu1 %v504_v18 }
 0x97f   : > { %4252 = vmatprep.subr.mxu1 %v6620_v3 }
 0x980   : > { %4253 = vmatpush3.msra.mxu1 %v503_v57 }
 0x981   : > { %4254 = vmatprep.subr.mxu1 %v6620_v3 }
 0x982   : > { %4255 = vmatpush3.msra.mxu1 %v502_v61 }
 0x983   : > { %4256 = vmatprep.subr.mxu1 %v6620_v3 }
 0x984   : > { %4257 = vmatpush3.msra.mxu1 %v501_v28 }
 0x985   : > { %4258 = vmatprep.subr.mxu1 %v6620_v3 }
 0x986   : > { %4259 = vmatpush3.msra.mxu1 %v500_v32 }
 0x987   : > { %4260 = vmatprep.subr.mxu1 %v6620_v3 }
 0x988   : > { %4261 = vmatpush3.msra.mxu1 %v499_v10 }
 0x989   : > { %4262 = vmatprep.subr.mxu1 %v6620_v3 }
 0x98a   : > { %4263 = vmatpush3.msra.mxu1 %v498_v16 }
 0x98b   : > { %4264 = vmatprep.subr.mxu1 %v6620_v3 }
 0x98c   : > { %4265 = vmatpush3.msra.mxu1 %v497_v37 }
 0x98d   : > { %4266 = vmatprep.subr.mxu1 %v6620_v3 }
 0x98e   : > { %4267 = vmatpush3.msra.mxu1 %v496_v20 }
 0xa2f   : > { %v2935_v34 = vpop.f32.mrf.mxu1 }
 0xa30   : > { %v2936_v60 = vadd.f32 %v2935_v34, %v355_v53 }
 0xa31   : > { %v4200_v43 = vpop.f32.mrf.mxu1 }
 0xa32   : > { %v2939_v19 = vmax.f32 %v2936_v60, 0.0 }
 0xa34   : > { %4234 = vmatmul.mubr.f32.vlgmr.msra.gmra.mxu0 %v2939_v19 }
 0xaf4   : > { %v3006_v49 = vpop.f32.mrf.mxu0 }
 0xaf5   : > { %v3007_v23 = vadd.f32 %v3006_v49, %v372_v22 }
 0xaf6   : > { %v4235_v44 = vpop.f32.mrf.mxu0 }
 0xaf7   : > { %4269 = vmatmul.mubr.f32.vlgmr.msra.gmra.mxu1 %v3007_v23 }
 0xbb7   : > { %v3076_v56 = vpop.f32.mrf.mxu1 }
 0xbb8   : > { %v3077_v3 = vadd.f32 %v3076_v56, %v373_v62 }
 0xbb9   : > { %v4270_v2 = vpop.f32.mrf.mxu1 }
 0xbba   : > { %v3083_v52 = vrot.slane %v3077_v3, %v3082_v48 }
 0xbbc   : > { %3084 = vst [vmem:[%s215_s14] sm:$0xff] %v3083_v52 }
 0xbbd PF: > { %s14_s15 = sadd.s32 1, %s4390_s15  }
 0xbbe   : > { %p11_p4 = scmp.ge.s32.totalorder %s14_s15, 10  }
 0xbc0   :  { %13 = sbr.rel (!%p11_p4) target bundleno = 1 (0x1), region = 69 }

</bundles_post_ra>
